<compile_context>
chip_gen: v7x
topology: tpu7x:2x2x1
jax: 0.10.0
libtpu: 0.0.40
codegen_flags: <defaults>
</compile_context>

<pallas_src>
import functools
import math

import jax
import jax.numpy as jnp
from jax.experimental import pallas as pl
from jax.experimental.pallas import tpu as pltpu


# -----------------------------------------------------------------------------
# Shared math helpers (used both inside the kernel and in the pure-JAX reference)
# -----------------------------------------------------------------------------

def _layer_norm(x, gamma, beta, eps=1e-5):
    mu = jnp.mean(x, axis=-1, keepdims=True)
    xc = x - mu
    var = jnp.mean(xc * xc, axis=-1, keepdims=True)
    return xc * jax.lax.rsqrt(var + eps) * gamma + beta


def _gelu_tanh(x):
    # TODO(synk): PyTorch F.gelu defaults to the exact erf GELU; the tanh approximation
    # (max abs deviation ~1e-3) is used here because erf has no guaranteed TPU EUP lowering.
    c = math.sqrt(2.0 / math.pi)
    return 0.5 * x * (1.0 + jnp.tanh(c * (x + 0.044715 * x * x * x)))


# -----------------------------------------------------------------------------
# Kernel
# -----------------------------------------------------------------------------

def _attention(xq, xkv, wq_ref, wk_ref, wv_ref, wo_ref, bo_ref, *,
               n_heads, block_b, lq, lk, cdt):
    """Multi-head attention core on batch-flattened rows.

    xq : (block_b*lq, Cq) f32, layer-normed query source (batch-flattened rows)
    xkv: (block_b*lk, Ck) f32 key/value source (may be the same array as xq)
    wq_ref/wk_ref/wv_ref: (H, C, d_head) per-head projection slabs (scale folded into wq)
    wo_ref: (H, d_head, Cf) per-head output-projection slab;  bo_ref: (1, Cf)
    Returns (block_b*lq, Cf) f32.
    """
    cf_out = wo_ref.shape[-1]
    xq_c = xq.astype(cdt)
    xkv_c = xq_c if xkv is xq else xkv.astype(cdt)     # never duplicate work for self-attention

    accs = [jnp.zeros((lq, cf_out), jnp.float32) for _ in range(block_b)]
    for h in range(n_heads):                            # static unroll (n_heads small)
        qh = jnp.dot(xq_c, wq_ref[h].astype(cdt), preferred_element_type=jnp.float32)
        kh = jnp.dot(xkv_c, wk_ref[h].astype(cdt), preferred_element_type=jnp.float32)
        vh = jnp.dot(xkv_c, wv_ref[h].astype(cdt), preferred_element_type=jnp.float32)
        wo_h = wo_ref[h].astype(cdt)
        for b in range(block_b):                        # static unroll (tiny batch block)
            qb = qh[b * lq:(b + 1) * lq]                # sublane slices only (cheap)
            kb = kh[b * lk:(b + 1) * lk]
            vb = vh[b * lk:(b + 1) * lk]
            # scores (lq, lk); 1/sqrt(d_head) already folded into wq at prep time.
            s = jax.lax.dot_general(qb.astype(cdt), kb.astype(cdt),
                                    (((1,), (1,)), ((), ())),
                                    preferred_element_type=jnp.float32)
            s_max = jnp.max(s, axis=-1, keepdims=True)
            p = jnp.exp(s - s_max)                      # unnormalized probs, f32
            denom = jnp.sum(p, axis=-1, keepdims=True)
            ho = jnp.dot(p.astype(cdt), vb.astype(cdt),
                         preferred_element_type=jnp.float32)      # (lq, d_head)
            ho = ho * pl.reciprocal(denom, approx=True)            # deferred softmax normalization
            # Accumulate the head output directly into the output projection (no concat).
            accs[b] = accs[b] + jnp.dot(ho.astype(cdt), wo_h,
                                        preferred_element_type=jnp.float32)
    out = accs[0] if block_b == 1 else jnp.concatenate(accs, axis=0)
    return out + bo_ref[...]


def _transformer_block_kernel(*refs, n_heads, block_b, lq, lk, has_cond, compute_dtype):
    if has_cond:
        x_ref, cond_ref = refs[0], refs[1]
        p_refs = refs[2:-1]
    else:
        x_ref, cond_ref = refs[0], None
        p_refs = refs[1:-1]
    o_ref = refs[-1]
    (g1_ref, b1_ref, wq1_ref, wk1_ref, wv1_ref, wo1_ref, bo1_ref,
     g2_ref, b2_ref, wq2_ref, wk2_ref, wv2_ref, wo2_ref, bo2_ref,
     g3_ref, b3_ref, wfc_ref, bfc_ref, wff_ref, bff_ref) = p_refs

    cdt = compute_dtype
    x = x_ref[...].astype(jnp.float32)                  # (block_b*lq, Cf), batch already folded

    # ---- 1) self-attention + residual ---------------------------------------
    xn = _layer_norm(x, g1_ref[...], b1_ref[...])
    x = x + _attention(xn, xn, wq1_ref, wk1_ref, wv1_ref, wo1_ref, bo1_ref,
                       n_heads=n_heads, block_b=block_b, lq=lq, lk=lq, cdt=cdt)

    # ---- 2) cross-attention (self if cond is None) + residual ---------------
    xn = _layer_norm(x, g2_ref[...], b2_ref[...])
    if has_cond:
        kv = cond_ref[...].astype(jnp.float32)          # (block_b*lk, Cc)
        kv_len = lk
    else:
        kv = xn
        kv_len = lq
    x = x + _attention(xn, kv, wq2_ref, wk2_ref, wv2_ref, wo2_ref, bo2_ref,
                       n_heads=n_heads, block_b=block_b, lq=lq, lk=kv_len, cdt=cdt)

    # ---- 3) feed-forward: GeGLU -> Dropout(eval: identity) -> Linear --------
    xn = _layer_norm(x, g3_ref[...], b3_ref[...])
    h = jnp.dot(xn.astype(cdt), wfc_ref[...].astype(cdt),
                preferred_element_type=jnp.float32) + bfc_ref[...]
    d_ff = wff_ref.shape[0]                             # 128-aligned lane split for Cf=32
    hg = h[:, :d_ff] * _gelu_tanh(h[:, d_ff:])
    # TODO(synk): nn.Dropout(p=0.1) is the identity in eval-mode forward; omitted here.
    ff = jnp.dot(hg.astype(cdt), wff_ref[...].astype(cdt),
                 preferred_element_type=jnp.float32) + bff_ref[...]
    x = x + ff

    o_ref[...] = x.astype(o_ref.dtype)


# -----------------------------------------------------------------------------
# Wrapper
# -----------------------------------------------------------------------------

def basic_transformer_block(x, cond, params, *, n_heads, d_head,
                            batch_block=None, compute_dtype=jnp.float32):
    """Fused BasicTransformerBlock forward.

    x: (B, Lq, feat_channels);  cond: (B, Lk, cond_channels) or None.
    params: output of prepare_params() (pre-transposed / per-head layout, built once).
    batch_block: batches per grid step.  Default B => single grid step (lowest overhead on
      single-TensorCore v5e/v6e).  On v7x (2 TCs/chip) pass B//2 (or 1) so the "parallel"
      grid axis spreads across both cores.
    compute_dtype: dtype of matmul inputs (accumulation & softmax/LayerNorm stay f32).
      Use jnp.bfloat16 on v6e/v7x for MXU-native throughput.
    """
    B, Lq, Cf = x.shape
    if batch_block is None:
        batch_block = B
    assert B % batch_block == 0, "batch_block must divide the batch size"
    grid = (B // batch_block,)

    a1 = params["attn1"]
    assert a1["wq"].shape[0] == n_heads and a1["wq"].shape[2] == d_head

    has_cond = cond is not None
    if has_cond:
        Lk, Cc = cond.shape[1], cond.shape[2]
        a2 = params["attn2_cross"]
    else:
        Lk, Cc = Lq, Cf
        a2 = params["attn2_self"]

    # Batch folding: (B, L, C) -> (B*L, C); contiguous reshape, free on the HBM side.
    x2 = x.reshape(B * Lq, Cf)

    param_args = (
        params["g1"], params["b1"],
        a1["wq"], a1["wk"], a1["wv"], a1["wo"], a1["bo"],
        params["g2"], params["b2"],
        a2["wq"], a2["wk"], a2["wv"], a2["wo"], a2["bo"],
        params["g3"], params["b3"],
        params["ff_wfc"], params["ff_bfc"], params["ff_wff"], params["ff_bff"],
    )

    def resident_spec(arr):
        # Whole array, same block every grid step -> DMA'd once, stays resident in VMEM.
        return pl.BlockSpec(arr.shape, lambda i, _nd=arr.ndim: (0,) * _nd)

    x_spec = pl.BlockSpec((batch_block * Lq, Cf), lambda i: (i, 0))

    if has_cond:
        cond2 = cond.reshape(B * Lk, Cc)
        cond_spec = pl.BlockSpec((batch_block * Lk, Cc), lambda i: (i, 0))
        in_specs = [x_spec, cond_spec] + [resident_spec(a) for a in param_args]
        args = (x2, cond2) + param_args
    else:
        in_specs = [x_spec] + [resident_spec(a) for a in param_args]
        args = (x2,) + param_args

    kernel = functools.partial(
        _transformer_block_kernel,
        n_heads=n_heads, block_b=batch_block, lq=Lq, lk=Lk,
        has_cond=has_cond, compute_dtype=compute_dtype)

    out2 = pl.pallas_call(
        kernel,
        out_shape=jax.ShapeDtypeStruct((B * Lq, Cf), x.dtype),
        grid_spec=pltpu.PrefetchScalarGridSpec(
            num_scalar_prefetch=0,
            grid=grid,
            in_specs=in_specs,
            out_specs=x_spec,
        ),
        compiler_params=pltpu.CompilerParams(
            dimension_semantics=("parallel",)),
    )(*args)
    return out2.reshape(B, Lq, Cf)


# -----------------------------------------------------------------------------
# Parameters
# -----------------------------------------------------------------------------

def init_params(key, feat_channels, cond_channels, n_heads, d_head):
    """Synthetic parameters in PyTorch nn.Linear / nn.LayerNorm layout ((out, in) weights)."""
    d_attn = n_heads * d_head
    d_ff = 4 * feat_channels
    keys = iter(jax.random.split(key, 24))

    def lin_w(out_f, in_f):
        bound = 1.0 / math.sqrt(in_f)
        return jax.random.uniform(next(keys), (out_f, in_f), jnp.float32, -bound, bound)

    def lin_b(out_f, in_f):
        bound = 1.0 / math.sqrt(in_f)
        return jax.random.uniform(next(keys), (out_f,), jnp.float32, -bound, bound)

    def ln(n):
        w = 1.0 + 0.1 * jax.random.normal(next(keys), (n,), jnp.float32)
        b = 0.1 * jax.random.normal(next(keys), (n,), jnp.float32)
        return w, b

    def attn(cond_ch):
        return {
            "q": lin_w(d_attn, feat_channels),
            "k_cond": lin_w(d_attn, cond_ch),
            "k_x": lin_w(d_attn, feat_channels),
            "v_cond": lin_w(d_attn, cond_ch),
            "v_x": lin_w(d_attn, feat_channels),
            "to_out_w": lin_w(feat_channels, d_attn),
            "to_out_b": lin_b(feat_channels, d_attn),
        }

    n1w, n1b = ln(feat_channels)
    n2w, n2b = ln(feat_channels)
    n3w, n3b = ln(feat_channels)
    return {
        "attn1": attn(feat_channels),       # attn1 is built with cond_channels == feat_channels
        "attn2": attn(cond_channels),
        "norm1_w": n1w, "norm1_b": n1b,
        "norm2_w": n2w, "norm2_b": n2b,
        "norm3_w": n3w, "norm3_b": n3b,
        "ff_fc_w": lin_w(2 * d_ff, feat_channels),
        "ff_fc_b": lin_b(2 * d_ff, feat_channels),
        "ff_out_w": lin_w(feat_channels, d_ff),
        "ff_out_b": lin_b(feat_channels, d_ff),
    }


def prepare_params(params, *, n_heads, d_head):
    """One-time conversion of PyTorch-shaped parameters into the kernel layout:
    pre-transposed weights, per-head (H, in, d_head)/(H, d_head, out) slabs, 2-D biases,
    and the 1/sqrt(d_head) attention scale folded into the query projection.
    Run once (e.g. at model load) -- the per-call wrapper does no weight reshaping."""
    scale = float(d_head) ** -0.5

    def heads_in(w):          # (H*d_head, in) -> (H, in, d_head):  x @ w_h == (x @ W.T)[:, head h]
        return jnp.transpose(w.reshape(n_heads, d_head, w.shape[1]), (0, 2, 1))

    def heads_out(w):         # (out, H*d_head) -> (H, d_head, out)
        return jnp.transpose(w.reshape(w.shape[0], n_heads, d_head), (1, 2, 0))

    def prep_attn(a, kv):     # kv in {"x", "cond"} selects which K/V weight pair is used
        return {
            "wq": heads_in(a["q"]) * scale,   # attention scale folded in (one-time)
            "wk": heads_in(a["k_" + kv]),
            "wv": heads_in(a["v_" + kv]),
            "wo": heads_out(a["to_out_w"]),
            "bo": a["to_out_b"].reshape(1, -1),
        }

    return {
        "g1": params["norm1_w"].reshape(1, -1), "b1": params["norm1_b"].reshape(1, -1),
        "g2": params["norm2_w"].reshape(1, -1), "b2": params["norm2_b"].reshape(1, -1),
        "g3": params["norm3_w"].reshape(1, -1), "b3": params["norm3_b"].reshape(1, -1),
        "attn1": prep_attn(params["attn1"], "x"),           # attn1 is always self-attention
        "attn2_cross": prep_attn(params["attn2"], "cond"),
        "attn2_self": prep_attn(params["attn2"], "x"),
        "ff_wfc": params["ff_fc_w"].T,                       # (Cf, 2*d_ff)
        "ff_bfc": params["ff_fc_b"].reshape(1, -1),
        "ff_wff": params["ff_out_w"].T,                      # (d_ff, Cf)
        "ff_bff": params["ff_out_b"].reshape(1, -1),
    }


# -----------------------------------------------------------------------------
# Pure-JAX reference (mirrors the PyTorch forward, eval mode)
# -----------------------------------------------------------------------------

def _reference(x, cond, params, *, n_heads, d_head):
    scale = float(d_head) ** -0.5

    def cross_attn(xn, cnd, a):
        q = xn @ a["q"].T
        if cnd is None:
            k = xn @ a["k_x"].T
            v = xn @ a["v_x"].T
        else:
            k = cnd @ a["k_cond"].T
            v = cnd @ a["v_cond"].T
        B, Lq, D = q.shape
        Lk = k.shape[1]
        qh = q.reshape(B, Lq, n_heads, d_head)
        kh = k.reshape(B, Lk, n_heads, d_head)
        vh = v.reshape(B, Lk, n_heads, d_head)
        attn = jnp.einsum("bihd,bjhd->bhij", qh, kh) * scale
        attn = jax.nn.softmax(attn, axis=-1)                 # == half-split softmax (row-wise)
        out = jnp.einsum("bhij,bjhd->bihd", attn, vh).reshape(B, Lq, D)
        return out @ a["to_out_w"].T + a["to_out_b"]

    h = x + cross_attn(_layer_norm(x, params["norm1_w"], params["norm1_b"]), None, params["attn1"])
    h = h + cross_attn(_layer_norm(h, params["norm2_w"], params["norm2_b"]), cond, params["attn2"])
    hn = _layer_norm(h, params["norm3_w"], params["norm3_b"])
    ff = hn @ params["ff_fc_w"].T + params["ff_fc_b"]
    d_ff = params["ff_out_w"].shape[1]
    ff = ff[..., :d_ff] * _gelu_tanh(ff[..., d_ff:])
    ff = ff @ params["ff_out_w"].T + params["ff_out_b"]
    return h + ff


# -----------------------------------------------------------------------------
# Demo / self-check
# -----------------------------------------------------------------------------

if __name__ == "__main__":
    feat_channels = 32
    cond_channels = 16
    n_heads = 2
    d_head = 16
    B = 2
    H = W = 8
    Lq = H * W          # width*height = 64
    Lk = 8              # condition sequence length

    root = jax.random.PRNGKey(0)
    k_param, k_x, k_cond = jax.random.split(root, 3)

    raw_params = init_params(k_param, feat_channels, cond_channels, n_heads, d_head)
    params = prepare_params(raw_params, n_heads=n_heads, d_head=d_head)   # one-time prep

    x = jax.random.normal(k_x, (B, Lq, feat_channels), jnp.float32)
    cond = jax.random.normal(k_cond, (B, Lk, cond_channels), jnp.float32)

    # Cross-attention conditioning path.
    out = basic_transformer_block(x, cond, params, n_heads=n_heads, d_head=d_head)
    out = jax.block_until_ready(out)
    ref = _reference(x, cond, raw_params, n_heads=n_heads, d_head=d_head)
    assert out.shape == (B, Lq, feat_channels)
    assert jnp.allclose(out, ref, atol=5e-3, rtol=5e-3), (
        f"cross mismatch: max abs err {float(jnp.max(jnp.abs(out - ref)))}")

    # Self-attention path (cond is None): single x input, no duplicate DMA.
    out_self = basic_transformer_block(x, None, params, n_heads=n_heads, d_head=d_head)
    out_self = jax.block_until_ready(out_self)
    ref_self = _reference(x, None, raw_params, n_heads=n_heads, d_head=d_head)
    assert jnp.allclose(out_self, ref_self, atol=5e-3, rtol=5e-3), (
        f"self mismatch: max abs err {float(jnp.max(jnp.abs(out_self - ref_self)))}")

    # bf16 matmul-input path (v6e/v7x MXU-native); checked for shape/finiteness.
    out_bf16 = basic_transformer_block(x, cond, params, n_heads=n_heads, d_head=d_head,
                                       compute_dtype=jnp.bfloat16)
    out_bf16 = jax.block_until_ready(out_bf16)
    assert out_bf16.shape == (B, Lq, feat_channels)
    assert bool(jnp.all(jnp.isfinite(out_bf16)))

    # 2-step "parallel" grid variant (recommended batch_block on v7x to use both TensorCores).
    out_2tc = basic_transformer_block(x, cond, params, n_heads=n_heads, d_head=d_head,
                                      batch_block=1)
    out_2tc = jax.block_until_ready(out_2tc)
    assert jnp.allclose(out_2tc, ref, atol=5e-3, rtol=5e-3), "batch_block=1 mismatch"

    print("KERNEL_OK")
</pallas_src>

<mosaic_0001>
module attributes {stable_mosaic.version = 11 : i64} {
  func.func @_transformer_block_kernel(%arg0: i32, %arg1: memref<128x32xf32, #tpu.memory_space<vmem>>, %arg2: memref<16x16xf32, #tpu.memory_space<vmem>>, %arg3: memref<1x32xf32, #tpu.memory_space<vmem>>, %arg4: memref<1x32xf32, #tpu.memory_space<vmem>>, %arg5: memref<2x32x16xf32, #tpu.memory_space<vmem>>, %arg6: memref<2x32x16xf32, #tpu.memory_space<vmem>>, %arg7: memref<2x32x16xf32, #tpu.memory_space<vmem>>, %arg8: memref<2x16x32xf32, #tpu.memory_space<vmem>>, %arg9: memref<1x32xf32, #tpu.memory_space<vmem>>, %arg10: memref<1x32xf32, #tpu.memory_space<vmem>>, %arg11: memref<1x32xf32, #tpu.memory_space<vmem>>, %arg12: memref<2x32x16xf32, #tpu.memory_space<vmem>>, %arg13: memref<2x16x16xf32, #tpu.memory_space<vmem>>, %arg14: memref<2x16x16xf32, #tpu.memory_space<vmem>>, %arg15: memref<2x16x32xf32, #tpu.memory_space<vmem>>, %arg16: memref<1x32xf32, #tpu.memory_space<vmem>>, %arg17: memref<1x32xf32, #tpu.memory_space<vmem>>, %arg18: memref<1x32xf32, #tpu.memory_space<vmem>>, %arg19: memref<32x256xf32, #tpu.memory_space<vmem>>, %arg20: memref<1x256xf32, #tpu.memory_space<vmem>>, %arg21: memref<128x32xf32, #tpu.memory_space<vmem>>, %arg22: memref<1x32xf32, #tpu.memory_space<vmem>>, %arg23: memref<128x32xf32, #tpu.memory_space<vmem>>) attributes {dimension_semantics = [#tpu.dimension_semantics<parallel>], iteration_bounds = array<i64: 1>, scalar_prefetch = 0 : i64, scratch_operands = 0 : i64, tpu.core_type = #tpu.core_type<tc>, window_params = [{transform_indices = @transform_0, window_bounds = array<i64: 128, 32>}, {transform_indices = @transform_1, window_bounds = array<i64: 16, 16>}, {pipeline_mode = #tpu.pipeline_mode<synchronous>, transform_indices = @transform_2, window_bounds = array<i64: 1, 32>}, {pipeline_mode = #tpu.pipeline_mode<synchronous>, transform_indices = @transform_3, window_bounds = array<i64: 1, 32>}, {pipeline_mode = #tpu.pipeline_mode<synchronous>, transform_indices = @transform_4, window_bounds = array<i64: 2, 32, 16>}, {pipeline_mode = #tpu.pipeline_mode<synchronous>, transform_indices = @transform_5, window_bounds = array<i64: 2, 32, 16>}, {pipeline_mode = #tpu.pipeline_mode<synchronous>, transform_indices = @transform_6, window_bounds = array<i64: 2, 32, 16>}, {pipeline_mode = #tpu.pipeline_mode<synchronous>, transform_indices = @transform_7, window_bounds = array<i64: 2, 16, 32>}, {pipeline_mode = #tpu.pipeline_mode<synchronous>, transform_indices = @transform_8, window_bounds = array<i64: 1, 32>}, {pipeline_mode = #tpu.pipeline_mode<synchronous>, transform_indices = @transform_9, window_bounds = array<i64: 1, 32>}, {pipeline_mode = #tpu.pipeline_mode<synchronous>, transform_indices = @transform_10, window_bounds = array<i64: 1, 32>}, {pipeline_mode = #tpu.pipeline_mode<synchronous>, transform_indices = @transform_11, window_bounds = array<i64: 2, 32, 16>}, {pipeline_mode = #tpu.pipeline_mode<synchronous>, transform_indices = @transform_12, window_bounds = array<i64: 2, 16, 16>}, {pipeline_mode = #tpu.pipeline_mode<synchronous>, transform_indices = @transform_13, window_bounds = array<i64: 2, 16, 16>}, {pipeline_mode = #tpu.pipeline_mode<synchronous>, transform_indices = @transform_14, window_bounds = array<i64: 2, 16, 32>}, {pipeline_mode = #tpu.pipeline_mode<synchronous>, transform_indices = @transform_15, window_bounds = array<i64: 1, 32>}, {pipeline_mode = #tpu.pipeline_mode<synchronous>, transform_indices = @transform_16, window_bounds = array<i64: 1, 32>}, {pipeline_mode = #tpu.pipeline_mode<synchronous>, transform_indices = @transform_17, window_bounds = array<i64: 1, 32>}, {pipeline_mode = #tpu.pipeline_mode<synchronous>, transform_indices = @transform_18, window_bounds = array<i64: 32, 256>}, {pipeline_mode = #tpu.pipeline_mode<synchronous>, transform_indices = @transform_19, window_bounds = array<i64: 1, 256>}, {pipeline_mode = #tpu.pipeline_mode<synchronous>, transform_indices = @transform_20, window_bounds = array<i64: 128, 32>}, {pipeline_mode = #tpu.pipeline_mode<synchronous>, transform_indices = @transform_21, window_bounds = array<i64: 1, 32>}, {transform_indices = @transform_22, window_bounds = array<i64: 128, 32>}]} {
    %c0 = arith.constant 0 : index
    %c0_0 = arith.constant 0 : index
    %0 = vector.load %arg1[%c0, %c0_0] : memref<128x32xf32, #tpu.memory_space<vmem>>, vector<128x32xf32>
    %c0_1 = arith.constant 0 : index
    %c0_2 = arith.constant 0 : index
    %1 = vector.load %arg3[%c0_1, %c0_2] : memref<1x32xf32, #tpu.memory_space<vmem>>, vector<1x32xf32>
    %c0_3 = arith.constant 0 : index
    %c0_4 = arith.constant 0 : index
    %2 = vector.load %arg4[%c0_3, %c0_4] : memref<1x32xf32, #tpu.memory_space<vmem>>, vector<1x32xf32>
    %cst = arith.constant dense<0.000000e+00> : vector<128xf32>
    %3 = vector.multi_reduction <add>, %0, %cst [1] : vector<128x32xf32> to vector<128xf32>
    %4 = vector.shape_cast %3 : vector<128xf32> to vector<128x1xf32>
    %cst_5 = arith.constant 3.200000e+01 : f32
    %5 = vector.broadcast %cst_5 : f32 to vector<128x1xf32>
    %6 = arith.divf %4, %5 : vector<128x1xf32>
    %7 = vector.broadcast %6 : vector<128x1xf32> to vector<128x32xf32>
    %8 = arith.subf %0, %7 : vector<128x32xf32>
    %9 = arith.mulf %8, %8 : vector<128x32xf32>
    %cst_6 = arith.constant dense<0.000000e+00> : vector<128xf32>
    %10 = vector.multi_reduction <add>, %9, %cst_6 [1] : vector<128x32xf32> to vector<128xf32>
    %11 = vector.shape_cast %10 : vector<128xf32> to vector<128x1xf32>
    %cst_7 = arith.constant 3.200000e+01 : f32
    %12 = vector.broadcast %cst_7 : f32 to vector<128x1xf32>
    %13 = arith.divf %11, %12 : vector<128x1xf32>
    %cst_8 = arith.constant 9.99999974E-6 : f32
    %14 = vector.broadcast %cst_8 : f32 to vector<128x1xf32>
    %15 = arith.addf %13, %14 : vector<128x1xf32>
    %16 = math.rsqrt %15 : vector<128x1xf32>
    %17 = vector.broadcast %16 : vector<128x1xf32> to vector<128x32xf32>
    %18 = arith.mulf %8, %17 : vector<128x32xf32>
    %19 = vector.broadcast %1 : vector<1x32xf32> to vector<128x32xf32>
    %20 = arith.mulf %18, %19 : vector<128x32xf32>
    %21 = vector.broadcast %2 : vector<1x32xf32> to vector<128x32xf32>
    %22 = arith.addf %20, %21 : vector<128x32xf32>
    %cst_9 = arith.constant 0.000000e+00 : f32
    %23 = vector.broadcast %cst_9 : f32 to vector<64x32xf32>
    %cst_10 = arith.constant 0.000000e+00 : f32
    %24 = vector.broadcast %cst_10 : f32 to vector<64x32xf32>
    %c0_11 = arith.constant 0 : index
    %c0_12 = arith.constant 0 : index
    %c0_13 = arith.constant 0 : index
    %25 = vector.load %arg5[%c0_11, %c0_12, %c0_13] : memref<2x32x16xf32, #tpu.memory_space<vmem>>, vector<1x32x16xf32>
    %26 = vector.shape_cast %25 : vector<1x32x16xf32> to vector<32x16xf32>
    %cst_14 = arith.constant dense<0.000000e+00> : vector<128x16xf32>
    %27 = tpu.matmul %22, %26, %cst_14 {dimension_numbers = #tpu.dot_dimension_numbers<[1], [0], [0], [1], [0, 0, 1, 1], [], []>} : vector<128x32xf32>, vector<32x16xf32>, vector<128x16xf32> -> vector<128x16xf32>
    %c0_15 = arith.constant 0 : index
    %c0_16 = arith.constant 0 : index
    %c0_17 = arith.constant 0 : index
    %28 = vector.load %arg6[%c0_15, %c0_16, %c0_17] : memref<2x32x16xf32, #tpu.memory_space<vmem>>, vector<1x32x16xf32>
    %29 = vector.shape_cast %28 : vector<1x32x16xf32> to vector<32x16xf32>
    %cst_18 = arith.constant dense<0.000000e+00> : vector<128x16xf32>
    %30 = tpu.matmul %22, %29, %cst_18 {dimension_numbers = #tpu.dot_dimension_numbers<[1], [0], [0], [1], [0, 0, 1, 1], [], []>} : vector<128x32xf32>, vector<32x16xf32>, vector<128x16xf32> -> vector<128x16xf32>
    %c0_19 = arith.constant 0 : index
    %c0_20 = arith.constant 0 : index
    %c0_21 = arith.constant 0 : index
    %31 = vector.load %arg7[%c0_19, %c0_20, %c0_21] : memref<2x32x16xf32, #tpu.memory_space<vmem>>, vector<1x32x16xf32>
    %32 = vector.shape_cast %31 : vector<1x32x16xf32> to vector<32x16xf32>
    %cst_22 = arith.constant dense<0.000000e+00> : vector<128x16xf32>
    %33 = tpu.matmul %22, %32, %cst_22 {dimension_numbers = #tpu.dot_dimension_numbers<[1], [0], [0], [1], [0, 0, 1, 1], [], []>} : vector<128x32xf32>, vector<32x16xf32>, vector<128x16xf32> -> vector<128x16xf32>
    %c0_23 = arith.constant 0 : index
    %c0_24 = arith.constant 0 : index
    %c0_25 = arith.constant 0 : index
    %34 = vector.load %arg8[%c0_23, %c0_24, %c0_25] : memref<2x16x32xf32, #tpu.memory_space<vmem>>, vector<1x16x32xf32>
    %35 = vector.shape_cast %34 : vector<1x16x32xf32> to vector<16x32xf32>
    %36 = vector.extract_strided_slice %27 {offsets = [0, 0], sizes = [64, 16], strides = [1, 1]} : vector<128x16xf32> to vector<64x16xf32>
    %37 = vector.extract_strided_slice %30 {offsets = [0, 0], sizes = [64, 16], strides = [1, 1]} : vector<128x16xf32> to vector<64x16xf32>
    %38 = vector.extract_strided_slice %33 {offsets = [0, 0], sizes = [64, 16], strides = [1, 1]} : vector<128x16xf32> to vector<64x16xf32>
    %cst_26 = arith.constant dense<0.000000e+00> : vector<64x64xf32>
    %39 = tpu.matmul %36, %37, %cst_26 {dimension_numbers = #tpu.dot_dimension_numbers<[1], [1], [0], [0], [0, 0, 1, 0], [], []>} : vector<64x16xf32>, vector<64x16xf32>, vector<64x64xf32> -> vector<64x64xf32>
    %cst_27 = arith.constant dense<0xFF800000> : vector<64xf32>
    %40 = vector.multi_reduction <maximumf>, %39, %cst_27 [1] : vector<64x64xf32> to vector<64xf32>
    %41 = vector.shape_cast %40 : vector<64xf32> to vector<64x1xf32>
    %42 = vector.broadcast %41 : vector<64x1xf32> to vector<64x64xf32>
    %43 = arith.subf %39, %42 : vector<64x64xf32>
    %44 = math.exp %43 : vector<64x64xf32>
    %cst_28 = arith.constant dense<0.000000e+00> : vector<64xf32>
    %45 = vector.multi_reduction <add>, %44, %cst_28 [1] : vector<64x64xf32> to vector<64xf32>
    %46 = vector.shape_cast %45 : vector<64xf32> to vector<64x1xf32>
    %cst_29 = arith.constant dense<0.000000e+00> : vector<64x16xf32>
    %47 = tpu.matmul %44, %38, %cst_29 {dimension_numbers = #tpu.dot_dimension_numbers<[1], [0], [0], [1], [0, 0, 1, 1], [], []>} : vector<64x64xf32>, vector<64x16xf32>, vector<64x16xf32> -> vector<64x16xf32>
    %48 = tpu.reciprocal %46 {approx = true} : vector<64x1xf32> -> vector<64x1xf32>
    %49 = vector.broadcast %48 : vector<64x1xf32> to vector<64x16xf32>
    %50 = arith.mulf %47, %49 : vector<64x16xf32>
    %cst_30 = arith.constant dense<0.000000e+00> : vector<64x32xf32>
    %51 = tpu.matmul %50, %35, %cst_30 {dimension_numbers = #tpu.dot_dimension_numbers<[1], [0], [0], [1], [0, 0, 1, 1], [], []>} : vector<64x16xf32>, vector<16x32xf32>, vector<64x32xf32> -> vector<64x32xf32>
    %52 = arith.addf %23, %51 : vector<64x32xf32>
    %53 = vector.extract_strided_slice %27 {offsets = [64, 0], sizes = [64, 16], strides = [1, 1]} : vector<128x16xf32> to vector<64x16xf32>
    %54 = vector.extract_strided_slice %30 {offsets = [64, 0], sizes = [64, 16], strides = [1, 1]} : vector<128x16xf32> to vector<64x16xf32>
    %55 = vector.extract_strided_slice %33 {offsets = [64, 0], sizes = [64, 16], strides = [1, 1]} : vector<128x16xf32> to vector<64x16xf32>
    %cst_31 = arith.constant dense<0.000000e+00> : vector<64x64xf32>
    %56 = tpu.matmul %53, %54, %cst_31 {dimension_numbers = #tpu.dot_dimension_numbers<[1], [1], [0], [0], [0, 0, 1, 0], [], []>} : vector<64x16xf32>, vector<64x16xf32>, vector<64x64xf32> -> vector<64x64xf32>
    %cst_32 = arith.constant dense<0xFF800000> : vector<64xf32>
    %57 = vector.multi_reduction <maximumf>, %56, %cst_32 [1] : vector<64x64xf32> to vector<64xf32>
    %58 = vector.shape_cast %57 : vector<64xf32> to vector<64x1xf32>
    %59 = vector.broadcast %58 : vector<64x1xf32> to vector<64x64xf32>
    %60 = arith.subf %56, %59 : vector<64x64xf32>
    %61 = math.exp %60 : vector<64x64xf32>
    %cst_33 = arith.constant dense<0.000000e+00> : vector<64xf32>
    %62 = vector.multi_reduction <add>, %61, %cst_33 [1] : vector<64x64xf32> to vector<64xf32>
    %63 = vector.shape_cast %62 : vector<64xf32> to vector<64x1xf32>
    %cst_34 = arith.constant dense<0.000000e+00> : vector<64x16xf32>
    %64 = tpu.matmul %61, %55, %cst_34 {dimension_numbers = #tpu.dot_dimension_numbers<[1], [0], [0], [1], [0, 0, 1, 1], [], []>} : vector<64x64xf32>, vector<64x16xf32>, vector<64x16xf32> -> vector<64x16xf32>
    %65 = tpu.reciprocal %63 {approx = true} : vector<64x1xf32> -> vector<64x1xf32>
    %66 = vector.broadcast %65 : vector<64x1xf32> to vector<64x16xf32>
    %67 = arith.mulf %64, %66 : vector<64x16xf32>
    %cst_35 = arith.constant dense<0.000000e+00> : vector<64x32xf32>
    %68 = tpu.matmul %67, %35, %cst_35 {dimension_numbers = #tpu.dot_dimension_numbers<[1], [0], [0], [1], [0, 0, 1, 1], [], []>} : vector<64x16xf32>, vector<16x32xf32>, vector<64x32xf32> -> vector<64x32xf32>
    %69 = arith.addf %24, %68 : vector<64x32xf32>
    %c1 = arith.constant 1 : index
    %c0_36 = arith.constant 0 : index
    %c0_37 = arith.constant 0 : index
    %70 = vector.load %arg5[%c1, %c0_36, %c0_37] : memref<2x32x16xf32, #tpu.memory_space<vmem>>, vector<1x32x16xf32>
    %71 = vector.shape_cast %70 : vector<1x32x16xf32> to vector<32x16xf32>
    %cst_38 = arith.constant dense<0.000000e+00> : vector<128x16xf32>
    %72 = tpu.matmul %22, %71, %cst_38 {dimension_numbers = #tpu.dot_dimension_numbers<[1], [0], [0], [1], [0, 0, 1, 1], [], []>} : vector<128x32xf32>, vector<32x16xf32>, vector<128x16xf32> -> vector<128x16xf32>
    %c1_39 = arith.constant 1 : index
    %c0_40 = arith.constant 0 : index
    %c0_41 = arith.constant 0 : index
    %73 = vector.load %arg6[%c1_39, %c0_40, %c0_41] : memref<2x32x16xf32, #tpu.memory_space<vmem>>, vector<1x32x16xf32>
    %74 = vector.shape_cast %73 : vector<1x32x16xf32> to vector<32x16xf32>
    %cst_42 = arith.constant dense<0.000000e+00> : vector<128x16xf32>
    %75 = tpu.matmul %22, %74, %cst_42 {dimension_numbers = #tpu.dot_dimension_numbers<[1], [0], [0], [1], [0, 0, 1, 1], [], []>} : vector<128x32xf32>, vector<32x16xf32>, vector<128x16xf32> -> vector<128x16xf32>
    %c1_43 = arith.constant 1 : index
    %c0_44 = arith.constant 0 : index
    %c0_45 = arith.constant 0 : index
    %76 = vector.load %arg7[%c1_43, %c0_44, %c0_45] : memref<2x32x16xf32, #tpu.memory_space<vmem>>, vector<1x32x16xf32>
    %77 = vector.shape_cast %76 : vector<1x32x16xf32> to vector<32x16xf32>
    %cst_46 = arith.constant dense<0.000000e+00> : vector<128x16xf32>
    %78 = tpu.matmul %22, %77, %cst_46 {dimension_numbers = #tpu.dot_dimension_numbers<[1], [0], [0], [1], [0, 0, 1, 1], [], []>} : vector<128x32xf32>, vector<32x16xf32>, vector<128x16xf32> -> vector<128x16xf32>
    %c1_47 = arith.constant 1 : index
    %c0_48 = arith.constant 0 : index
    %c0_49 = arith.constant 0 : index
    %79 = vector.load %arg8[%c1_47, %c0_48, %c0_49] : memref<2x16x32xf32, #tpu.memory_space<vmem>>, vector<1x16x32xf32>
    %80 = vector.shape_cast %79 : vector<1x16x32xf32> to vector<16x32xf32>
    %81 = vector.extract_strided_slice %72 {offsets = [0, 0], sizes = [64, 16], strides = [1, 1]} : vector<128x16xf32> to vector<64x16xf32>
    %82 = vector.extract_strided_slice %75 {offsets = [0, 0], sizes = [64, 16], strides = [1, 1]} : vector<128x16xf32> to vector<64x16xf32>
    %83 = vector.extract_strided_slice %78 {offsets = [0, 0], sizes = [64, 16], strides = [1, 1]} : vector<128x16xf32> to vector<64x16xf32>
    %cst_50 = arith.constant dense<0.000000e+00> : vector<64x64xf32>
    %84 = tpu.matmul %81, %82, %cst_50 {dimension_numbers = #tpu.dot_dimension_numbers<[1], [1], [0], [0], [0, 0, 1, 0], [], []>} : vector<64x16xf32>, vector<64x16xf32>, vector<64x64xf32> -> vector<64x64xf32>
    %cst_51 = arith.constant dense<0xFF800000> : vector<64xf32>
    %85 = vector.multi_reduction <maximumf>, %84, %cst_51 [1] : vector<64x64xf32> to vector<64xf32>
    %86 = vector.shape_cast %85 : vector<64xf32> to vector<64x1xf32>
    %87 = vector.broadcast %86 : vector<64x1xf32> to vector<64x64xf32>
    %88 = arith.subf %84, %87 : vector<64x64xf32>
    %89 = math.exp %88 : vector<64x64xf32>
    %cst_52 = arith.constant dense<0.000000e+00> : vector<64xf32>
    %90 = vector.multi_reduction <add>, %89, %cst_52 [1] : vector<64x64xf32> to vector<64xf32>
    %91 = vector.shape_cast %90 : vector<64xf32> to vector<64x1xf32>
    %cst_53 = arith.constant dense<0.000000e+00> : vector<64x16xf32>
    %92 = tpu.matmul %89, %83, %cst_53 {dimension_numbers = #tpu.dot_dimension_numbers<[1], [0], [0], [1], [0, 0, 1, 1], [], []>} : vector<64x64xf32>, vector<64x16xf32>, vector<64x16xf32> -> vector<64x16xf32>
    %93 = tpu.reciprocal %91 {approx = true} : vector<64x1xf32> -> vector<64x1xf32>
    %94 = vector.broadcast %93 : vector<64x1xf32> to vector<64x16xf32>
    %95 = arith.mulf %92, %94 : vector<64x16xf32>
    %cst_54 = arith.constant dense<0.000000e+00> : vector<64x32xf32>
    %96 = tpu.matmul %95, %80, %cst_54 {dimension_numbers = #tpu.dot_dimension_numbers<[1], [0], [0], [1], [0, 0, 1, 1], [], []>} : vector<64x16xf32>, vector<16x32xf32>, vector<64x32xf32> -> vector<64x32xf32>
    %97 = arith.addf %52, %96 : vector<64x32xf32>
    %98 = vector.extract_strided_slice %72 {offsets = [64, 0], sizes = [64, 16], strides = [1, 1]} : vector<128x16xf32> to vector<64x16xf32>
    %99 = vector.extract_strided_slice %75 {offsets = [64, 0], sizes = [64, 16], strides = [1, 1]} : vector<128x16xf32> to vector<64x16xf32>
    %100 = vector.extract_strided_slice %78 {offsets = [64, 0], sizes = [64, 16], strides = [1, 1]} : vector<128x16xf32> to vector<64x16xf32>
    %cst_55 = arith.constant dense<0.000000e+00> : vector<64x64xf32>
    %101 = tpu.matmul %98, %99, %cst_55 {dimension_numbers = #tpu.dot_dimension_numbers<[1], [1], [0], [0], [0, 0, 1, 0], [], []>} : vector<64x16xf32>, vector<64x16xf32>, vector<64x64xf32> -> vector<64x64xf32>
    %cst_56 = arith.constant dense<0xFF800000> : vector<64xf32>
    %102 = vector.multi_reduction <maximumf>, %101, %cst_56 [1] : vector<64x64xf32> to vector<64xf32>
    %103 = vector.shape_cast %102 : vector<64xf32> to vector<64x1xf32>
    %104 = vector.broadcast %103 : vector<64x1xf32> to vector<64x64xf32>
    %105 = arith.subf %101, %104 : vector<64x64xf32>
    %106 = math.exp %105 : vector<64x64xf32>
    %cst_57 = arith.constant dense<0.000000e+00> : vector<64xf32>
    %107 = vector.multi_reduction <add>, %106, %cst_57 [1] : vector<64x64xf32> to vector<64xf32>
    %108 = vector.shape_cast %107 : vector<64xf32> to vector<64x1xf32>
    %cst_58 = arith.constant dense<0.000000e+00> : vector<64x16xf32>
    %109 = tpu.matmul %106, %100, %cst_58 {dimension_numbers = #tpu.dot_dimension_numbers<[1], [0], [0], [1], [0, 0, 1, 1], [], []>} : vector<64x64xf32>, vector<64x16xf32>, vector<64x16xf32> -> vector<64x16xf32>
    %110 = tpu.reciprocal %108 {approx = true} : vector<64x1xf32> -> vector<64x1xf32>
    %111 = vector.broadcast %110 : vector<64x1xf32> to vector<64x16xf32>
    %112 = arith.mulf %109, %111 : vector<64x16xf32>
    %cst_59 = arith.constant dense<0.000000e+00> : vector<64x32xf32>
    %113 = tpu.matmul %112, %80, %cst_59 {dimension_numbers = #tpu.dot_dimension_numbers<[1], [0], [0], [1], [0, 0, 1, 1], [], []>} : vector<64x16xf32>, vector<16x32xf32>, vector<64x32xf32> -> vector<64x32xf32>
    %114 = arith.addf %69, %113 : vector<64x32xf32>
    %115 = tpu.concatenate %97, %114 in 0 : vector<64x32xf32>, vector<64x32xf32> -> vector<128x32xf32>
    %c0_60 = arith.constant 0 : index
    %c0_61 = arith.constant 0 : index
    %116 = vector.load %arg9[%c0_60, %c0_61] : memref<1x32xf32, #tpu.memory_space<vmem>>, vector<1x32xf32>
    %117 = vector.broadcast %116 : vector<1x32xf32> to vector<128x32xf32>
    %118 = arith.addf %115, %117 : vector<128x32xf32>
    %119 = arith.addf %0, %118 : vector<128x32xf32>
    %c0_62 = arith.constant 0 : index
    %c0_63 = arith.constant 0 : index
    %120 = vector.load %arg10[%c0_62, %c0_63] : memref<1x32xf32, #tpu.memory_space<vmem>>, vector<1x32xf32>
    %c0_64 = arith.constant 0 : index
    %c0_65 = arith.constant 0 : index
    %121 = vector.load %arg11[%c0_64, %c0_65] : memref<1x32xf32, #tpu.memory_space<vmem>>, vector<1x32xf32>
    %cst_66 = arith.constant dense<0.000000e+00> : vector<128xf32>
    %122 = vector.multi_reduction <add>, %119, %cst_66 [1] : vector<128x32xf32> to vector<128xf32>
    %123 = vector.shape_cast %122 : vector<128xf32> to vector<128x1xf32>
    %cst_67 = arith.constant 3.200000e+01 : f32
    %124 = vector.broadcast %cst_67 : f32 to vector<128x1xf32>
    %125 = arith.divf %123, %124 : vector<128x1xf32>
    %126 = vector.broadcast %125 : vector<128x1xf32> to vector<128x32xf32>
    %127 = arith.subf %119, %126 : vector<128x32xf32>
    %128 = arith.mulf %127, %127 : vector<128x32xf32>
    %cst_68 = arith.constant dense<0.000000e+00> : vector<128xf32>
    %129 = vector.multi_reduction <add>, %128, %cst_68 [1] : vector<128x32xf32> to vector<128xf32>
    %130 = vector.shape_cast %129 : vector<128xf32> to vector<128x1xf32>
    %cst_69 = arith.constant 3.200000e+01 : f32
    %131 = vector.broadcast %cst_69 : f32 to vector<128x1xf32>
    %132 = arith.divf %130, %131 : vector<128x1xf32>
    %cst_70 = arith.constant 9.99999974E-6 : f32
    %133 = vector.broadcast %cst_70 : f32 to vector<128x1xf32>
    %134 = arith.addf %132, %133 : vector<128x1xf32>
    %135 = math.rsqrt %134 : vector<128x1xf32>
    %136 = vector.broadcast %135 : vector<128x1xf32> to vector<128x32xf32>
    %137 = arith.mulf %127, %136 : vector<128x32xf32>
    %138 = vector.broadcast %120 : vector<1x32xf32> to vector<128x32xf32>
    %139 = arith.mulf %137, %138 : vector<128x32xf32>
    %140 = vector.broadcast %121 : vector<1x32xf32> to vector<128x32xf32>
    %141 = arith.addf %139, %140 : vector<128x32xf32>
    %c0_71 = arith.constant 0 : index
    %c0_72 = arith.constant 0 : index
    %142 = vector.load %arg2[%c0_71, %c0_72] : memref<16x16xf32, #tpu.memory_space<vmem>>, vector<16x16xf32>
    %cst_73 = arith.constant 0.000000e+00 : f32
    %143 = vector.broadcast %cst_73 : f32 to vector<64x32xf32>
    %cst_74 = arith.constant 0.000000e+00 : f32
    %144 = vector.broadcast %cst_74 : f32 to vector<64x32xf32>
    %c0_75 = arith.constant 0 : index
    %c0_76 = arith.constant 0 : index
    %c0_77 = arith.constant 0 : index
    %145 = vector.load %arg12[%c0_75, %c0_76, %c0_77] : memref<2x32x16xf32, #tpu.memory_space<vmem>>, vector<1x32x16xf32>
    %146 = vector.shape_cast %145 : vector<1x32x16xf32> to vector<32x16xf32>
    %cst_78 = arith.constant dense<0.000000e+00> : vector<128x16xf32>
    %147 = tpu.matmul %141, %146, %cst_78 {dimension_numbers = #tpu.dot_dimension_numbers<[1], [0], [0], [1], [0, 0, 1, 1], [], []>} : vector<128x32xf32>, vector<32x16xf32>, vector<128x16xf32> -> vector<128x16xf32>
    %c0_79 = arith.constant 0 : index
    %c0_80 = arith.constant 0 : index
    %c0_81 = arith.constant 0 : index
    %148 = vector.load %arg13[%c0_79, %c0_80, %c0_81] : memref<2x16x16xf32, #tpu.memory_space<vmem>>, vector<1x16x16xf32>
    %149 = vector.shape_cast %148 : vector<1x16x16xf32> to vector<16x16xf32>
    %cst_82 = arith.constant dense<0.000000e+00> : vector<16x16xf32>
    %150 = tpu.matmul %142, %149, %cst_82 {dimension_numbers = #tpu.dot_dimension_numbers<[1], [0], [0], [1], [0, 0, 1, 1], [], []>} : vector<16x16xf32>, vector<16x16xf32>, vector<16x16xf32> -> vector<16x16xf32>
    %c0_83 = arith.constant 0 : index
    %c0_84 = arith.constant 0 : index
    %c0_85 = arith.constant 0 : index
    %151 = vector.load %arg14[%c0_83, %c0_84, %c0_85] : memref<2x16x16xf32, #tpu.memory_space<vmem>>, vector<1x16x16xf32>
    %152 = vector.shape_cast %151 : vector<1x16x16xf32> to vector<16x16xf32>
    %cst_86 = arith.constant dense<0.000000e+00> : vector<16x16xf32>
    %153 = tpu.matmul %142, %152, %cst_86 {dimension_numbers = #tpu.dot_dimension_numbers<[1], [0], [0], [1], [0, 0, 1, 1], [], []>} : vector<16x16xf32>, vector<16x16xf32>, vector<16x16xf32> -> vector<16x16xf32>
    %c0_87 = arith.constant 0 : index
    %c0_88 = arith.constant 0 : index
    %c0_89 = arith.constant 0 : index
    %154 = vector.load %arg15[%c0_87, %c0_88, %c0_89] : memref<2x16x32xf32, #tpu.memory_space<vmem>>, vector<1x16x32xf32>
    %155 = vector.shape_cast %154 : vector<1x16x32xf32> to vector<16x32xf32>
    %156 = vector.extract_strided_slice %147 {offsets = [0, 0], sizes = [64, 16], strides = [1, 1]} : vector<128x16xf32> to vector<64x16xf32>
    %157 = vector.extract_strided_slice %150 {offsets = [0, 0], sizes = [8, 16], strides = [1, 1]} : vector<16x16xf32> to vector<8x16xf32>
    %158 = vector.extract_strided_slice %153 {offsets = [0, 0], sizes = [8, 16], strides = [1, 1]} : vector<16x16xf32> to vector<8x16xf32>
    %cst_90 = arith.constant dense<0.000000e+00> : vector<64x8xf32>
    %159 = tpu.matmul %156, %157, %cst_90 {dimension_numbers = #tpu.dot_dimension_numbers<[1], [1], [0], [0], [0, 0, 1, 0], [], []>} : vector<64x16xf32>, vector<8x16xf32>, vector<64x8xf32> -> vector<64x8xf32>
    %cst_91 = arith.constant dense<0xFF800000> : vector<64xf32>
    %160 = vector.multi_reduction <maximumf>, %159, %cst_91 [1] : vector<64x8xf32> to vector<64xf32>
    %161 = vector.shape_cast %160 : vector<64xf32> to vector<64x1xf32>
    %162 = vector.broadcast %161 : vector<64x1xf32> to vector<64x8xf32>
    %163 = arith.subf %159, %162 : vector<64x8xf32>
    %164 = math.exp %163 : vector<64x8xf32>
    %cst_92 = arith.constant dense<0.000000e+00> : vector<64xf32>
    %165 = vector.multi_reduction <add>, %164, %cst_92 [1] : vector<64x8xf32> to vector<64xf32>
    %166 = vector.shape_cast %165 : vector<64xf32> to vector<64x1xf32>
    %cst_93 = arith.constant dense<0.000000e+00> : vector<64x16xf32>
    %167 = tpu.matmul %164, %158, %cst_93 {dimension_numbers = #tpu.dot_dimension_numbers<[1], [0], [0], [1], [0, 0, 1, 1], [], []>} : vector<64x8xf32>, vector<8x16xf32>, vector<64x16xf32> -> vector<64x16xf32>
    %168 = tpu.reciprocal %166 {approx = true} : vector<64x1xf32> -> vector<64x1xf32>
    %169 = vector.broadcast %168 : vector<64x1xf32> to vector<64x16xf32>
    %170 = arith.mulf %167, %169 : vector<64x16xf32>
    %cst_94 = arith.constant dense<0.000000e+00> : vector<64x32xf32>
    %171 = tpu.matmul %170, %155, %cst_94 {dimension_numbers = #tpu.dot_dimension_numbers<[1], [0], [0], [1], [0, 0, 1, 1], [], []>} : vector<64x16xf32>, vector<16x32xf32>, vector<64x32xf32> -> vector<64x32xf32>
    %172 = arith.addf %143, %171 : vector<64x32xf32>
    %173 = vector.extract_strided_slice %147 {offsets = [64, 0], sizes = [64, 16], strides = [1, 1]} : vector<128x16xf32> to vector<64x16xf32>
    %174 = vector.extract_strided_slice %150 {offsets = [8, 0], sizes = [8, 16], strides = [1, 1]} : vector<16x16xf32> to vector<8x16xf32>
    %175 = vector.extract_strided_slice %153 {offsets = [8, 0], sizes = [8, 16], strides = [1, 1]} : vector<16x16xf32> to vector<8x16xf32>
    %cst_95 = arith.constant dense<0.000000e+00> : vector<64x8xf32>
    %176 = tpu.matmul %173, %174, %cst_95 {dimension_numbers = #tpu.dot_dimension_numbers<[1], [1], [0], [0], [0, 0, 1, 0], [], []>} : vector<64x16xf32>, vector<8x16xf32>, vector<64x8xf32> -> vector<64x8xf32>
    %cst_96 = arith.constant dense<0xFF800000> : vector<64xf32>
    %177 = vector.multi_reduction <maximumf>, %176, %cst_96 [1] : vector<64x8xf32> to vector<64xf32>
    %178 = vector.shape_cast %177 : vector<64xf32> to vector<64x1xf32>
    %179 = vector.broadcast %178 : vector<64x1xf32> to vector<64x8xf32>
    %180 = arith.subf %176, %179 : vector<64x8xf32>
    %181 = math.exp %180 : vector<64x8xf32>
    %cst_97 = arith.constant dense<0.000000e+00> : vector<64xf32>
    %182 = vector.multi_reduction <add>, %181, %cst_97 [1] : vector<64x8xf32> to vector<64xf32>
    %183 = vector.shape_cast %182 : vector<64xf32> to vector<64x1xf32>
    %cst_98 = arith.constant dense<0.000000e+00> : vector<64x16xf32>
    %184 = tpu.matmul %181, %175, %cst_98 {dimension_numbers = #tpu.dot_dimension_numbers<[1], [0], [0], [1], [0, 0, 1, 1], [], []>} : vector<64x8xf32>, vector<8x16xf32>, vector<64x16xf32> -> vector<64x16xf32>
    %185 = tpu.reciprocal %183 {approx = true} : vector<64x1xf32> -> vector<64x1xf32>
    %186 = vector.broadcast %185 : vector<64x1xf32> to vector<64x16xf32>
    %187 = arith.mulf %184, %186 : vector<64x16xf32>
    %cst_99 = arith.constant dense<0.000000e+00> : vector<64x32xf32>
    %188 = tpu.matmul %187, %155, %cst_99 {dimension_numbers = #tpu.dot_dimension_numbers<[1], [0], [0], [1], [0, 0, 1, 1], [], []>} : vector<64x16xf32>, vector<16x32xf32>, vector<64x32xf32> -> vector<64x32xf32>
    %189 = arith.addf %144, %188 : vector<64x32xf32>
    %c1_100 = arith.constant 1 : index
    %c0_101 = arith.constant 0 : index
    %c0_102 = arith.constant 0 : index
    %190 = vector.load %arg12[%c1_100, %c0_101, %c0_102] : memref<2x32x16xf32, #tpu.memory_space<vmem>>, vector<1x32x16xf32>
    %191 = vector.shape_cast %190 : vector<1x32x16xf32> to vector<32x16xf32>
    %cst_103 = arith.constant dense<0.000000e+00> : vector<128x16xf32>
    %192 = tpu.matmul %141, %191, %cst_103 {dimension_numbers = #tpu.dot_dimension_numbers<[1], [0], [0], [1], [0, 0, 1, 1], [], []>} : vector<128x32xf32>, vector<32x16xf32>, vector<128x16xf32> -> vector<128x16xf32>
    %c1_104 = arith.constant 1 : index
    %c0_105 = arith.constant 0 : index
    %c0_106 = arith.constant 0 : index
    %193 = vector.load %arg13[%c1_104, %c0_105, %c0_106] : memref<2x16x16xf32, #tpu.memory_space<vmem>>, vector<1x16x16xf32>
    %194 = vector.shape_cast %193 : vector<1x16x16xf32> to vector<16x16xf32>
    %cst_107 = arith.constant dense<0.000000e+00> : vector<16x16xf32>
    %195 = tpu.matmul %142, %194, %cst_107 {dimension_numbers = #tpu.dot_dimension_numbers<[1], [0], [0], [1], [0, 0, 1, 1], [], []>} : vector<16x16xf32>, vector<16x16xf32>, vector<16x16xf32> -> vector<16x16xf32>
    %c1_108 = arith.constant 1 : index
    %c0_109 = arith.constant 0 : index
    %c0_110 = arith.constant 0 : index
    %196 = vector.load %arg14[%c1_108, %c0_109, %c0_110] : memref<2x16x16xf32, #tpu.memory_space<vmem>>, vector<1x16x16xf32>
    %197 = vector.shape_cast %196 : vector<1x16x16xf32> to vector<16x16xf32>
    %cst_111 = arith.constant dense<0.000000e+00> : vector<16x16xf32>
    %198 = tpu.matmul %142, %197, %cst_111 {dimension_numbers = #tpu.dot_dimension_numbers<[1], [0], [0], [1], [0, 0, 1, 1], [], []>} : vector<16x16xf32>, vector<16x16xf32>, vector<16x16xf32> -> vector<16x16xf32>
    %c1_112 = arith.constant 1 : index
    %c0_113 = arith.constant 0 : index
    %c0_114 = arith.constant 0 : index
    %199 = vector.load %arg15[%c1_112, %c0_113, %c0_114] : memref<2x16x32xf32, #tpu.memory_space<vmem>>, vector<1x16x32xf32>
    %200 = vector.shape_cast %199 : vector<1x16x32xf32> to vector<16x32xf32>
    %201 = vector.extract_strided_slice %192 {offsets = [0, 0], sizes = [64, 16], strides = [1, 1]} : vector<128x16xf32> to vector<64x16xf32>
    %202 = vector.extract_strided_slice %195 {offsets = [0, 0], sizes = [8, 16], strides = [1, 1]} : vector<16x16xf32> to vector<8x16xf32>
    %203 = vector.extract_strided_slice %198 {offsets = [0, 0], sizes = [8, 16], strides = [1, 1]} : vector<16x16xf32> to vector<8x16xf32>
    %cst_115 = arith.constant dense<0.000000e+00> : vector<64x8xf32>
    %204 = tpu.matmul %201, %202, %cst_115 {dimension_numbers = #tpu.dot_dimension_numbers<[1], [1], [0], [0], [0, 0, 1, 0], [], []>} : vector<64x16xf32>, vector<8x16xf32>, vector<64x8xf32> -> vector<64x8xf32>
    %cst_116 = arith.constant dense<0xFF800000> : vector<64xf32>
    %205 = vector.multi_reduction <maximumf>, %204, %cst_116 [1] : vector<64x8xf32> to vector<64xf32>
    %206 = vector.shape_cast %205 : vector<64xf32> to vector<64x1xf32>
    %207 = vector.broadcast %206 : vector<64x1xf32> to vector<64x8xf32>
    %208 = arith.subf %204, %207 : vector<64x8xf32>
    %209 = math.exp %208 : vector<64x8xf32>
    %cst_117 = arith.constant dense<0.000000e+00> : vector<64xf32>
    %210 = vector.multi_reduction <add>, %209, %cst_117 [1] : vector<64x8xf32> to vector<64xf32>
    %211 = vector.shape_cast %210 : vector<64xf32> to vector<64x1xf32>
    %cst_118 = arith.constant dense<0.000000e+00> : vector<64x16xf32>
    %212 = tpu.matmul %209, %203, %cst_118 {dimension_numbers = #tpu.dot_dimension_numbers<[1], [0], [0], [1], [0, 0, 1, 1], [], []>} : vector<64x8xf32>, vector<8x16xf32>, vector<64x16xf32> -> vector<64x16xf32>
    %213 = tpu.reciprocal %211 {approx = true} : vector<64x1xf32> -> vector<64x1xf32>
    %214 = vector.broadcast %213 : vector<64x1xf32> to vector<64x16xf32>
    %215 = arith.mulf %212, %214 : vector<64x16xf32>
    %cst_119 = arith.constant dense<0.000000e+00> : vector<64x32xf32>
    %216 = tpu.matmul %215, %200, %cst_119 {dimension_numbers = #tpu.dot_dimension_numbers<[1], [0], [0], [1], [0, 0, 1, 1], [], []>} : vector<64x16xf32>, vector<16x32xf32>, vector<64x32xf32> -> vector<64x32xf32>
    %217 = arith.addf %172, %216 : vector<64x32xf32>
    %218 = vector.extract_strided_slice %192 {offsets = [64, 0], sizes = [64, 16], strides = [1, 1]} : vector<128x16xf32> to vector<64x16xf32>
    %219 = vector.extract_strided_slice %195 {offsets = [8, 0], sizes = [8, 16], strides = [1, 1]} : vector<16x16xf32> to vector<8x16xf32>
    %220 = vector.extract_strided_slice %198 {offsets = [8, 0], sizes = [8, 16], strides = [1, 1]} : vector<16x16xf32> to vector<8x16xf32>
    %cst_120 = arith.constant dense<0.000000e+00> : vector<64x8xf32>
    %221 = tpu.matmul %218, %219, %cst_120 {dimension_numbers = #tpu.dot_dimension_numbers<[1], [1], [0], [0], [0, 0, 1, 0], [], []>} : vector<64x16xf32>, vector<8x16xf32>, vector<64x8xf32> -> vector<64x8xf32>
    %cst_121 = arith.constant dense<0xFF800000> : vector<64xf32>
    %222 = vector.multi_reduction <maximumf>, %221, %cst_121 [1] : vector<64x8xf32> to vector<64xf32>
    %223 = vector.shape_cast %222 : vector<64xf32> to vector<64x1xf32>
    %224 = vector.broadcast %223 : vector<64x1xf32> to vector<64x8xf32>
    %225 = arith.subf %221, %224 : vector<64x8xf32>
    %226 = math.exp %225 : vector<64x8xf32>
    %cst_122 = arith.constant dense<0.000000e+00> : vector<64xf32>
    %227 = vector.multi_reduction <add>, %226, %cst_122 [1] : vector<64x8xf32> to vector<64xf32>
    %228 = vector.shape_cast %227 : vector<64xf32> to vector<64x1xf32>
    %cst_123 = arith.constant dense<0.000000e+00> : vector<64x16xf32>
    %229 = tpu.matmul %226, %220, %cst_123 {dimension_numbers = #tpu.dot_dimension_numbers<[1], [0], [0], [1], [0, 0, 1, 1], [], []>} : vector<64x8xf32>, vector<8x16xf32>, vector<64x16xf32> -> vector<64x16xf32>
    %230 = tpu.reciprocal %228 {approx = true} : vector<64x1xf32> -> vector<64x1xf32>
    %231 = vector.broadcast %230 : vector<64x1xf32> to vector<64x16xf32>
    %232 = arith.mulf %229, %231 : vector<64x16xf32>
    %cst_124 = arith.constant dense<0.000000e+00> : vector<64x32xf32>
    %233 = tpu.matmul %232, %200, %cst_124 {dimension_numbers = #tpu.dot_dimension_numbers<[1], [0], [0], [1], [0, 0, 1, 1], [], []>} : vector<64x16xf32>, vector<16x32xf32>, vector<64x32xf32> -> vector<64x32xf32>
    %234 = arith.addf %189, %233 : vector<64x32xf32>
    %235 = tpu.concatenate %217, %234 in 0 : vector<64x32xf32>, vector<64x32xf32> -> vector<128x32xf32>
    %c0_125 = arith.constant 0 : index
    %c0_126 = arith.constant 0 : index
    %236 = vector.load %arg16[%c0_125, %c0_126] : memref<1x32xf32, #tpu.memory_space<vmem>>, vector<1x32xf32>
    %237 = vector.broadcast %236 : vector<1x32xf32> to vector<128x32xf32>
    %238 = arith.addf %235, %237 : vector<128x32xf32>
    %239 = arith.addf %119, %238 : vector<128x32xf32>
    %c0_127 = arith.constant 0 : index
    %c0_128 = arith.constant 0 : index
    %240 = vector.load %arg17[%c0_127, %c0_128] : memref<1x32xf32, #tpu.memory_space<vmem>>, vector<1x32xf32>
    %c0_129 = arith.constant 0 : index
    %c0_130 = arith.constant 0 : index
    %241 = vector.load %arg18[%c0_129, %c0_130] : memref<1x32xf32, #tpu.memory_space<vmem>>, vector<1x32xf32>
    %cst_131 = arith.constant dense<0.000000e+00> : vector<128xf32>
    %242 = vector.multi_reduction <add>, %239, %cst_131 [1] : vector<128x32xf32> to vector<128xf32>
    %243 = vector.shape_cast %242 : vector<128xf32> to vector<128x1xf32>
    %cst_132 = arith.constant 3.200000e+01 : f32
    %244 = vector.broadcast %cst_132 : f32 to vector<128x1xf32>
    %245 = arith.divf %243, %244 : vector<128x1xf32>
    %246 = vector.broadcast %245 : vector<128x1xf32> to vector<128x32xf32>
    %247 = arith.subf %239, %246 : vector<128x32xf32>
    %248 = arith.mulf %247, %247 : vector<128x32xf32>
    %cst_133 = arith.constant dense<0.000000e+00> : vector<128xf32>
    %249 = vector.multi_reduction <add>, %248, %cst_133 [1] : vector<128x32xf32> to vector<128xf32>
    %250 = vector.shape_cast %249 : vector<128xf32> to vector<128x1xf32>
    %cst_134 = arith.constant 3.200000e+01 : f32
    %251 = vector.broadcast %cst_134 : f32 to vector<128x1xf32>
    %252 = arith.divf %250, %251 : vector<128x1xf32>
    %cst_135 = arith.constant 9.99999974E-6 : f32
    %253 = vector.broadcast %cst_135 : f32 to vector<128x1xf32>
    %254 = arith.addf %252, %253 : vector<128x1xf32>
    %255 = math.rsqrt %254 : vector<128x1xf32>
    %256 = vector.broadcast %255 : vector<128x1xf32> to vector<128x32xf32>
    %257 = arith.mulf %247, %256 : vector<128x32xf32>
    %258 = vector.broadcast %240 : vector<1x32xf32> to vector<128x32xf32>
    %259 = arith.mulf %257, %258 : vector<128x32xf32>
    %260 = vector.broadcast %241 : vector<1x32xf32> to vector<128x32xf32>
    %261 = arith.addf %259, %260 : vector<128x32xf32>
    %c0_136 = arith.constant 0 : index
    %c0_137 = arith.constant 0 : index
    %262 = vector.load %arg19[%c0_136, %c0_137] : memref<32x256xf32, #tpu.memory_space<vmem>>, vector<32x256xf32>
    %cst_138 = arith.constant dense<0.000000e+00> : vector<128x256xf32>
    %263 = tpu.matmul %261, %262, %cst_138 {dimension_numbers = #tpu.dot_dimension_numbers<[1], [0], [0], [1], [0, 0, 1, 1], [], []>} : vector<128x32xf32>, vector<32x256xf32>, vector<128x256xf32> -> vector<128x256xf32>
    %c0_139 = arith.constant 0 : index
    %c0_140 = arith.constant 0 : index
    %264 = vector.load %arg20[%c0_139, %c0_140] : memref<1x256xf32, #tpu.memory_space<vmem>>, vector<1x256xf32>
    %265 = vector.broadcast %264 : vector<1x256xf32> to vector<128x256xf32>
    %266 = arith.addf %263, %265 : vector<128x256xf32>
    %267 = vector.extract_strided_slice %266 {offsets = [0, 0], sizes = [128, 128], strides = [1, 1]} : vector<128x256xf32> to vector<128x128xf32>
    %268 = vector.extract_strided_slice %266 {offsets = [0, 128], sizes = [128, 128], strides = [1, 1]} : vector<128x256xf32> to vector<128x128xf32>
    %cst_141 = arith.constant 5.000000e-01 : f32
    %269 = vector.broadcast %cst_141 : f32 to vector<128x128xf32>
    %270 = arith.mulf %269, %268 : vector<128x128xf32>
    %cst_142 = arith.constant 4.471500e-02 : f32
    %271 = vector.broadcast %cst_142 : f32 to vector<128x128xf32>
    %272 = arith.mulf %271, %268 : vector<128x128xf32>
    %273 = arith.mulf %272, %268 : vector<128x128xf32>
    %274 = arith.mulf %273, %268 : vector<128x128xf32>
    %275 = arith.addf %268, %274 : vector<128x128xf32>
    %cst_143 = arith.constant 0.797884583 : f32
    %276 = vector.broadcast %cst_143 : f32 to vector<128x128xf32>
    %277 = arith.mulf %276, %275 : vector<128x128xf32>
    %278 = math.tanh %277 : vector<128x128xf32>
    %cst_144 = arith.constant 1.000000e+00 : f32
    %279 = vector.broadcast %cst_144 : f32 to vector<128x128xf32>
    %280 = arith.addf %279, %278 : vector<128x128xf32>
    %281 = arith.mulf %270, %280 : vector<128x128xf32>
    %282 = arith.mulf %267, %281 : vector<128x128xf32>
    %c0_145 = arith.constant 0 : index
    %c0_146 = arith.constant 0 : index
    %283 = vector.load %arg21[%c0_145, %c0_146] : memref<128x32xf32, #tpu.memory_space<vmem>>, vector<128x32xf32>
    %cst_147 = arith.constant dense<0.000000e+00> : vector<128x32xf32>
    %284 = tpu.matmul %282, %283, %cst_147 {dimension_numbers = #tpu.dot_dimension_numbers<[1], [0], [0], [1], [0, 0, 1, 1], [], []>} : vector<128x128xf32>, vector<128x32xf32>, vector<128x32xf32> -> vector<128x32xf32>
    %c0_148 = arith.constant 0 : index
    %c0_149 = arith.constant 0 : index
    %285 = vector.load %arg22[%c0_148, %c0_149] : memref<1x32xf32, #tpu.memory_space<vmem>>, vector<1x32xf32>
    %286 = vector.broadcast %285 : vector<1x32xf32> to vector<128x32xf32>
    %287 = arith.addf %284, %286 : vector<128x32xf32>
    %288 = arith.addf %239, %287 : vector<128x32xf32>
    %c0_150 = arith.constant 0 : index
    %c0_151 = arith.constant 0 : index
    %289 = vector.load %arg23[%c0_150, %c0_151] : memref<128x32xf32, #tpu.memory_space<vmem>>, vector<128x32xf32>
    tpu.vector_store %arg23[%c0_150, %c0_151], %288 {strides = array<i32>} : memref<128x32xf32, #tpu.memory_space<vmem>>, vector<128x32xf32>,
    return
  }
  func.func @transform_0(%arg0: i32) -> (i32, i32) {
    %c0_i32 = arith.constant 0 : i32
    %c0_i32_0 = arith.constant 0 : i32
    return %arg0, %c0_i32 : i32, i32
  }
  func.func @transform_1(%arg0: i32) -> (i32, i32) {
    %c0_i32 = arith.constant 0 : i32
    %c0_i32_0 = arith.constant 0 : i32
    return %arg0, %c0_i32 : i32, i32
  }
  func.func @transform_2(%arg0: i32) -> (i32, i32) {
    %c0_i32 = arith.constant 0 : i32
    %c0_i32_0 = arith.constant 0 : i32
    %c0_i32_1 = arith.constant 0 : i32
    return %c0_i32, %c0_i32_0 : i32, i32
  }
  func.func @transform_3(%arg0: i32) -> (i32, i32) {
    %c0_i32 = arith.constant 0 : i32
    %c0_i32_0 = arith.constant 0 : i32
    %c0_i32_1 = arith.constant 0 : i32
    return %c0_i32, %c0_i32_0 : i32, i32
  }
  func.func @transform_4(%arg0: i32) -> (i32, i32, i32) {
    %c0_i32 = arith.constant 0 : i32
    %c0_i32_0 = arith.constant 0 : i32
    %c0_i32_1 = arith.constant 0 : i32
    %c0_i32_2 = arith.constant 0 : i32
    return %c0_i32, %c0_i32_0, %c0_i32_1 : i32, i32, i32
  }
  func.func @transform_5(%arg0: i32) -> (i32, i32, i32) {
    %c0_i32 = arith.constant 0 : i32
    %c0_i32_0 = arith.constant 0 : i32
    %c0_i32_1 = arith.constant 0 : i32
    %c0_i32_2 = arith.constant 0 : i32
    return %c0_i32, %c0_i32_0, %c0_i32_1 : i32, i32, i32
  }
  func.func @transform_6(%arg0: i32) -> (i32, i32, i32) {
    %c0_i32 = arith.constant 0 : i32
    %c0_i32_0 = arith.constant 0 : i32
    %c0_i32_1 = arith.constant 0 : i32
    %c0_i32_2 = arith.constant 0 : i32
    return %c0_i32, %c0_i32_0, %c0_i32_1 : i32, i32, i32
  }
  func.func @transform_7(%arg0: i32) -> (i32, i32, i32) {
    %c0_i32 = arith.constant 0 : i32
    %c0_i32_0 = arith.constant 0 : i32
    %c0_i32_1 = arith.constant 0 : i32
    %c0_i32_2 = arith.constant 0 : i32
    return %c0_i32, %c0_i32_0, %c0_i32_1 : i32, i32, i32
  }
  func.func @transform_8(%arg0: i32) -> (i32, i32) {
    %c0_i32 = arith.constant 0 : i32
    %c0_i32_0 = arith.constant 0 : i32
    %c0_i32_1 = arith.constant 0 : i32
    return %c0_i32, %c0_i32_0 : i32, i32
  }
  func.func @transform_9(%arg0: i32) -> (i32, i32) {
    %c0_i32 = arith.constant 0 : i32
    %c0_i32_0 = arith.constant 0 : i32
    %c0_i32_1 = arith.constant 0 : i32
    return %c0_i32, %c0_i32_0 : i32, i32
  }
  func.func @transform_10(%arg0: i32) -> (i32, i32) {
    %c0_i32 = arith.constant 0 : i32
    %c0_i32_0 = arith.constant 0 : i32
    %c0_i32_1 = arith.constant 0 : i32
    return %c0_i32, %c0_i32_0 : i32, i32
  }
  func.func @transform_11(%arg0: i32) -> (i32, i32, i32) {
    %c0_i32 = arith.constant 0 : i32
    %c0_i32_0 = arith.constant 0 : i32
    %c0_i32_1 = arith.constant 0 : i32
    %c0_i32_2 = arith.constant 0 : i32
    return %c0_i32, %c0_i32_0, %c0_i32_1 : i32, i32, i32
  }
  func.func @transform_12(%arg0: i32) -> (i32, i32, i32) {
    %c0_i32 = arith.constant 0 : i32
    %c0_i32_0 = arith.constant 0 : i32
    %c0_i32_1 = arith.constant 0 : i32
    %c0_i32_2 = arith.constant 0 : i32
    return %c0_i32, %c0_i32_0, %c0_i32_1 : i32, i32, i32
  }
  func.func @transform_13(%arg0: i32) -> (i32, i32, i32) {
    %c0_i32 = arith.constant 0 : i32
    %c0_i32_0 = arith.constant 0 : i32
    %c0_i32_1 = arith.constant 0 : i32
    %c0_i32_2 = arith.constant 0 : i32
    return %c0_i32, %c0_i32_0, %c0_i32_1 : i32, i32, i32
  }
  func.func @transform_14(%arg0: i32) -> (i32, i32, i32) {
    %c0_i32 = arith.constant 0 : i32
    %c0_i32_0 = arith.constant 0 : i32
    %c0_i32_1 = arith.constant 0 : i32
    %c0_i32_2 = arith.constant 0 : i32
    return %c0_i32, %c0_i32_0, %c0_i32_1 : i32, i32, i32
  }
  func.func @transform_15(%arg0: i32) -> (i32, i32) {
    %c0_i32 = arith.constant 0 : i32
    %c0_i32_0 = arith.constant 0 : i32
    %c0_i32_1 = arith.constant 0 : i32
    return %c0_i32, %c0_i32_0 : i32, i32
  }
  func.func @transform_16(%arg0: i32) -> (i32, i32) {
    %c0_i32 = arith.constant 0 : i32
    %c0_i32_0 = arith.constant 0 : i32
    %c0_i32_1 = arith.constant 0 : i32
    return %c0_i32, %c0_i32_0 : i32, i32
  }
  func.func @transform_17(%arg0: i32) -> (i32, i32) {
    %c0_i32 = arith.constant 0 : i32
    %c0_i32_0 = arith.constant 0 : i32
    %c0_i32_1 = arith.constant 0 : i32
    return %c0_i32, %c0_i32_0 : i32, i32
  }
  func.func @transform_18(%arg0: i32) -> (i32, i32) {
    %c0_i32 = arith.constant 0 : i32
    %c0_i32_0 = arith.constant 0 : i32
    %c0_i32_1 = arith.constant 0 : i32
    return %c0_i32, %c0_i32_0 : i32, i32
  }
  func.func @transform_19(%arg0: i32) -> (i32, i32) {
    %c0_i32 = arith.constant 0 : i32
    %c0_i32_0 = arith.constant 0 : i32
    %c0_i32_1 = arith.constant 0 : i32
    return %c0_i32, %c0_i32_0 : i32, i32
  }
  func.func @transform_20(%arg0: i32) -> (i32, i32) {
    %c0_i32 = arith.constant 0 : i32
    %c0_i32_0 = arith.constant 0 : i32
    %c0_i32_1 = arith.constant 0 : i32
    return %c0_i32, %c0_i32_0 : i32, i32
  }
  func.func @transform_21(%arg0: i32) -> (i32, i32) {
    %c0_i32 = arith.constant 0 : i32
    %c0_i32_0 = arith.constant 0 : i32
    %c0_i32_1 = arith.constant 0 : i32
    return %c0_i32, %c0_i32_0 : i32, i32
  }
  func.func @transform_22(%arg0: i32) -> (i32, i32) {
    %c0_i32 = arith.constant 0 : i32
    %c0_i32_0 = arith.constant 0 : i32
    return %arg0, %c0_i32 : i32, i32
  }
}

</mosaic_0001>

<bundles_post_ra>
// kernel: tpu_custom_call.1
= control target key start
LH: loop header
LB: loop body
LE: loop exit
PB: predicated region body
PF: predicated region fallthrough
CT: control target
= control target key end

     0   :  { %vm89_vm0 = vcmask 261120   ;;  %vm840_vm1 = vcmask 130048   ;;  %vm994_vm3 = vcmask 523264   ;;  %vm4077_vm4 = vcmask 64512   ;;  %s12242_s0 = inlined_call_operand.vmem [shape: f32[128,32], index: 0, kind: input, shape index: {}]   ;;  %s12243_s4 = inlined_call_operand.vmem [shape: f32[2,32,16], index: 4, kind: input, shape index: {}]   ;;  %s12244_s5 = inlined_call_operand.vmem [shape: f32[2,32,16], index: 5, kind: input, shape index: {}]   ;;  %s12245_s6 = inlined_call_operand.vmem [shape: f32[2,32,16], index: 6, kind: input, shape index: {}]   ;;  %s12246_s2 = inlined_call_operand.vmem [shape: f32[1,32], index: 2, kind: input, shape index: {}]   ;;  %s12247_s3 = inlined_call_operand.vmem [shape: f32[1,32], index: 3, kind: input, shape index: {}]   ;;  %s12248_s7 = inlined_call_operand.vmem [shape: f32[2,16,32], index: 7, kind: input, shape index: {}]   ;;  %s12249_s8 = inlined_call_operand.vmem [shape: f32[1,32], index: 8, kind: input, shape index: {}]   ;;  %s12250_s11 = inlined_call_operand.vmem [shape: f32[2,32,16], index: 11, kind: input, shape index: {}]   ;;  %s12251_s12 = inlined_call_operand.vmem [shape: f32[2,16,16], index: 12, kind: input, shape index: {}]   ;;  %s12252_s1 = inlined_call_operand.vmem [shape: f32[16,16], index: 1, kind: input, shape index: {}]   ;;  %s12253_s9 = inlined_call_operand.vmem [shape: f32[1,32], index: 9, kind: input, shape index: {}]   ;;  %s12254_s10 = inlined_call_operand.vmem [shape: f32[1,32], index: 10, kind: input, shape index: {}]   ;;  %s12255_s13 = inlined_call_operand.vmem [shape: f32[2,16,16], index: 13, kind: input, shape index: {}]   ;;  %s12256_s14 = inlined_call_operand.vmem [shape: f32[2,16,32], index: 14, kind: input, shape index: {}]   ;;  %s12257_s15 = inlined_call_operand.vmem [shape: f32[1,32], index: 15, kind: input, shape index: {}]   ;;  %s12258_s18 = inlined_call_operand.vmem [shape: f32[32,256], index: 18, kind: input, shape index: {}]   ;;  %s12259_s16 = inlined_call_operand.vmem [shape: f32[1,32], index: 16, kind: input, shape index: {}]   ;;  %s12260_s17 = inlined_call_operand.vmem [shape: f32[1,32], index: 17, kind: input, shape index: {}]   ;;  %s12261_s20 = inlined_call_operand.vmem [shape: f32[128,32], index: 20, kind: input, shape index: {}]   ;;  %s12262_s19 = inlined_call_operand.vmem [shape: f32[1,256], index: 19, kind: input, shape index: {}]   ;;  %s12263_s21 = inlined_call_operand.vmem [shape: f32[1,32], index: 21, kind: input, shape index: {}]   ;;  %s12264_s22 = inlined_call_operand.vmem [shape: f32[128,32], index: 22, kind: output, shape index: {}]  }
   0x1   :  { %12289 = sst [smem:[#allocation21_spill]] %s12242_s0  ;;  %vm10031_vm2 = vmpackc.low %vm840_vm1, %vm840_vm1 }
   0x2   :  { %12290 = sst [smem:[#allocation22_spill]] %s12243_s4  ;;  %s12296_s29 = sld [smem:[#allocation21_spill]] }
   0x3   :  { %12291 = sst [smem:[#allocation23_spill]] %s12244_s5  ;;  %s12297_s23 = sld [smem:[#allocation22_spill]] }
   0x4   :  { %12292 = sst [smem:[#allocation24_spill]] %s12245_s6  ;;  %s12298_s26 = sld [smem:[#allocation23_spill]] }
   0x5   :  { %12293 = sst [smem:[#allocation25_spill]] %s12246_s2  ;;  %s12299_s5 = sld [smem:[#allocation24_spill]] }
   0x6   :  { %12294 = sst [smem:[#allocation26_spill]] %s12247_s3  ;;  %s12300_s2 = sld [smem:[#allocation25_spill]] }
   0x7   :  { %12295 = sst [smem:[#allocation27_spill]] %s12248_s7  ;;  %s12301_s4 = sld [smem:[#allocation26_spill]] }
   0x8   :  { %v71_v0 = vld [vmem:[%s12296_s29] sm:$0xff]  ;;  %v73_v1 = vld [vmem:[%s12296_s29 + $0x10] sm:$0xff]  ;;  %v72_v2 = vld [vmem:[%s12296_s29 + $0x8] sm:$0xff] }
   0x9   :  { %v90_v3 = vsel %vm89_vm0, %v71_v0, 0.0  ;;  %v96_v4 = vsel %vm89_vm0, %v73_v1, 0.0  ;;  %v74_v5 = vld [vmem:[%s12296_s29 + $0x18] sm:$0xff]  ;;  %v93_v6 = vsel %vm89_vm0, %v72_v2, 0.0  ;;  %v75_v8 = vld [vmem:[%s12296_s29 + $0x20] sm:$0xff]  ;;  %v76_v9 = vld [vmem:[%s12296_s29 + $0x28] sm:$0xff] }
   0xa   :  { %91 = vadd.xlane.f32.xlu0 %v90_v3  ;;  %97 = vadd.xlane.f32.xlu1 %v96_v4  ;;  %v99_v7 = vsel %vm89_vm0, %v74_v5, 0.0  ;;  %v102_v10 = vsel %vm89_vm0, %v75_v8, 0.0  ;;  %v105_v11 = vsel %vm89_vm0, %v76_v9, 0.0  ;;  %v9646_v12 = vld [vmem:[%s12296_s29 + $0x30] sm:$0xff]  ;;  %v9651_v13 = vld [vmem:[%s12296_s29 + $0x38] sm:$0xff]  ;;  %v9660_v16 = vld [vmem:[%s12296_s29 + $0x40] sm:$0xff] }
   0xb   :  { %v108_v14 = vsel %vm89_vm0, %v9646_v12, 0.0  ;;  %v111_v15 = vsel %vm89_vm0, %v9651_v13, 0.0  ;;  %v9665_v17 = vld [vmem:[%s12296_s29 + $0x48] sm:$0xff]  ;;  %v114_v18 = vsel %vm89_vm0, %v9660_v16, 0.0  ;;  %v9674_v20 = vld [vmem:[%s12296_s29 + $0x50] sm:$0xff]  ;;  %v9679_v21 = vld [vmem:[%s12296_s29 + $0x58] sm:$0xff] }
   0xc   :  { %v117_v19 = vsel %vm89_vm0, %v9665_v17, 0.0  ;;  %v120_v22 = vsel %vm89_vm0, %v9674_v20, 0.0  ;;  %v123_v23 = vsel %vm89_vm0, %v9679_v21, 0.0  ;;  %v9688_v24 = vld [vmem:[%s12296_s29 + $0x60] sm:$0xff]  ;;  %v9693_v25 = vld [vmem:[%s12296_s29 + $0x68] sm:$0xff]  ;;  %v9702_v28 = vld [vmem:[%s12296_s29 + $0x70] sm:$0xff] }
   0xd   :  { %v126_v26 = vsel %vm89_vm0, %v9688_v24, 0.0  ;;  %v129_v27 = vsel %vm89_vm0, %v9693_v25, 0.0  ;;  %v9707_v29 = vld [vmem:[%s12296_s29 + $0x78] sm:$0xff]  ;;  %v132_v30 = vsel %vm89_vm0, %v9702_v28, 0.0 }
   0xe   :  { %94 = vadd.xlane.f32.xlu0 %v93_v6  ;;  %100 = vadd.xlane.f32.xlu1 %v99_v7  ;;  %v135_v31 = vsel %vm89_vm0, %v9707_v29, 0.0 }
  0x12   :  { %103 = vadd.xlane.f32.xlu0 %v102_v10  ;;  %106 = vadd.xlane.f32.xlu1 %v105_v11 }
  0x16   :  { %109 = vadd.xlane.f32.xlu0 %v108_v14  ;;  %112 = vadd.xlane.f32.xlu1 %v111_v15 }
  0x1a   :  { %115 = vadd.xlane.f32.xlu0 %v114_v18  ;;  %118 = vadd.xlane.f32.xlu1 %v117_v19 }
  0x1e   :  { %121 = vadd.xlane.f32.xlu0 %v120_v22  ;;  %124 = vadd.xlane.f32.xlu1 %v123_v23 }
  0x22   :  { %127 = vadd.xlane.f32.xlu0 %v126_v26  ;;  %130 = vadd.xlane.f32.xlu1 %v129_v27 }
  0x26   :  { %133 = vadd.xlane.f32.xlu0 %v132_v30  ;;  %136 = vadd.xlane.f32.xlu1 %v135_v31 }
  0x97   :  { %v92_v32 = vpop.xlane.xlu0 %91  ;;  %v98_v33 = vpop.xlane.xlu1 %97 }
  0x98   :  { %v139_v34 = vmul.f32 0.03125, %v92_v32  ;;  %v141_v35 = vmul.f32 0.03125, %v98_v33 }
  0x9a   :  { %v9713_v36 = vsub.f32 %v71_v0, %v139_v34  ;;  %v9715_v37 = vsub.f32 %v73_v1, %v141_v35 }
  0x9b   :  { %v95_v38 = vpop.xlane.xlu0 %94  ;;  %v101_v39 = vpop.xlane.xlu1 %100 }
  0x9c   :  { %v140_v40 = vmul.f32 0.03125, %v95_v38  ;;  %v142_v41 = vmul.f32 0.03125, %v101_v39  ;;  %v171_v42 = vmul.f32 %v9713_v36, %v9713_v36  ;;  %v173_v43 = vmul.f32 %v9715_v37, %v9715_v37 }
  0x9e   :  { %v9721_v44 = vsub.f32 %v72_v2, %v140_v40  ;;  %v9723_v45 = vsub.f32 %v74_v5, %v142_v41  ;;  %v187_v46 = vsel %vm89_vm0, %v171_v42, 0.0  ;;  %v193_v49 = vsel %vm89_vm0, %v173_v43, 0.0 }
  0x9f   :  { %188 = vadd.xlane.f32.xlu0 %v187_v46  ;;  %v104_v47 = vpop.xlane.xlu0 %103  ;;  %v107_v48 = vpop.xlane.xlu1 %106 }
  0xa0   :  { %v143_v50 = vmul.f32 0.03125, %v104_v47  ;;  %v144_v51 = vmul.f32 0.03125, %v107_v48  ;;  %v172_v52 = vmul.f32 %v9721_v44, %v9721_v44  ;;  %v174_v53 = vmul.f32 %v9723_v45, %v9723_v45 }
  0xa2   :  { %v9731_v54 = vsub.f32 %v75_v8, %v143_v50  ;;  %v9733_v55 = vsub.f32 %v76_v9, %v144_v51  ;;  %v190_v56 = vsel %vm89_vm0, %v172_v52, 0.0  ;;  %v196_v59 = vsel %vm89_vm0, %v174_v53, 0.0  ;;  %v344_v53 = vld [vmem:[%s12297_s23 + $0x8] sm:$0xff] }
  0xa3   :  { %194 = vadd.xlane.f32.xlu0 %v193_v49  ;;  %191 = vadd.xlane.f32.xlu1 %v190_v56  ;;  %v110_v57 = vpop.xlane.xlu0 %109  ;;  %v113_v58 = vpop.xlane.xlu1 %112  ;;  %v540_v56 = vld [vmem:[%s12298_s26] sm:$0xff] }
  0xa4   :  { %v145_v60 = vmul.f32 0.03125, %v110_v57  ;;  %v146_v61 = vmul.f32 0.03125, %v113_v58  ;;  %v175_v62 = vmul.f32 %v9731_v54, %v9731_v54  ;;  %v176_v63 = vmul.f32 %v9733_v55, %v9733_v55  ;;  %v541_v58 = vld [vmem:[%s12298_s26 + $0x8] sm:$0xff] }
  0xa6   :  { %v9742_v0 = vsub.f32 %v9646_v12, %v145_v60  ;;  %v9745_v1 = vsub.f32 %v9651_v13, %v146_v61  ;;  %v199_v2 = vsel %vm89_vm0, %v175_v62, 0.0  ;;  %v202_v5 = vsel %vm89_vm0, %v176_v63, 0.0  ;;  %v345_v60 = vld [vmem:[%s12297_s23 + $0x10] sm:$0xff]  ;;  %v346_v61 = vld [vmem:[%s12297_s23 + $0x18] sm:$0xff] }
  0xa7   :  { %197 = vadd.xlane.f32.xlu1 %v196_v59  ;;  %200 = vadd.xlane.f32.xlu0 %v199_v2  ;;  %v116_v3 = vpop.xlane.xlu0 %115  ;;  %v119_v4 = vpop.xlane.xlu1 %118  ;;  %v8766_v59 = vpack.c.bf16 %v541_v58, %v540_v56  ;;  %v8762_v62 = vpack.c.bf16 %v346_v61, %v345_v60  ;;  %v542_v63 = vld [vmem:[%s12298_s26 + $0x10] sm:$0xff]  ;;  %v543_v2 = vld [vmem:[%s12298_s26 + $0x18] sm:$0xff] }
  0xa8   :  { %v147_v6 = vmul.f32 0.03125, %v116_v3  ;;  %v148_v7 = vmul.f32 0.03125, %v119_v4  ;;  %v177_v8 = vmul.f32 %v9742_v0, %v9742_v0  ;;  %v178_v9 = vmul.f32 %v9745_v1, %v9745_v1  ;;  %v689_v4 = vld [vmem:[%s12299_s5] sm:$0xff]  ;;  %v691_v61 = vld [vmem:[%s12299_s5 + $0x10] sm:$0xff] }
  0xa9   :  { %8767 = vmatprep.subr.bf16.mxu1 %v8766_v59  ;;  %v8770_v3 = vpack.c.bf16 %v543_v2, %v542_v63 }
  0xaa   :  { %v9754_v10 = vsub.f32 %v9660_v16, %v147_v6  ;;  %v9757_v11 = vsub.f32 %v9665_v17, %v148_v7  ;;  %v205_v12 = vsel %vm89_vm0, %v177_v8, 0.0  ;;  %v208_v15 = vsel %vm89_vm0, %v178_v9, 0.0  ;;  %8769 = vmatpush3.bf16.msra.mxu1 %v8766_v59 }
  0xab   :  { %203 = vadd.xlane.f32.xlu1 %v202_v5  ;;  %206 = vadd.xlane.f32.xlu0 %v205_v12  ;;  %v122_v13 = vpop.xlane.xlu0 %121  ;;  %v125_v14 = vpop.xlane.xlu1 %124  ;;  %v690_v5 = vld [vmem:[%s12299_s5 + $0x8] sm:$0xff] }
  0xac   :  { %v149_v18 = vmul.f32 0.03125, %v122_v13  ;;  %v150_v19 = vmul.f32 0.03125, %v125_v14  ;;  %v179_v22 = vmul.f32 %v9754_v10, %v9754_v10  ;;  %v180_v16 = vmul.f32 %v9757_v11, %v9757_v11  ;;  %8771 = vmatprep.subr.bf16.mxu1 %v8770_v3 }
  0xad   :  { %v9833_v6 = vpack.c.bf16 %v690_v5, %v689_v4 }
  0xae   :  { %v9766_v23 = vsub.f32 %v9674_v20, %v149_v18  ;;  %v9769_v17 = vsub.f32 %v9679_v21, %v150_v19  ;;  %v211_v26 = vsel %vm89_vm0, %v179_v22, 0.0  ;;  %v214_v31 = vsel %vm89_vm0, %v180_v16, 0.0  ;;  %8773 = vmatpush3.bf16.msra.mxu1 %v8770_v3 }
  0xaf   :  { %209 = vadd.xlane.f32.xlu1 %v208_v15  ;;  %212 = vadd.xlane.f32.xlu0 %v211_v26  ;;  %v128_v27 = vpop.xlane.xlu0 %127  ;;  %v131_v30 = vpop.xlane.xlu1 %130 }
  0xb0   :  { %v151_v32 = vmul.f32 0.03125, %v128_v27  ;;  %v152_v33 = vmul.f32 0.03125, %v131_v30  ;;  %v181_v34 = vmul.f32 %v9766_v23, %v9766_v23  ;;  %v182_v20 = vmul.f32 %v9769_v17, %v9769_v17 }
  0xb2   :  { %v9778_v35 = vsub.f32 %v9688_v24, %v151_v32  ;;  %v9781_v21 = vsub.f32 %v9693_v25, %v152_v33  ;;  %v217_v38 = vsel %vm89_vm0, %v181_v34, 0.0  ;;  %v220_v41 = vsel %vm89_vm0, %v182_v20, 0.0 }
  0xb3   :  { %215 = vadd.xlane.f32.xlu1 %v214_v31  ;;  %218 = vadd.xlane.f32.xlu0 %v217_v38  ;;  %v134_v39 = vpop.xlane.xlu0 %133  ;;  %v137_v40 = vpop.xlane.xlu1 %136 }
  0xb4   :  { %v153_v42 = vmul.f32 0.03125, %v134_v39  ;;  %v154_v43 = vmul.f32 0.03125, %v137_v40  ;;  %v183_v46 = vmul.f32 %v9778_v35, %v9778_v35  ;;  %v184_v24 = vmul.f32 %v9781_v21, %v9781_v21  ;;  %v9839_v39 = vld [vmem:[%s12300_s2] ss:$0 sm:$0xff] }
  0xb6   :  { %v9790_v47 = vsub.f32 %v9702_v28, %v153_v42  ;;  %v9793_v25 = vsub.f32 %v9707_v29, %v154_v43  ;;  %v223_v48 = vsel %vm89_vm0, %v183_v46, 0.0  ;;  %v226_v49 = vsel %vm89_vm0, %v184_v24, 0.0  ;;  %v343_v29 = vld [vmem:[%s12297_s23] sm:$0xff] }
  0xb7   :  { %221 = vadd.xlane.f32.xlu1 %v220_v41  ;;  %224 = vadd.xlane.f32.xlu0 %v223_v48  ;;  %v8758_v57 = vpack.c.bf16 %v344_v53, %v343_v29 }
  0xb8   :  { %v185_v50 = vmul.f32 %v9790_v47, %v9790_v47  ;;  %v186_v51 = vmul.f32 %v9793_v25, %v9793_v25 }
  0xb9   :  { %8759 = vmatprep.subr.bf16.mxu0 %v8758_v57 }
  0xba   :  { %v229_v52 = vsel %vm89_vm0, %v185_v50, 0.0  ;;  %v232_v28 = vsel %vm89_vm0, %v186_v51, 0.0  ;;  %8761 = vmatpush3.bf16.msra.mxu0 %v8758_v57 }
  0xbb   :  { %227 = vadd.xlane.f32.xlu1 %v226_v49  ;;  %230 = vadd.xlane.f32.xlu0 %v229_v52  ;;  %v9845_v49 = vld [vmem:[%s12301_s4] ss:$0 sm:$0xff] }
  0xbc   :  { %8763 = vmatprep.subr.bf16.mxu0 %v8762_v62 }
  0xbe   :  { %8765 = vmatpush3.bf16.msra.mxu0 %v8762_v62  ;;  %v692_v62 = vld [vmem:[%s12299_s5 + $0x18] sm:$0xff] }
  0xbf   :  { %233 = vadd.xlane.f32.xlu1 %v232_v28  ;;  %8775 = vmatprep.subr.bf16.mxu0 %v9833_v6 }
 0x12c   :  { %v189_v7 = vpop.xlane.xlu0 %188 }
 0x12d   :  { %v235_v8 = vmul.f32 0.03125, %v189_v7 }
 0x12f   :  { %v251_v9 = vadd.f32 1e-05, %v235_v8 }
 0x130   :  { %v192_v12 = vpop.xlane.xlu1 %191  ;;  %v195_v13 = vpop.xlane.xlu0 %194 }
 0x131   :  { %9103 = vrsqrt.f32 %v251_v9  ;;  %v236_v14 = vmul.f32 0.03125, %v192_v12  ;;  %v237_v15 = vmul.f32 0.03125, %v195_v13  ;;  %v8778_v12 = vpack.c.bf16 %v692_v62, %v691_v61 }
 0x133   :  { %v252_v18 = vadd.f32 1e-05, %v236_v14  ;;  %v253_v19 = vadd.f32 1e-05, %v237_v15 }
 0x134   :  { %v198_v22 = vpop.xlane.xlu1 %197  ;;  %v201_v16 = vpop.xlane.xlu0 %200 }
 0x135   :  { %9105 = vrsqrt.f32 %v252_v18  ;;  %v238_v26 = vmul.f32 0.03125, %v198_v22  ;;  %v239_v27 = vmul.f32 0.03125, %v201_v16 }
 0x136   :  { %9107 = vrsqrt.f32 %v253_v19 }
 0x137   :  { %v254_v30 = vadd.f32 1e-05, %v238_v26  ;;  %v255_v31 = vadd.f32 1e-05, %v239_v27 }
 0x138   :  { %v204_v32 = vpop.xlane.xlu1 %203  ;;  %v207_v33 = vpop.xlane.xlu0 %206 }
 0x139   :  { %9109 = vrsqrt.f32 %v254_v30  ;;  %v240_v34 = vmul.f32 0.03125, %v204_v32  ;;  %v241_v20 = vmul.f32 0.03125, %v207_v33 }
 0x13a   :  { %9111 = vrsqrt.f32 %v255_v31 }
 0x13b   :  { %v9104_v38 = vpop.eup %9103  ;;  %v256_v40 = vadd.f32 1e-05, %v240_v34  ;;  %v257_v41 = vadd.f32 1e-05, %v241_v20 }
 0x13c   :  { %v283_v42 = vmul.f32 %v9104_v38, %v9713_v36  ;;  %v210_v43 = vpop.xlane.xlu1 %209  ;;  %v213_v46 = vpop.xlane.xlu0 %212 }
 0x13d   :  { %9113 = vrsqrt.f32 %v256_v40  ;;  %v242_v24 = vmul.f32 0.03125, %v210_v43  ;;  %v243_v48 = vmul.f32 0.03125, %v213_v46 }
 0x13e   :  { %v305_v50 = vmul.f32 %v9839_v39, %v283_v42  ;;  %9115 = vrsqrt.f32 %v257_v41 }
 0x13f   :  { %v9106_v51 = vpop.eup %9105  ;;  %v258_v52 = vadd.f32 1e-05, %v242_v24  ;;  %v259_v28 = vadd.f32 1e-05, %v243_v48 }
 0x140   :  { %v9108_v29 = vpop.eup %9107  ;;  %v284_v53 = vmul.f32 %v9106_v51, %v9721_v44  ;;  %v216_v36 = vpop.xlane.xlu1 %215  ;;  %v9850_v57 = vadd.f32 %v9845_v49, %v305_v50 }
 0x141   :  { %v219_v56 = vpop.xlane.xlu0 %218  ;;  %v285_v58 = vmul.f32 %v9108_v29, %v9715_v37  ;;  %9117 = vrsqrt.f32 %v258_v52  ;;  %v244_v59 = vmul.f32 0.03125, %v216_v36 }
 0x142   :  { %v245_v60 = vmul.f32 0.03125, %v219_v56  ;;  %v306_v44 = vmul.f32 %v9839_v39, %v284_v53  ;;  %9119 = vrsqrt.f32 %v259_v28  ;;  %7962 = vmatprep.mubr.msk.f32.mxu0 %vm89_vm0, %v9850_v57  ;;  %7994 = vmatprep.mubr.msk.f32.mxu1 %vm89_vm0, %v9850_v57 }
 0x143   :  { %v9110_v37 = vpop.eup %9109  ;;  %v307_v63 = vmul.f32 %v9839_v39, %v285_v58  ;;  %v260_v2 = vadd.f32 1e-05, %v244_v59 }
 0x144   :  { %v261_v3 = vadd.f32 1e-05, %v245_v60  ;;  %v9112_v4 = vpop.eup %9111  ;;  %v286_v5 = vmul.f32 %v9110_v37, %v9723_v45  ;;  %v222_v7 = vpop.xlane.xlu1 %221  ;;  %v9867_v9 = vadd.f32 %v9845_v49, %v306_v44 }
 0x145   :  { %v225_v8 = vpop.xlane.xlu0 %224  ;;  %v287_v13 = vmul.f32 %v9112_v4, %v9731_v54  ;;  %9121 = vrsqrt.f32 %v260_v2  ;;  %v246_v14 = vmul.f32 0.03125, %v222_v7  ;;  %v9876_v45 = vadd.f32 %v9845_v49, %v307_v63 }
 0x146   :  { %v247_v15 = vmul.f32 0.03125, %v225_v8  ;;  %v308_v18 = vmul.f32 %v9839_v39, %v286_v5  ;;  %9123 = vrsqrt.f32 %v261_v3  ;;  %7963 = vmatmul.mubr.msk.f32.vlgmr.msra.gmra.mrb[0].mxu0 %vm89_vm0, %v9867_v9  ;;  %7995 = vmatmul.mubr.msk.f32.vlgmr.msra.gmra.mrb[0].mxu1 %vm89_vm0, %v9867_v9 }
 0x147   :  { %v9114_v19 = vpop.eup %9113  ;;  %v309_v22 = vmul.f32 %v9839_v39, %v287_v13  ;;  %v262_v16 = vadd.f32 1e-05, %v246_v14  ;;  %8777 = vmatpush3.bf16.msra.mxu0 %v9833_v6  ;;  %7965 = vmatprep.mubr.msk.f32.mxu0 %vm89_vm0, %v9876_v45 }
 0x148   :  { %v263_v54 = vadd.f32 1e-05, %v247_v15  ;;  %v9116_v26 = vpop.eup %9115  ;;  %v288_v27 = vmul.f32 %v9114_v19, %v9733_v55  ;;  %7997 = vmatprep.mubr.msk.f32.mxu1 %vm89_vm0, %v9876_v45  ;;  %v228_v30 = vpop.xlane.xlu1 %227  ;;  %v9886_v32 = vadd.f32 %v9845_v49, %v308_v18  ;;  %8779 = vmatprep.subr.bf16.mxu0 %v8778_v12 }
 0x149   :  { %v231_v31 = vpop.xlane.xlu0 %230  ;;  %v289_v33 = vmul.f32 %v9116_v26, %v9742_v0  ;;  %9125 = vrsqrt.f32 %v262_v16  ;;  %v248_v34 = vmul.f32 0.03125, %v228_v30  ;;  %v9895_v55 = vadd.f32 %v9845_v49, %v309_v22 }
 0x14a   :  { %v249_v20 = vmul.f32 0.03125, %v231_v31  ;;  %v310_v6 = vmul.f32 %v9839_v39, %v288_v27  ;;  %9127 = vrsqrt.f32 %v263_v54  ;;  %7966 = vmatmul.mubr.msk.f32.gmra.mrb[2].mxu0 %vm89_vm0, %v9886_v32  ;;  %7998 = vmatmul.mubr.msk.f32.gmra.mrb[2].mxu1 %vm89_vm0, %v9886_v32 }
 0x14b   :  { %v9118_v38 = vpop.eup %9117  ;;  %v311_v40 = vmul.f32 %v9839_v39, %v289_v33  ;;  %v264_v0 = vadd.f32 1e-05, %v248_v34  ;;  %8781 = vmatpush3.bf16.msra.mxu0 %v8778_v12  ;;  %7968 = vmatprep.mubr.msk.f32.mxu0 %vm89_vm0, %v9895_v55 }
 0x14c   :  { %v265_v41 = vadd.f32 1e-05, %v249_v20  ;;  %v9120_v42 = vpop.eup %9119  ;;  %v290_v43 = vmul.f32 %v9118_v38, %v9745_v1  ;;  %8000 = vmatprep.mubr.msk.f32.mxu1 %vm89_vm0, %v9895_v55  ;;  %v234_v46 = vpop.xlane.xlu1 %233  ;;  %v9904_v24 = vadd.f32 %v9845_v49, %v310_v6 }
 0x14d   :  { %v291_v48 = vmul.f32 %v9120_v42, %v9754_v10  ;;  %9129 = vrsqrt.f32 %v264_v0  ;;  %v250_v50 = vmul.f32 0.03125, %v234_v46  ;;  %v9908_v51 = vadd.f32 %v9845_v49, %v311_v40 }
 0x14e   :  { %v312_v52 = vmul.f32 %v9839_v39, %v290_v43  ;;  %9131 = vrsqrt.f32 %v265_v41  ;;  %7969 = vmatmul.mubr.msk.f32.gmra.mrb[4].mxu0 %vm89_vm0, %v9904_v24  ;;  %8001 = vmatmul.mubr.msk.f32.gmra.mrb[4].mxu1 %vm89_vm0, %v9904_v24 }
 0x14f   :  { %v9122_v1 = vpop.eup %9121  ;;  %v313_v28 = vmul.f32 %v9839_v39, %v291_v48  ;;  %v266_v29 = vadd.f32 1e-05, %v250_v50  ;;  %7971 = vmatprep.mubr.msk.f32.mxu0 %vm89_vm0, %v9908_v51  ;;  %8003 = vmatprep.mubr.msk.f32.mxu1 %vm89_vm0, %v9908_v51 }
 0x150   :  { %v9124_v10 = vpop.eup %9123  ;;  %v292_v53 = vmul.f32 %v9122_v1, %v9757_v11  ;;  %v9922_v36 = vadd.f32 %v9845_v49, %v312_v52 }
 0x151   :  { %v293_v56 = vmul.f32 %v9124_v10, %v9766_v23  ;;  %9133 = vrsqrt.f32 %v266_v29  ;;  %v9926_v58 = vadd.f32 %v9845_v49, %v313_v28 }
 0x152   :  { %v314_v59 = vmul.f32 %v9839_v39, %v292_v53  ;;  %7972 = vmatmul.mubr.msk.f32.gmra.mrb[6].mxu0 %vm89_vm0, %v9922_v36  ;;  %8004 = vmatmul.mubr.msk.f32.gmra.mrb[6].mxu1 %vm89_vm0, %v9922_v36 }
 0x153   :  { %v9126_v60 = vpop.eup %9125  ;;  %v315_v11 = vmul.f32 %v9839_v39, %v293_v56  ;;  %7974 = vmatprep.mubr.msk.f32.mxu0 %vm89_vm0, %v9926_v58  ;;  %8006 = vmatprep.mubr.msk.f32.mxu1 %vm89_vm0, %v9926_v58 }
 0x154   :  { %v9128_v23 = vpop.eup %9127  ;;  %v294_v61 = vmul.f32 %v9126_v60, %v9769_v17  ;;  %v9940_v62 = vadd.f32 %v9845_v49, %v314_v59 }
 0x155   :  { %v295_v44 = vmul.f32 %v9128_v23, %v9778_v35  ;;  %v9944_v37 = vadd.f32 %v9845_v49, %v315_v11 }
 0x156   :  { %v316_v63 = vmul.f32 %v9839_v39, %v294_v61  ;;  %7975 = vmatmul.mubr.msk.f32.gmra.mrb[8].mxu0 %vm89_vm0, %v9940_v62  ;;  %8007 = vmatmul.mubr.msk.f32.gmra.mrb[8].mxu1 %vm89_vm0, %v9940_v62 }
 0x157   :  { %v9130_v2 = vpop.eup %9129  ;;  %v317_v3 = vmul.f32 %v9839_v39, %v295_v44  ;;  %7977 = vmatprep.mubr.msk.f32.mxu0 %vm89_vm0, %v9944_v37  ;;  %8009 = vmatprep.mubr.msk.f32.mxu1 %vm89_vm0, %v9944_v37 }
 0x158   :  { %v9132_v17 = vpop.eup %9131  ;;  %v296_v35 = vmul.f32 %v9130_v2, %v9781_v21  ;;  %v9958_v4 = vadd.f32 %v9845_v49, %v316_v63 }
 0x159   :  { %v297_v5 = vmul.f32 %v9132_v17, %v9790_v47  ;;  %v9962_v7 = vadd.f32 %v9845_v49, %v317_v3 }
 0x15a   :  { %v318_v8 = vmul.f32 %v9839_v39, %v296_v35  ;;  %7978 = vmatmul.mubr.msk.f32.gmra.mrb[10].mxu0 %vm89_vm0, %v9958_v4  ;;  %8010 = vmatmul.mubr.msk.f32.gmra.mrb[10].mxu1 %vm89_vm0, %v9958_v4 }
 0x15b   :  { %v9134_v12 = vpop.eup %9133  ;;  %v319_v13 = vmul.f32 %v9839_v39, %v297_v5  ;;  %7980 = vmatprep.mubr.msk.f32.mxu0 %vm89_vm0, %v9962_v7  ;;  %8012 = vmatprep.mubr.msk.f32.mxu1 %vm89_vm0, %v9962_v7 }
 0x15c   :  { %v298_v21 = vmul.f32 %v9134_v12, %v9793_v25  ;;  %v9976_v47 = vadd.f32 %v9845_v49, %v318_v8 }
 0x15d   :  { %v9979_v14 = vadd.f32 %v9845_v49, %v319_v13 }
 0x15e   :  { %v320_v15 = vmul.f32 %v9839_v39, %v298_v21  ;;  %7981 = vmatmul.mubr.msk.f32.gmra.mrb[12].mxu0 %vm89_vm0, %v9976_v47  ;;  %8013 = vmatmul.mubr.msk.f32.gmra.mrb[12].mxu1 %vm89_vm0, %v9976_v47 }
 0x15f   :  { %7983 = vmatprep.mubr.msk.f32.mxu0 %vm89_vm0, %v9979_v14  ;;  %8015 = vmatprep.mubr.msk.f32.mxu1 %vm89_vm0, %v9979_v14 }
 0x160   :  { %v9991_v25 = vadd.f32 %v9845_v49, %v320_v15 }
 0x162   :  { %7984 = vmatmul.mubr.msk.f32.gmra.mrb[14].mxu0 %vm89_vm0, %v9991_v25  ;;  %8016 = vmatmul.mubr.msk.f32.gmra.mrb[14].mxu1 %vm89_vm0, %v9991_v25 }
 0x163   :  { %8026 = vmatprep.mubr.msk.f32.mxu0 %vm89_vm0, %v9850_v57 }
 0x166   :  { %8027 = vmatmul.mubr.msk.f32.vlgmr.msra.gmra.mrb[16].mxu0 %vm89_vm0, %v9867_v9 }
 0x167   :  { %8029 = vmatprep.mubr.msk.f32.mxu0 %vm89_vm0, %v9876_v45 }
 0x16a   :  { %8030 = vmatmul.mubr.msk.f32.gmra.mrb[18].mxu0 %vm89_vm0, %v9886_v32 }
 0x16b   :  { %8032 = vmatprep.mubr.msk.f32.mxu0 %vm89_vm0, %v9895_v55 }
 0x16e   :  { %8033 = vmatmul.mubr.msk.f32.gmra.mrb[20].mxu0 %vm89_vm0, %v9904_v24 }
 0x16f   :  { %8035 = vmatprep.mubr.msk.f32.mxu0 %vm89_vm0, %v9908_v51 }
 0x172   :  { %8036 = vmatmul.mubr.msk.f32.gmra.mrb[22].mxu0 %vm89_vm0, %v9922_v36 }
 0x173   :  { %8038 = vmatprep.mubr.msk.f32.mxu0 %vm89_vm0, %v9926_v58 }
 0x176   :  { %8039 = vmatmul.mubr.msk.f32.gmra.mrb[24].mxu0 %vm89_vm0, %v9940_v62 }
 0x177   :  { %8041 = vmatprep.mubr.msk.f32.mxu0 %vm89_vm0, %v9944_v37 }
 0x17a   :  { %8042 = vmatmul.mubr.msk.f32.gmra.mrb[26].mxu0 %vm89_vm0, %v9958_v4 }
 0x17b   :  { %8044 = vmatprep.mubr.msk.f32.mxu0 %vm89_vm0, %v9962_v7 }
 0x17e   :  { %8045 = vmatmul.mubr.msk.f32.gmra.mrb[28].mxu0 %vm89_vm0, %v9976_v47 }
 0x17f   :  { %8047 = vmatprep.mubr.msk.f32.mxu0 %vm89_vm0, %v9979_v14 }
 0x182   :  { %8048 = vmatmul.mubr.msk.f32.gmra.mrb[30].mxu0 %vm89_vm0, %v9991_v25 }
 0x219   :  { %v7964_v39 = vpop.f32.mrb[0].mxu0  ;;  %v7996_v49 = vpop.f32.mrb[0].mxu1 }
 0x21a   :  { %v461_v18 = vpop.f32.mrb[1].mxu0  ;;  %v610_v19 = vpop.f32.mrb[1].mxu1 }
 0x21b   :  { %v8782_v16 = vpack.c.bf16 %v7996_v49, %v610_v19  ;;  %8066 = vmatprep.mubr.msk.f32.mxu1 %vm840_vm1, %v461_v18  ;;  %v7152_v49 = vld [vmem:[%s12297_s23 + $0x28] sm:$0xff] }
 0x21d   :  { %v7967_v54 = vpop.f32.mrb[2].mxu0  ;;  %v7999_v26 = vpop.f32.mrb[2].mxu1  ;;  %8784 = vmatprep.subr.msk.bf16.mxu1 %vm10031_vm2, %v8782_v16 }
 0x21e   :  { %v471_v27 = vpop.f32.mrb[3].mxu0  ;;  %v620_v30 = vpop.f32.mrb[3].mxu1  ;;  %8787 = vmatpush3.bf16.xpose.msk.msra.mxu1 %vm10031_vm2, %v8782_v16 }
 0x21f   :  { %v8788_v31 = vpack.c.bf16 %v7999_v26, %v620_v30 }
 0x221   :  { %v10040_v33 = vpop.f32.mrb[4].mxu0  ;;  %v8002_v34 = vpop.f32.mrb[4].mxu1  ;;  %8790 = vmatprep.subr.msk.bf16.mxu1 %vm10031_vm2, %v8788_v31 }
 0x222   :  { %v481_v20 = vpop.f32.mrb[5].mxu0  ;;  %v630_v6 = vpop.f32.mrb[5].mxu1 }
 0x223   :  { %v8794_v38 = vpack.c.bf16 %v8002_v34, %v630_v6 }
 0x225   :  { %v10044_v40 = vpop.f32.mrb[6].mxu0  ;;  %v8005_v0 = vpop.f32.mrb[6].mxu1 }
 0x226   :  { %v491_v41 = vpop.f32.mrb[7].mxu0  ;;  %v640_v42 = vpop.f32.mrb[7].mxu1  ;;  %8793 = vmatpush3.bf16.xpose.msk.msra.mxu1 %vm10031_vm2, %v8788_v31  ;;  %v7153_v31 = vld [vmem:[%s12297_s23 + $0x30] sm:$0xff] }
 0x227   :  { %v8800_v43 = vpack.c.bf16 %v8005_v0, %v640_v42  ;;  %8796 = vmatprep.subr.msk.bf16.mxu1 %vm10031_vm2, %v8794_v38  ;;  %v7192_v0 = vld [vmem:[%s12299_s5 + $0x28] sm:$0xff] }
 0x229   :  { %v10050_v46 = vpop.f32.mrb[8].mxu0  ;;  %v8008_v48 = vpop.f32.mrb[8].mxu1 }
 0x22a   :  { %v501_v50 = vpop.f32.mrb[9].mxu0  ;;  %v650_v52 = vpop.f32.mrb[9].mxu1 }
 0x22b   :  { %v8822_v1 = vpack.c.bf16 %v8008_v48, %v650_v52  ;;  %8122 = vmatprep.mubr.msk.f32.mxu0 %vm840_vm1, %v501_v50 }
 0x22d   :  { %v10053_v28 = vpop.f32.mrb[10].mxu0  ;;  %v8011_v29 = vpop.f32.mrb[10].mxu1  ;;  %8824 = vmatprep.subr.msk.bf16.mxu0 %vm10031_vm2, %v8822_v1 }
 0x22e   :  { %v10057_v10 = vpop.f32.mrb[11].mxu0  ;;  %v660_v53 = vpop.f32.mrb[11].mxu1  ;;  %8799 = vmatpush3.bf16.xpose.msk.msra.mxu1 %vm10031_vm2, %v8794_v38  ;;  %8827 = vmatpush3.bf16.xpose.msk.msra.mxu0 %vm10031_vm2, %v8822_v1 }
 0x22f   :  { %v8828_v56 = vpack.c.bf16 %v8011_v29, %v660_v53  ;;  %8802 = vmatprep.subr.msk.bf16.mxu1 %vm10031_vm2, %v8800_v43 }
 0x231   :  { %v10065_v59 = vpop.f32.mrb[12].mxu0  ;;  %v8014_v60 = vpop.f32.mrb[12].mxu1  ;;  %8830 = vmatprep.subr.msk.bf16.mxu0 %vm10031_vm2, %v8828_v56 }
 0x232   :  { %v10069_v11 = vpop.f32.mrb[13].mxu0  ;;  %v670_v23 = vpop.f32.mrb[13].mxu1 }
 0x233   :  { %v8834_v61 = vpack.c.bf16 %v8014_v60, %v670_v23 }
 0x235   :  { %v10071_v44 = vpop.f32.mrb[14].mxu0  ;;  %v8017_v63 = vpop.f32.mrb[14].mxu1 }
 0x236   :  { %v10073_v2 = vpop.f32.mrb[15].mxu0  ;;  %v680_v3 = vpop.f32.mrb[15].mxu1  ;;  %8805 = vmatpush3.bf16.xpose.msk.msra.mxu1 %vm10031_vm2, %v8800_v43  ;;  %8833 = vmatpush3.bf16.xpose.msk.msra.mxu0 %vm10031_vm2, %v8828_v56 }
 0x237   :  { %v8840_v17 = vpack.c.bf16 %v8017_v63, %v680_v3  ;;  %8836 = vmatprep.subr.msk.bf16.mxu0 %vm10031_vm2, %v8834_v61 }
 0x239   :  { %v8028_v35 = vpop.f32.mrb[16].mxu0 }
 0x23a   :  { %v759_v5 = vpop.f32.mrb[17].mxu0 }
 0x23b   :  { %v8806_v8 = vpack.c.bf16 %v8028_v35, %v759_v5 }
 0x23d   :  { %v8031_v12 = vpop.f32.mrb[18].mxu0  ;;  %8067 = vmatmul.mubr.msk.f32.vlgmr.msra.gmra.mrb[16].mxu1 %vm840_vm1, %v7964_v39  ;;  %8807 = vmatprep.subr.bf16.mxu1 %v8806_v8  ;;  %v7151_v39 = vld [vmem:[%s12297_s23 + $0x20] sm:$0xff] }
 0x23e   :  { %v769_v13 = vpop.f32.mrb[19].mxu0  ;;  %8069 = vmatprep.mubr.msk.f32.mxu1 %vm840_vm1, %v471_v27  ;;  %8809 = vmatpush3.bf16.msra.mxu1 %v8806_v8  ;;  %v8862_v16 = vpack.c.bf16 %v7152_v49, %v7151_v39 }
 0x23f   :  { %v8810_v21 = vpack.c.bf16 %v8031_v12, %v769_v13  ;;  %8839 = vmatpush3.bf16.xpose.msk.msra.mxu0 %vm10031_vm2, %v8834_v61 }
 0x240   :  { %8842 = vmatprep.subr.msk.bf16.mxu0 %vm10031_vm2, %v8840_v17 }
 0x241   :  { %v8034_v15 = vpop.f32.mrb[20].mxu0  ;;  %8070 = vmatmul.mubr.msk.f32.gmra.mrb[18].mxu1 %vm840_vm1, %v7967_v54  ;;  %8811 = vmatprep.subr.bf16.mxu1 %v8810_v21 }
 0x242   :  { %v779_v18 = vpop.f32.mrb[21].mxu0  ;;  %8072 = vmatprep.mubr.msk.f32.mxu1 %vm840_vm1, %v481_v20  ;;  %8813 = vmatpush3.bf16.msra.mxu1 %v8810_v21 }
 0x243   :  { %v8814_v19 = vpack.c.bf16 %v8034_v15, %v779_v18 }
 0x245   :  { %v8037_v26 = vpop.f32.mrb[22].mxu0  ;;  %8073 = vmatmul.mubr.msk.f32.gmra.mrb[20].mxu1 %vm840_vm1, %v10040_v33  ;;  %8815 = vmatprep.subr.bf16.mxu1 %v8814_v19  ;;  %v7154_v33 = vld [vmem:[%s12297_s23 + $0x38] sm:$0xff]  ;;  %s12325_s23 = sld [smem:[#allocation27_spill]] }
 0x246   :  { %v789_v54 = vpop.f32.mrb[23].mxu0  ;;  %8075 = vmatprep.mubr.msk.f32.mxu1 %vm840_vm1, %v491_v41  ;;  %8817 = vmatpush3.bf16.msra.mxu1 %v8814_v19  ;;  %v8866_v6 = vpack.c.bf16 %v7154_v33, %v7153_v31 }
 0x247   :  { %v8818_v27 = vpack.c.bf16 %v8037_v26, %v789_v54  ;;  %8845 = vmatpush3.bf16.xpose.msk.msra.mxu0 %vm10031_vm2, %v8840_v17 }
 0x248   :  { %8863 = vmatprep.subr.bf16.mxu0 %v8862_v16 }
 0x249   :  { %v8040_v30 = vpop.f32.mrb[24].mxu0  ;;  %8076 = vmatmul.mubr.msk.f32.gmra.mrb[22].mxu1 %vm840_vm1, %v10044_v40  ;;  %8819 = vmatprep.subr.bf16.mxu1 %v8818_v27  ;;  %v7191_v40 = vld [vmem:[%s12299_s5 + $0x20] sm:$0xff] }
 0x24a   :  { %v799_v34 = vpop.f32.mrb[25].mxu0  ;;  %8821 = vmatpush3.bf16.msra.mxu1 %v8818_v27  ;;  %v8878_v43 = vpack.c.bf16 %v7192_v0, %v7191_v40 }
 0x24b   :  { %v10108_v20 = vpack.c.bf16 %v8040_v30, %v799_v34 }
 0x24d   :  { %v8043_v38 = vpop.f32.mrb[26].mxu0  ;;  %8847 = vmatprep.subr.bf16.mxu1 %v10108_v20 }
 0x24e   :  { %8123 = vmatmul.mubr.msk.f32.vlgmr.msra.gmra.mrb[32].mxu0 %vm840_vm1, %v10050_v46  ;;  %v809_v41 = vpop.f32.mrb[27].mxu0 }
 0x24f   :  { %v10119_v42 = vpack.c.bf16 %v8043_v38, %v809_v41  ;;  %8125 = vmatprep.mubr.msk.f32.mxu0 %vm840_vm1, %v10057_v10  ;;  %8865 = vmatpush3.bf16.msra.mxu0 %v8862_v16  ;;  %v7194_v10 = vld [vmem:[%s12299_s5 + $0x38] sm:$0xff] }
 0x250   :  { %8867 = vmatprep.subr.bf16.mxu0 %v8866_v6 }
 0x251   :  { %v8046_v48 = vpop.f32.mrb[28].mxu0 }
 0x252   :  { %8126 = vmatmul.mubr.msk.f32.gmra.mrb[34].mxu0 %vm840_vm1, %v10053_v28  ;;  %v819_v50 = vpop.f32.mrb[29].mxu0  ;;  %v7193_v28 = vld [vmem:[%s12299_s5 + $0x30] sm:$0xff] }
 0x253   :  { %v10125_v52 = vpack.c.bf16 %v8046_v48, %v819_v50  ;;  %8128 = vmatprep.mubr.msk.f32.mxu0 %vm840_vm1, %v10069_v11  ;;  %8869 = vmatpush3.bf16.msra.mxu0 %v8866_v6  ;;  %v8882_v53 = vpack.c.bf16 %v7194_v10, %v7193_v28 }
 0x254   :  { %8879 = vmatprep.subr.bf16.mxu0 %v8878_v43 }
 0x255   :  { %v8049_v46 = vpop.f32.mrb[30].mxu0 }
 0x256   :  { %8129 = vmatmul.mubr.msk.f32.gmra.mrb[36].mxu0 %vm840_vm1, %v10065_v59  ;;  %v829_v1 = vpop.f32.mrb[31].mxu0 }
 0x257   :  { %v10131_v29 = vpack.c.bf16 %v8049_v46, %v829_v1  ;;  %8131 = vmatprep.mubr.msk.f32.mxu0 %vm840_vm1, %v10073_v2 }
 0x25a   :  { %8132 = vmatmul.mubr.msk.f32.gmra.mrb[38].mxu0 %vm840_vm1, %v10071_v44 }
 0x25b   :  { %8170 = vmatprep.mubr.msk.f32.mxu0 %vm89_vm0, %v9850_v57 }
 0x25e   :  { %8171 = vmatmul.mubr.msk.f32.vlgmr.msra.gmra.mrb[40].mxu0 %vm89_vm0, %v9867_v9 }
 0x25f   :  { %8173 = vmatprep.mubr.msk.f32.mxu0 %vm89_vm0, %v9876_v45  ;;  %8881 = vmatpush3.bf16.msra.mxu0 %v8878_v43 }
 0x260   :  { %8883 = vmatprep.subr.bf16.mxu0 %v8882_v53 }
 0x262   :  { %8174 = vmatmul.mubr.msk.f32.gmra.mrb[42].mxu0 %vm89_vm0, %v9886_v32 }
 0x263   :  { %8176 = vmatprep.mubr.msk.f32.mxu0 %vm89_vm0, %v9895_v55  ;;  %8885 = vmatpush3.bf16.msra.mxu0 %v8882_v53 }
 0x266   :  { %8177 = vmatmul.mubr.msk.f32.gmra.mrb[44].mxu0 %vm89_vm0, %v9904_v24 }
 0x267   :  { %8179 = vmatprep.mubr.msk.f32.mxu0 %vm89_vm0, %v9908_v51 }
 0x26a   :  { %8180 = vmatmul.mubr.msk.f32.gmra.mrb[46].mxu0 %vm89_vm0, %v9922_v36 }
 0x26b   :  { %8182 = vmatprep.mubr.msk.f32.mxu0 %vm89_vm0, %v9926_v58 }
 0x26e   :  { %8183 = vmatmul.mubr.msk.f32.gmra.mrb[48].mxu0 %vm89_vm0, %v9940_v62 }
 0x26f   :  { %8185 = vmatprep.mubr.msk.f32.mxu0 %vm89_vm0, %v9944_v37 }
 0x272   :  { %8186 = vmatmul.mubr.msk.f32.gmra.mrb[50].mxu0 %vm89_vm0, %v9958_v4 }
 0x273   :  { %8188 = vmatprep.mubr.msk.f32.mxu0 %vm89_vm0, %v9962_v7 }
 0x276   :  { %8189 = vmatmul.mubr.msk.f32.gmra.mrb[52].mxu0 %vm89_vm0, %v9976_v47 }
 0x277   :  { %8191 = vmatprep.mubr.msk.f32.mxu0 %vm89_vm0, %v9979_v14 }
 0x27a   :  { %8192 = vmatmul.mubr.msk.f32.gmra.mrb[54].mxu0 %vm89_vm0, %v9991_v25 }
 0x27b   :  { %8234 = vmatprep.mubr.msk.f32.mxu0 %vm89_vm0, %v9850_v57 }
 0x27e   :  { %8235 = vmatmul.mubr.msk.f32.vlgmr.msra.gmra.mrb[56].mxu0 %vm89_vm0, %v9867_v9 }
 0x27f   :  { %8237 = vmatprep.mubr.msk.f32.mxu0 %vm89_vm0, %v9876_v45 }
 0x282   :  { %8238 = vmatmul.mubr.msk.f32.gmra.mrb[58].mxu0 %vm89_vm0, %v9886_v32 }
 0x283   :  { %8240 = vmatprep.mubr.msk.f32.mxu0 %vm89_vm0, %v9895_v55 }
 0x286   :  { %8241 = vmatmul.mubr.msk.f32.gmra.mrb[60].mxu0 %vm89_vm0, %v9904_v24 }
 0x287   :  { %8243 = vmatprep.mubr.msk.f32.mxu0 %vm89_vm0, %v9908_v51 }
 0x28a   :  { %8244 = vmatmul.mubr.msk.f32.gmra.mrb[62].mxu0 %vm89_vm0, %v9922_v36 }
 0x28b   :  { %8246 = vmatprep.mubr.msk.f32.mxu0 %vm89_vm0, %v9926_v58 }
 0x28e   :  { %8247 = vmatmul.mubr.msk.f32.gmra.mrb[64].mxu0 %vm89_vm0, %v9940_v62 }
 0x28f   :  { %8249 = vmatprep.mubr.msk.f32.mxu0 %vm89_vm0, %v9944_v37 }
 0x292   :  { %8250 = vmatmul.mubr.msk.f32.gmra.mrb[66].mxu0 %vm89_vm0, %v9958_v4 }
 0x293   :  { %8252 = vmatprep.mubr.msk.f32.mxu0 %vm89_vm0, %v9962_v7 }
 0x296   :  { %8253 = vmatmul.mubr.msk.f32.gmra.mrb[68].mxu0 %vm89_vm0, %v9976_v47 }
 0x297   :  { %8255 = vmatprep.mubr.msk.f32.mxu0 %vm89_vm0, %v9979_v14 }
 0x29a   :  { %8256 = vmatmul.mubr.msk.f32.gmra.mrb[70].mxu0 %vm89_vm0, %v9991_v25 }
 0x310   :  { %v10207_v56 = vpop.f32.mrb[16].mxu1 }
 0x311   :  { %v10209_v59 = vpop.f32.mrb[17].mxu1  ;;  %v998_v60 = vsel %vm994_vm3, %v10207_v56, -inf }
 0x312   :  { %999 = vmax.xlane.f32.xlu1 %v998_v60  ;;  %v995_v11 = vsel %vm994_vm3, %v10209_v59, -inf }
 0x313   :  { %996 = vmax.xlane.f32.xlu0 %v995_v11 }
 0x314   :  { %v10215_v23 = vpop.f32.mrb[18].mxu1 }
 0x315   :  { %v10217_v61 = vpop.f32.mrb[19].mxu1  ;;  %v1004_v44 = vsel %vm994_vm3, %v10215_v23, -inf }
 0x316   :  { %1005 = vmax.xlane.f32.xlu1 %v1004_v44  ;;  %v1001_v63 = vsel %vm994_vm3, %v10217_v61, -inf }
 0x317   :  { %1002 = vmax.xlane.f32.xlu0 %v1001_v63 }
 0x318   :  { %v10223_v2 = vpop.f32.mrb[20].mxu1 }
 0x319   :  { %v10225_v3 = vpop.f32.mrb[21].mxu1  ;;  %v1010_v17 = vsel %vm994_vm3, %v10223_v2, -inf }
 0x31a   :  { %1011 = vmax.xlane.f32.xlu1 %v1010_v17  ;;  %v1007_v35 = vsel %vm994_vm3, %v10225_v3, -inf }
 0x31b   :  { %1008 = vmax.xlane.f32.xlu0 %v1007_v35 }
 0x31c   :  { %v10231_v5 = vpop.f32.mrb[22].mxu1 }
 0x31d   :  { %v10233_v8 = vpop.f32.mrb[23].mxu1  ;;  %v1016_v12 = vsel %vm994_vm3, %v10231_v5, -inf }
 0x31e   :  { %1017 = vmax.xlane.f32.xlu1 %v1016_v12  ;;  %v1013_v13 = vsel %vm994_vm3, %v10233_v8, -inf }
 0x31f   :  { %1014 = vmax.xlane.f32.xlu0 %v1013_v13 }
 0x321   :  { %v10239_v21 = vpop.f32.mrb[32].mxu0 }
 0x322   :  { %v10241_v15 = vpop.f32.mrb[33].mxu0  ;;  %v1368_v39 = vsel %vm994_vm3, %v10239_v21, -inf }
 0x323   :  { %1369 = vmax.xlane.f32.xlu1 %v1368_v39  ;;  %v1365_v49 = vsel %vm994_vm3, %v10241_v15, -inf }
 0x324   :  { %1366 = vmax.xlane.f32.xlu0 %v1365_v49 }
 0x325   :  { %v10247_v18 = vpop.f32.mrb[34].mxu0 }
 0x326   :  { %v10249_v19 = vpop.f32.mrb[35].mxu0  ;;  %v1374_v16 = vsel %vm994_vm3, %v10247_v18, -inf }
 0x327   :  { %1375 = vmax.xlane.f32.xlu1 %v1374_v16  ;;  %v1371_v26 = vsel %vm994_vm3, %v10249_v19, -inf }
 0x328   :  { %1372 = vmax.xlane.f32.xlu0 %v1371_v26 }
 0x329   :  { %v10255_v54 = vpop.f32.mrb[36].mxu0 }
 0x32a   :  { %v10257_v27 = vpop.f32.mrb[37].mxu0  ;;  %v1380_v30 = vsel %vm994_vm3, %v10255_v54, -inf }
 0x32b   :  { %1381 = vmax.xlane.f32.xlu1 %v1380_v30  ;;  %v1377_v31 = vsel %vm994_vm3, %v10257_v27, -inf }
 0x32c   :  { %1378 = vmax.xlane.f32.xlu0 %v1377_v31 }
 0x32d   :  { %v10263_v33 = vpop.f32.mrb[38].mxu0 }
 0x32e   :  { %v10265_v34 = vpop.f32.mrb[39].mxu0  ;;  %v1386_v6 = vsel %vm994_vm3, %v10263_v33, -inf }
 0x32f   :  { %1387 = vmax.xlane.f32.xlu1 %v1386_v6  ;;  %v1383_v38 = vsel %vm994_vm3, %v10265_v34, -inf }
 0x330   :  { %1384 = vmax.xlane.f32.xlu0 %v1383_v38 }
 0x331   :  { %v10271_v40 = vpop.f32.mrb[40].mxu0 }
 0x332   :  { %v10273_v0 = vpop.f32.mrb[41].mxu0 }
 0x335   :  { %v10275_v41 = vpop.f32.mrb[42].mxu0 }
 0x336   :  { %v10277_v43 = vpop.f32.mrb[43].mxu0 }
 0x339   :  { %v10279_v48 = vpop.f32.mrb[44].mxu0 }
 0x33a   :  { %v10281_v50 = vpop.f32.mrb[45].mxu0 }
 0x33d   :  { %v10283_v46 = vpop.f32.mrb[46].mxu0 }
 0x33e   :  { %12304 = vst [vmem:[#allocation2_spill] sm:$0xff] %v10283_v46  ;;  %v10285_v1 = vpop.f32.mrb[47].mxu0 }
 0x341   :  { %v10287_v28 = vpop.f32.mrb[48].mxu0 }
 0x342   :  { %12305 = vst [vmem:[#allocation3_spill] sm:$0xff] %v10287_v28  ;;  %v10289_v10 = vpop.f32.mrb[49].mxu0 }
 0x343   :  { %12306 = vst [vmem:[#allocation4_spill] sm:$0xff] %v10289_v10 }
 0x345   :  { %v10291_v53 = vpop.f32.mrb[50].mxu0 }
 0x346   :  { %12307 = vst [vmem:[#allocation5_spill] sm:$0xff] %v10291_v53  ;;  %v10293_v60 = vpop.f32.mrb[51].mxu0 }
 0x347   :  { %12308 = vst [vmem:[#allocation6_spill] sm:$0xff] %v10293_v60 }
 0x349   :  { %v10295_v11 = vpop.f32.mrb[52].mxu0 }
 0x34a   :  { %12309 = vst [vmem:[#allocation7_spill] sm:$0xff] %v10295_v11  ;;  %v10297_v44 = vpop.f32.mrb[53].mxu0 }
 0x34b   :  { %12310 = vst [vmem:[#allocation8_spill] sm:$0xff] %v10297_v44 }
 0x34d   :  { %v10299_v63 = vpop.f32.mrb[54].mxu0 }
 0x34e   :  { %12311 = vst [vmem:[#allocation9_spill] sm:$0xff] %v10299_v63  ;;  %v10301_v17 = vpop.f32.mrb[55].mxu0 }
 0x34f   :  { %12312 = vst [vmem:[#allocation10_spill] sm:$0xff] %v10301_v17 }
 0x351   :  { %v8236_v35 = vpop.f32.mrb[56].mxu0  ;;  %v12322_v22 = vld [vmem:[#allocation7_spill] sm:$0xff] }
 0x352   :  { %v1953_v12 = vpop.f32.mrb[57].mxu0 }
 0x353   :  { %v10303_v13 = vpack.c.bf16 %v8236_v35, %v1953_v12 }
 0x355   :  { %v8239_v39 = vpop.f32.mrb[58].mxu0 }
 0x356   :  { %v1963_v49 = vpop.f32.mrb[59].mxu0 }
 0x357   :  { %v10305_v16 = vpack.c.bf16 %v8239_v39, %v1963_v49 }
 0x359   :  { %v8242_v26 = vpop.f32.mrb[60].mxu0 }
 0x35a   :  { %v1973_v30 = vpop.f32.mrb[61].mxu0 }
 0x35b   :  { %v10307_v31 = vpack.c.bf16 %v8242_v26, %v1973_v30 }
 0x35d   :  { %v8245_v6 = vpop.f32.mrb[62].mxu0 }
 0x35e   :  { %v1983_v38 = vpop.f32.mrb[63].mxu0 }
 0x35f   :  { %v10309_v11 = vpack.c.bf16 %v8245_v6, %v1983_v38 }
 0x361   :  { %v8248_v44 = vpop.f32.mrb[64].mxu0 }
 0x362   :  { %v1993_v63 = vpop.f32.mrb[65].mxu0 }
 0x363   :  { %v10311_v53 = vpack.c.bf16 %v8248_v44, %v1993_v63 }
 0x365   :  { %12313 = vst [vmem:[#allocation11_spill] sm:$0xff] %v10311_v53  ;;  %v8251_v17 = vpop.f32.mrb[66].mxu0 }
 0x366   :  { %v2003_v60 = vpop.f32.mrb[67].mxu0 }
 0x367   :  { %v10313_v35 = vpack.c.bf16 %v8251_v17, %v2003_v60 }
 0x369   :  { %v8254_v12 = vpop.f32.mrb[68].mxu0 }
 0x36a   :  { %v2013_v28 = vpop.f32.mrb[69].mxu0 }
 0x36b   :  { %v10315_v39 = vpack.c.bf16 %v8254_v12, %v2013_v28 }
 0x36d   :  { %12314 = vst [vmem:[#allocation12_spill] sm:$0xff] %v10315_v39  ;;  %v8257_v49 = vpop.f32.mrb[70].mxu0 }
 0x36e   :  { %v2023_v10 = vpop.f32.mrb[71].mxu0 }
 0x36f   :  { %v10317_v26 = vpack.c.bf16 %v8257_v49, %v2023_v10 }
 0x371   :  { %12315 = vst [vmem:[#allocation13_spill] sm:$0xff] %v10317_v26 }
 0x39f   :  { %v1000_v30 = vpop.xlane.xlu1 %999 }
 0x3a0   :  { %v1020_v6 = vsub.f32 %v10207_v56, %v1000_v30  ;;  %v997_v38 = vpop.xlane.xlu0 %996 }
 0x3a1   :  { %v1019_v46 = vsub.f32 %v10209_v59, %v997_v38 }
 0x3a2   :  { %v1029_v44 = vmul.f32 1.442695, %v1020_v6 }
 0x3a3   :  { %v1027_v63 = vmul.f32 1.442695, %v1019_v46  ;;  %v1006_v53 = vpop.xlane.xlu1 %1005 }
 0x3a4   :  { %v1022_v60 = vsub.f32 %v10215_v23, %v1006_v53  ;;  %v1003_v17 = vpop.xlane.xlu0 %1002 }
 0x3a5   :  { %9135 = vpow2.f32 %v1027_v63  ;;  %v1021_v28 = vsub.f32 %v10217_v61, %v1003_v17 }
 0x3a6   :  { %9137 = vpow2.f32 %v1029_v44  ;;  %v1033_v12 = vmul.f32 1.442695, %v1022_v60 }
 0x3a7   :  { %v1031_v39 = vmul.f32 1.442695, %v1021_v28  ;;  %v1012_v10 = vpop.xlane.xlu1 %1011 }
 0x3a8   :  { %v1024_v49 = vsub.f32 %v10223_v2, %v1012_v10  ;;  %v1009_v26 = vpop.xlane.xlu0 %1008 }
 0x3a9   :  { %9139 = vpow2.f32 %v1031_v39  ;;  %v1023_v56 = vsub.f32 %v10225_v3, %v1009_v26 }
 0x3aa   :  { %9141 = vpow2.f32 %v1033_v12  ;;  %v1037_v59 = vmul.f32 1.442695, %v1024_v49 }
 0x3ab   :  { %v1035_v46 = vmul.f32 1.442695, %v1023_v56  ;;  %v1018_v30 = vpop.xlane.xlu1 %1017 }
 0x3ac   :  { %v1026_v23 = vsub.f32 %v10231_v5, %v1018_v30  ;;  %v1015_v53 = vpop.xlane.xlu0 %1014 }
 0x3ad   :  { %9143 = vpow2.f32 %v1035_v46  ;;  %v1025_v61 = vsub.f32 %v10233_v8, %v1015_v53 }
 0x3ae   :  { %9145 = vpow2.f32 %v1037_v59  ;;  %v1041_v6 = vmul.f32 1.442695, %v1026_v23 }
 0x3af   :  { %v10327_v38 = vpop.eup %9135  ;;  %v1039_v44 = vmul.f32 1.442695, %v1025_v61 }
 0x3b0   :  { %v10329_v2 = vpop.eup %9137  ;;  %v1370_v39 = vpop.xlane.xlu1 %1369  ;;  %8094 = vmatprep.mubr.msk.f32.mxu1 %vm994_vm3, %v10327_v38 }
 0x3b1   :  { %9147 = vpow2.f32 %v1039_v44  ;;  %v1390_v3 = vsub.f32 %v10239_v21, %v1370_v39  ;;  %v1367_v26 = vpop.xlane.xlu0 %1366  ;;  %8095 = vmatmul.mubr.msk.f32.vlgmr.msra.gmra.mrb[24].mxu1 %vm994_vm3, %v10329_v2 }
 0x3b2   :  { %9149 = vpow2.f32 %v1041_v6  ;;  %v1389_v5 = vsub.f32 %v10241_v15, %v1367_v26  ;;  %8849 = vmatpush3.bf16.msra.mxu1 %v10108_v20 }
 0x3b3   :  { %v10338_v8 = vpop.eup %9139  ;;  %v1399_v63 = vmul.f32 1.442695, %v1390_v3  ;;  %8851 = vmatprep.subr.bf16.mxu1 %v10119_v42 }
 0x3b4   :  { %v10341_v60 = vpop.eup %9141  ;;  %v1397_v17 = vmul.f32 1.442695, %v1389_v5  ;;  %v1376_v28 = vpop.xlane.xlu1 %1375  ;;  %8097 = vmatprep.mubr.msk.f32.mxu1 %vm994_vm3, %v10338_v8 }
 0x3b5   :  { %v1392_v21 = vsub.f32 %v10247_v18, %v1376_v28  ;;  %v1373_v12 = vpop.xlane.xlu0 %1372  ;;  %8098 = vmatmul.mubr.msk.f32.gmra.mrb[26].mxu1 %vm994_vm3, %v10341_v60  ;;  %v7171_v18 = vld [vmem:[%s12298_s26 + $0x20] sm:$0xff] }
 0x3b6   :  { %9151 = vpow2.f32 %v1397_v17  ;;  %v1391_v20 = vsub.f32 %v10249_v19, %v1373_v12  ;;  %8853 = vmatpush3.bf16.msra.mxu1 %v10119_v42  ;;  %v7172_v42 = vld [vmem:[%s12298_s26 + $0x28] sm:$0xff] }
 0x3b7   :  { %v10350_v15 = vpop.eup %9143  ;;  %9153 = vpow2.f32 %v1399_v63  ;;  %v1403_v10 = vmul.f32 1.442695, %v1392_v21  ;;  %8855 = vmatprep.subr.bf16.mxu1 %v10125_v52  ;;  %v8870_v61 = vpack.c.bf16 %v7172_v42, %v7171_v18 }
 0x3b8   :  { %v10353_v49 = vpop.eup %9145  ;;  %v1401_v56 = vmul.f32 1.442695, %v1391_v20  ;;  %v1382_v59 = vpop.xlane.xlu1 %1381  ;;  %8100 = vmatprep.mubr.msk.f32.mxu1 %vm994_vm3, %v10350_v15 }
 0x3b9   :  { %v1394_v19 = vsub.f32 %v10255_v54, %v1382_v59  ;;  %v1379_v46 = vpop.xlane.xlu0 %1378  ;;  %8101 = vmatmul.mubr.msk.f32.gmra.mrb[28].mxu1 %vm994_vm3, %v10353_v49 }
 0x3ba   :  { %9155 = vpow2.f32 %v1401_v56  ;;  %v1393_v30 = vsub.f32 %v10257_v27, %v1379_v46  ;;  %8857 = vmatpush3.bf16.msra.mxu1 %v10125_v52  ;;  %v7173_v52 = vld [vmem:[%s12298_s26 + $0x30] sm:$0xff]  ;;  %v7174_v27 = vld [vmem:[%s12298_s26 + $0x38] sm:$0xff] }
 0x3bb   :  { %v10368_v23 = vpop.eup %9147  ;;  %9157 = vpow2.f32 %v1403_v10  ;;  %v1407_v53 = vmul.f32 1.442695, %v1394_v19  ;;  %8859 = vmatprep.subr.bf16.mxu1 %v10131_v29  ;;  %v8874_v17 = vpack.c.bf16 %v7174_v27, %v7173_v52 }
 0x3bc   :  { %v10371_v6 = vpop.eup %9149  ;;  %v1405_v44 = vmul.f32 1.442695, %v1393_v30  ;;  %v1388_v54 = vpop.xlane.xlu1 %1387  ;;  %8103 = vmatprep.mubr.msk.f32.mxu1 %vm994_vm3, %v10368_v23 }
 0x3bd   :  { %v1396_v39 = vsub.f32 %v10263_v33, %v1388_v54  ;;  %v1385_v3 = vpop.xlane.xlu0 %1384  ;;  %8104 = vmatmul.mubr.msk.f32.gmra.mrb[30].mxu1 %vm994_vm3, %v10371_v6 }
 0x3be   :  { %9159 = vpow2.f32 %v1405_v44  ;;  %v1395_v26 = vsub.f32 %v10265_v34, %v1385_v3  ;;  %8861 = vmatpush3.bf16.msra.mxu1 %v10131_v29 }
 0x3bf   :  { %9161 = vpow2.f32 %v1407_v53  ;;  %v1411_v5 = vmul.f32 1.442695, %v1396_v39  ;;  %8871 = vmatprep.subr.bf16.mxu1 %v8870_v61 }
 0x3c0   :  { %v10386_v33 = vpop.eup %9151  ;;  %v1409_v63 = vmul.f32 1.442695, %v1395_v26 }
 0x3c1   :  { %v10388_v28 = vpop.eup %9153  ;;  %8150 = vmatprep.mubr.msk.f32.mxu1 %vm994_vm3, %v10386_v33 }
 0x3c2   :  { %9163 = vpow2.f32 %v1409_v63  ;;  %8151 = vmatmul.mubr.msk.f32.vlgmr.msra.gmra.mrb[32].mxu1 %vm994_vm3, %v10388_v28 }
 0x3c3   :  { %9165 = vpow2.f32 %v1411_v5  ;;  %8873 = vmatpush3.bf16.msra.mxu1 %v8870_v61 }
 0x3c4   :  { %v10394_v34 = vpop.eup %9155  ;;  %8875 = vmatprep.subr.bf16.mxu1 %v8874_v17 }
 0x3c5   :  { %v10396_v29 = vpop.eup %9157  ;;  %8153 = vmatprep.mubr.msk.f32.mxu1 %vm994_vm3, %v10394_v34 }
 0x3c6   :  { %8154 = vmatmul.mubr.msk.f32.gmra.mrb[34].mxu1 %vm994_vm3, %v10396_v29 }
 0x3c7   :  { %8877 = vmatpush3.bf16.msra.mxu1 %v8874_v17 }
 0x3c8   :  { %v10402_v21 = vpop.eup %9159 }
 0x3c9   :  { %v10404_v12 = vpop.eup %9161  ;;  %8156 = vmatprep.mubr.msk.f32.mxu1 %vm994_vm3, %v10402_v21 }
 0x3ca   :  { %8157 = vmatmul.mubr.msk.f32.gmra.mrb[36].mxu1 %vm994_vm3, %v10404_v12 }
 0x3cc   :  { %v10410_v20 = vpop.eup %9163 }
 0x3cd   :  { %v10412_v10 = vpop.eup %9165  ;;  %8159 = vmatprep.mubr.msk.f32.mxu1 %vm994_vm3, %v10410_v20 }
 0x3ce   :  { %8160 = vmatmul.mubr.msk.f32.gmra.mrb[38].mxu1 %vm994_vm3, %v10412_v10 }
 0x3cf   :  { %8202 = vmatprep.mubr.msk.f32.mxu1 %vm89_vm0, %v9850_v57 }
 0x3d2   :  { %8203 = vmatmul.mubr.msk.f32.vlgmr.msra.gmra.mrb[40].mxu1 %vm89_vm0, %v9867_v9 }
 0x3d3   :  { %8205 = vmatprep.mubr.msk.f32.mxu1 %vm89_vm0, %v9876_v45 }
 0x3d6   :  { %8206 = vmatmul.mubr.msk.f32.gmra.mrb[42].mxu1 %vm89_vm0, %v9886_v32 }
 0x3d7   :  { %8208 = vmatprep.mubr.msk.f32.mxu1 %vm89_vm0, %v9895_v55 }
 0x3da   :  { %8209 = vmatmul.mubr.msk.f32.gmra.mrb[44].mxu1 %vm89_vm0, %v9904_v24 }
 0x3db   :  { %8211 = vmatprep.mubr.msk.f32.mxu1 %vm89_vm0, %v9908_v51 }
 0x3de   :  { %8212 = vmatmul.mubr.msk.f32.gmra.mrb[46].mxu1 %vm89_vm0, %v9922_v36 }
 0x3df   :  { %8214 = vmatprep.mubr.msk.f32.mxu1 %vm89_vm0, %v9926_v58 }
 0x3e2   :  { %8215 = vmatmul.mubr.msk.f32.gmra.mrb[48].mxu1 %vm89_vm0, %v9940_v62 }
 0x3e3   :  { %8217 = vmatprep.mubr.msk.f32.mxu1 %vm89_vm0, %v9944_v37 }
 0x3e6   :  { %8218 = vmatmul.mubr.msk.f32.gmra.mrb[50].mxu1 %vm89_vm0, %v9958_v4 }
 0x3e7   :  { %8220 = vmatprep.mubr.msk.f32.mxu1 %vm89_vm0, %v9962_v7 }
 0x3ea   :  { %8221 = vmatmul.mubr.msk.f32.gmra.mrb[52].mxu1 %vm89_vm0, %v9976_v47 }
 0x3eb   :  { %8223 = vmatprep.mubr.msk.f32.mxu1 %vm89_vm0, %v9979_v14 }
 0x3ee   :  { %8224 = vmatmul.mubr.msk.f32.gmra.mrb[54].mxu1 %vm89_vm0, %v9991_v25 }
 0x3ef   :  { %8274 = vmatprep.mubr.msk.f32.mxu1 %vm840_vm1, %v10273_v0 }
 0x484   :  { %v10452_v57 = vpop.f32.mrb[24].mxu1 }
 0x485   :  { %v10454_v9 = vpop.f32.mrb[25].mxu1 }
 0x488   :  { %v10456_v45 = vpop.f32.mrb[26].mxu1 }
 0x489   :  { %v10458_v32 = vpop.f32.mrb[27].mxu1 }
 0x48c   :  { %v10460_v55 = vpop.f32.mrb[28].mxu1 }
 0x48d   :  { %v10462_v24 = vpop.f32.mrb[29].mxu1 }
 0x490   :  { %v10464_v51 = vpop.f32.mrb[30].mxu1 }
 0x491   :  { %v10466_v36 = vpop.f32.mrb[31].mxu1 }
 0x495   :  { %v10468_v58 = vpop.f32.mrb[32].mxu1 }
 0x496   :  { %v10470_v62 = vpop.f32.mrb[33].mxu1 }
 0x499   :  { %v10472_v37 = vpop.f32.mrb[34].mxu1 }
 0x49a   :  { %v10474_v4 = vpop.f32.mrb[35].mxu1 }
 0x49d   :  { %v10476_v7 = vpop.f32.mrb[36].mxu1 }
 0x49e   :  { %v10478_v47 = vpop.f32.mrb[37].mxu1 }
 0x4a1   :  { %v10480_v14 = vpop.f32.mrb[38].mxu1 }
 0x4a2   :  { %v10482_v25 = vpop.f32.mrb[39].mxu1 }
 0x4a5   :  { %v8204_v0 = vpop.f32.mrb[40].mxu1 }
 0x4a6   :  { %v1803_v56 = vpop.f32.mrb[41].mxu1 }
 0x4a7   :  { %v8886_v59 = vpack.c.bf16 %v8204_v0, %v1803_v56 }
 0x4a9   :  { %v8207_v18 = vpop.f32.mrb[42].mxu1  ;;  %8888 = vmatprep.subr.msk.bf16.mxu1 %vm10031_vm2, %v8886_v59 }
 0x4aa   :  { %v1813_v42 = vpop.f32.mrb[43].mxu1  ;;  %8891 = vmatpush3.bf16.xpose.msk.msra.mxu1 %vm10031_vm2, %v8886_v59 }
 0x4ab   :  { %v8892_v19 = vpack.c.bf16 %v8207_v18, %v1813_v42 }
 0x4ad   :  { %v8210_v46 = vpop.f32.mrb[44].mxu1  ;;  %8894 = vmatprep.subr.msk.bf16.mxu1 %vm10031_vm2, %v8892_v19 }
 0x4ae   :  { %v1823_v30 = vpop.f32.mrb[45].mxu1 }
 0x4af   :  { %v8898_v53 = vpack.c.bf16 %v8210_v46, %v1823_v30 }
 0x4b1   :  { %v8213_v61 = vpop.f32.mrb[46].mxu1 }
 0x4b2   :  { %v1833_v44 = vpop.f32.mrb[47].mxu1  ;;  %8897 = vmatpush3.bf16.xpose.msk.msra.mxu1 %vm10031_vm2, %v8892_v19 }
 0x4b3   :  { %v8904_v54 = vpack.c.bf16 %v8213_v61, %v1833_v44  ;;  %8900 = vmatprep.subr.msk.bf16.mxu1 %vm10031_vm2, %v8898_v53 }
 0x4b5   :  { %v8216_v39 = vpop.f32.mrb[48].mxu1 }
 0x4b6   :  { %v1843_v3 = vpop.f32.mrb[49].mxu1 }
 0x4b7   :  { %v10494_v52 = vpack.c.bf16 %v8216_v39, %v1843_v3 }
 0x4b9   :  { %v8219_v27 = vpop.f32.mrb[50].mxu1 }
 0x4ba   :  { %v1853_v26 = vpop.f32.mrb[51].mxu1  ;;  %8903 = vmatpush3.bf16.xpose.msk.msra.mxu1 %vm10031_vm2, %v8898_v53 }
 0x4bb   :  { %v10498_v5 = vpack.c.bf16 %v8219_v27, %v1853_v26  ;;  %8906 = vmatprep.subr.msk.bf16.mxu1 %vm10031_vm2, %v8904_v54 }
 0x4bd   :  { %v8222_v63 = vpop.f32.mrb[52].mxu1 }
 0x4be   :  { %v1863_v17 = vpop.f32.mrb[53].mxu1 }
 0x4bf   :  { %v10502_v0 = vpack.c.bf16 %v8222_v63, %v1863_v17 }
 0x4c1   :  { %v8225_v56 = vpop.f32.mrb[54].mxu1 }
 0x4c2   :  { %v1873_v59 = vpop.f32.mrb[55].mxu1  ;;  %8909 = vmatpush3.bf16.xpose.msk.msra.mxu1 %vm10031_vm2, %v8904_v54 }
 0x4c3   :  { %v10506_v18 = vpack.c.bf16 %v8225_v56, %v1873_v59  ;;  %8911 = vmatprep.subr.bf16.mxu1 %v10303_v13 }
 0x4c9   :  { %8275 = vmatmul.mubr.msk.f32.vlgmr.msra.gmra.mrb[56].mxu1 %vm840_vm1, %v10271_v40  ;;  %v12316_v40 = vld [vmem:[#allocation2_spill] sm:$0xff] }
 0x4ca   :  { %8277 = vmatprep.mubr.msk.f32.mxu1 %vm840_vm1, %v10277_v43  ;;  %8913 = vmatpush3.bf16.msra.mxu1 %v10303_v13 }
 0x4cb   :  { %8915 = vmatprep.subr.bf16.mxu1 %v10305_v16 }
 0x4cd   :  { %8278 = vmatmul.mubr.msk.f32.gmra.mrb[58].mxu1 %vm840_vm1, %v10275_v41 }
 0x4ce   :  { %8280 = vmatprep.mubr.msk.f32.mxu1 %vm840_vm1, %v10281_v50  ;;  %8917 = vmatpush3.bf16.msra.mxu1 %v10305_v16 }
 0x4cf   :  { %8919 = vmatprep.subr.bf16.mxu1 %v10307_v31 }
 0x4d1   :  { %8281 = vmatmul.mubr.msk.f32.gmra.mrb[60].mxu1 %vm840_vm1, %v10279_v48 }
 0x4d2   :  { %8283 = vmatprep.mubr.msk.f32.mxu1 %vm840_vm1, %v10285_v1  ;;  %8921 = vmatpush3.bf16.msra.mxu1 %v10307_v31 }
 0x4d3   :  { %8923 = vmatprep.subr.bf16.mxu1 %v10309_v11 }
 0x4d5   :  { %8284 = vmatmul.mubr.msk.f32.gmra.mrb[62].mxu1 %vm840_vm1, %v12316_v40 }
 0x4d6   :  { %8925 = vmatpush3.bf16.msra.mxu1 %v10309_v11 }
 0x4d7   :  { %8936 = vmatprep.subr.msk.bf16.mxu1 %vm10031_vm2, %v10494_v52 }
 0x59c   :  { %v8276_v41 = vpop.f32.mrb[56].mxu1 }
 0x59d   :  { %v2149_v43 = vpop.f32.mrb[57].mxu1  ;;  %v2191_v48 = vsel %vm994_vm3, %v8276_v41, -inf }
 0x59e   :  { %2192 = vmax.xlane.f32.xlu1 %v2191_v48  ;;  %v2188_v50 = vsel %vm994_vm3, %v2149_v43, -inf }
 0x59f   :  { %2189 = vmax.xlane.f32.xlu0 %v2188_v50 }
 0x5a0   :  { %v8279_v1 = vpop.f32.mrb[58].mxu1 }
 0x5a1   :  { %v2159_v13 = vpop.f32.mrb[59].mxu1  ;;  %v2197_v16 = vsel %vm994_vm3, %v8279_v1, -inf }
 0x5a2   :  { %2198 = vmax.xlane.f32.xlu1 %v2197_v16  ;;  %v2194_v31 = vsel %vm994_vm3, %v2159_v13, -inf }
 0x5a3   :  { %2195 = vmax.xlane.f32.xlu0 %v2194_v31 }
 0x5a4   :  { %v8282_v11 = vpop.f32.mrb[60].mxu1 }
 0x5a5   :  { %v2169_v42 = vpop.f32.mrb[61].mxu1  ;;  %v2203_v19 = vsel %vm994_vm3, %v8282_v11, -inf }
 0x5a6   :  { %2204 = vmax.xlane.f32.xlu1 %v2203_v19  ;;  %v2200_v46 = vsel %vm994_vm3, %v2169_v42, -inf }
 0x5a7   :  { %2201 = vmax.xlane.f32.xlu0 %v2200_v46 }
 0x5a8   :  { %v8285_v30 = vpop.f32.mrb[62].mxu1 }
 0x5a9   :  { %v2179_v53 = vpop.f32.mrb[63].mxu1  ;;  %v2209_v61 = vsel %vm994_vm3, %v8285_v30, -inf }
 0x5aa   :  { %2210 = vmax.xlane.f32.xlu1 %v2209_v61  ;;  %v2206_v44 = vsel %vm994_vm3, %v2179_v53, -inf }
 0x5ab   :  { %2207 = vmax.xlane.f32.xlu0 %v2206_v44 }
 0x62b   :  { %v2193_v54 = vpop.xlane.xlu1 %2192 }
 0x62c   :  { %v2213_v39 = vsub.f32 %v8276_v41, %v2193_v54  ;;  %v2190_v3 = vpop.xlane.xlu0 %2189 }
 0x62d   :  { %v2212_v27 = vsub.f32 %v2149_v43, %v2190_v3 }
 0x62e   :  { %v2222_v26 = vmul.f32 1.442695, %v2213_v39 }
 0x62f   :  { %v2220_v63 = vmul.f32 1.442695, %v2212_v27  ;;  %v2199_v17 = vpop.xlane.xlu1 %2198 }
 0x630   :  { %9167 = vpow2.f32 %v2222_v26  ;;  %v2215_v56 = vsub.f32 %v8279_v1, %v2199_v17  ;;  %v2196_v59 = vpop.xlane.xlu0 %2195 }
 0x631   :  { %9169 = vpow2.f32 %v2220_v63  ;;  %v2214_v40 = vsub.f32 %v2159_v13, %v2196_v59 }
 0x632   :  { %v2226_v48 = vmul.f32 1.442695, %v2215_v56 }
 0x633   :  { %v2224_v50 = vmul.f32 1.442695, %v2214_v40  ;;  %v2205_v16 = vpop.xlane.xlu1 %2204 }
 0x634   :  { %9171 = vpow2.f32 %v2226_v48  ;;  %v2217_v31 = vsub.f32 %v8282_v11, %v2205_v16  ;;  %v2202_v19 = vpop.xlane.xlu0 %2201 }
 0x635   :  { %9173 = vpow2.f32 %v2224_v50  ;;  %v2216_v46 = vsub.f32 %v2169_v42, %v2202_v19  ;;  %v1043_v19 = vsel %vm994_vm3, %v10327_v38, 0.0  ;;  %v1058_v38 = vsel %vm994_vm3, %v10353_v49, 0.0  ;;  %v12319_v49 = vld [vmem:[#allocation6_spill] sm:$0xff] }
 0x636   :  { %v2230_v61 = vmul.f32 1.442695, %v2217_v31  ;;  %v12317_v31 = vld [vmem:[#allocation4_spill] sm:$0xff] }
 0x637   :  { %v2228_v41 = vmul.f32 1.442695, %v2216_v46  ;;  %v2211_v44 = vpop.xlane.xlu1 %2210  ;;  %v1052_v46 = vsel %vm994_vm3, %v10341_v60, 0.0  ;;  %v1064_v60 = vsel %vm994_vm3, %v10371_v6, 0.0  ;;  %v12323_v6 = vld [vmem:[#allocation10_spill] sm:$0xff] }
 0x638   :  { %9175 = vpow2.f32 %v2230_v61  ;;  %v2219_v43 = vsub.f32 %v8285_v30, %v2211_v44  ;;  %v2208_v54 = vpop.xlane.xlu0 %2207  ;;  %v1055_v61 = vsel %vm994_vm3, %v10350_v15, 0.0  ;;  %v12320_v15 = vld [vmem:[#allocation5_spill] sm:$0xff] }
 0x639   :  { %9177 = vpow2.f32 %v2228_v41  ;;  %v2218_v39 = vsub.f32 %v2179_v53, %v2208_v54  ;;  %v12321_v41 = vld [vmem:[#allocation8_spill] sm:$0xff]  ;;  %v7212_v44 = vld [vmem:[%s12325_s23 + $0x18] sm:$0xff]  ;;  %v838_v54 = vld [vmem:[%s12325_s23] sm:$0xff] }
 0x63a   :  { %v9168_v1 = vpop.eup %9167  ;;  %v2234_v3 = vmul.f32 1.442695, %v2219_v43 }
 0x63b   :  { %v9170_v27 = vpop.eup %9169  ;;  %v2232_v13 = vmul.f32 1.442695, %v2218_v39  ;;  %v2239_v26 = vsel %vm994_vm3, %v9168_v1, 0.0  ;;  %v839_v39 = vld [vmem:[%s12325_s23 + $0x8] sm:$0xff] }
 0x63c   :  { %9179 = vpow2.f32 %v2234_v3  ;;  %8302 = vmatprep.mubr.msk.f32.mxu1 %vm994_vm3, %v9170_v27  ;;  %2240 = vadd.xlane.f32.xlu1 %v2239_v26  ;;  %v2236_v11 = vsel %vm994_vm3, %v9170_v27, 0.0 }
 0x63d   :  { %9181 = vpow2.f32 %v2232_v13  ;;  %8303 = vmatmul.mubr.msk.f32.vlgmr.msra.gmra.mrb[64].mxu1 %vm994_vm3, %v9168_v1  ;;  %2237 = vadd.xlane.f32.xlu0 %v2236_v11  ;;  %v10622_v1 = vpack.c.bf16 %v839_v39, %v838_v54 }
 0x63e   :  { %v9172_v42 = vpop.eup %9171  ;;  %8939 = vmatpush3.bf16.xpose.msk.msra.mxu1 %vm10031_vm2, %v10494_v52 }
 0x63f   :  { %v9174_v30 = vpop.eup %9173  ;;  %8942 = vmatprep.subr.msk.bf16.mxu1 %vm10031_vm2, %v10498_v5  ;;  %v2245_v53 = vsel %vm994_vm3, %v9172_v42, 0.0 }
 0x640   :  { %8305 = vmatprep.mubr.msk.f32.mxu1 %vm994_vm3, %v9174_v30  ;;  %2246 = vadd.xlane.f32.xlu1 %v2245_v53  ;;  %v2242_v63 = vsel %vm994_vm3, %v9174_v30, 0.0 }
 0x641   :  { %8306 = vmatmul.mubr.msk.f32.gmra.mrb[66].mxu1 %vm994_vm3, %v9172_v42  ;;  %2243 = vadd.xlane.f32.xlu0 %v2242_v63 }
 0x642   :  { %v9176_v17 = vpop.eup %9175 }
 0x643   :  { %v9178_v56 = vpop.eup %9177  ;;  %v2251_v59 = vsel %vm994_vm3, %v9176_v17, 0.0 }
 0x644   :  { %8308 = vmatprep.mubr.msk.f32.mxu1 %vm994_vm3, %v9178_v56  ;;  %2252 = vadd.xlane.f32.xlu1 %v2251_v59  ;;  %v2248_v52 = vsel %vm994_vm3, %v9178_v56, 0.0 }
 0x645   :  { %8309 = vmatmul.mubr.msk.f32.gmra.mrb[68].mxu1 %vm994_vm3, %v9176_v17  ;;  %2249 = vadd.xlane.f32.xlu0 %v2248_v52 }
 0x646   :  { %v9180_v40 = vpop.eup %9179  ;;  %8945 = vmatpush3.bf16.xpose.msk.msra.mxu1 %vm10031_vm2, %v10498_v5  ;;  %v1046_v5 = vsel %vm994_vm3, %v10329_v2, 0.0  ;;  %v1049_v2 = vsel %vm994_vm3, %v10338_v8, 0.0  ;;  %v1061_v8 = vsel %vm994_vm3, %v10368_v23, 0.0  ;;  %v12324_v23 = vld [vmem:[#allocation9_spill] sm:$0xff] }
 0x647   :  { %v9182_v48 = vpop.eup %9181  ;;  %8948 = vmatprep.subr.msk.bf16.mxu1 %vm10031_vm2, %v10502_v0  ;;  %v2257_v50 = vsel %vm994_vm3, %v9180_v40, 0.0 }
 0x648   :  { %2258 = vadd.xlane.f32.xlu1 %v2257_v50  ;;  %8311 = vmatprep.mubr.msk.f32.mxu1 %vm994_vm3, %v9182_v48  ;;  %v2254_v16 = vsel %vm994_vm3, %v9182_v48, 0.0 }
 0x649   :  { %8312 = vmatmul.mubr.msk.f32.gmra.mrb[70].mxu1 %vm994_vm3, %v9180_v40  ;;  %2255 = vadd.xlane.f32.xlu0 %v2254_v16 }
 0x64a   :  { %8362 = vmatprep.mubr.msk.f32.mxu1 %vm840_vm1, %v12317_v31 }
 0x64c   :  { %1047 = vadd.xlane.f32.xlu1 %v1046_v5 }
 0x64d   :  { %1044 = vadd.xlane.f32.xlu0 %v1043_v19 }
 0x64e   :  { %8951 = vmatpush3.bf16.xpose.msk.msra.mxu1 %vm10031_vm2, %v10502_v0  ;;  %v12318_v0 = vld [vmem:[#allocation3_spill] sm:$0xff] }
 0x64f   :  { %8954 = vmatprep.subr.msk.bf16.mxu1 %vm10031_vm2, %v10506_v18 }
 0x650   :  { %1053 = vadd.xlane.f32.xlu1 %v1052_v46 }
 0x651   :  { %1050 = vadd.xlane.f32.xlu0 %v1049_v2 }
 0x654   :  { %1059 = vadd.xlane.f32.xlu1 %v1058_v38 }
 0x655   :  { %1056 = vadd.xlane.f32.xlu0 %v1055_v61 }
 0x656   :  { %8957 = vmatpush3.bf16.xpose.msk.msra.mxu1 %vm10031_vm2, %v10506_v18  ;;  %v7211_v18 = vld [vmem:[%s12325_s23 + $0x10] sm:$0xff] }
 0x657   :  { %v8926_v43 = vpack.c.bf16 %v7212_v44, %v7211_v18 }
 0x658   :  { %1065 = vadd.xlane.f32.xlu1 %v1064_v60 }
 0x659   :  { %1062 = vadd.xlane.f32.xlu0 %v1061_v8  ;;  %8927 = vmatprep.subr.bf16.mxu0 %v8926_v43  ;;  %v12326_v8 = vld [vmem:[#allocation11_spill] sm:$0xff] }
 0x65a   :  { %8975 = vmatprep.subr.bf16.mxu1 %v8926_v43  ;;  %8929 = vmatpush3.bf16.msra.mxu0 %v8926_v43 }
 0x65b   :  { %8931 = vmatprep.subr.bf16.mxu0 %v10622_v1 }
 0x65d   :  { %8363 = vmatmul.mubr.msk.f32.vlgmr.msra.gmra.mrb[72].mxu1 %vm840_vm1, %v12318_v0 }
 0x65e   :  { %8365 = vmatprep.mubr.msk.f32.mxu1 %vm840_vm1, %v12319_v49  ;;  %8977 = vmatpush3.bf16.msra.mxu1 %v8926_v43 }
 0x65f   :  { %8979 = vmatprep.subr.bf16.mxu1 %v10622_v1 }
 0x661   :  { %8366 = vmatmul.mubr.msk.f32.gmra.mrb[74].mxu1 %vm840_vm1, %v12320_v15 }
 0x662   :  { %8368 = vmatprep.mubr.msk.f32.mxu1 %vm840_vm1, %v12321_v41 }
 0x665   :  { %8369 = vmatmul.mubr.msk.f32.gmra.mrb[76].mxu1 %vm840_vm1, %v12322_v22 }
 0x666   :  { %8371 = vmatprep.mubr.msk.f32.mxu1 %vm840_vm1, %v12323_v6 }
 0x669   :  { %8372 = vmatmul.mubr.msk.f32.gmra.mrb[78].mxu1 %vm840_vm1, %v12324_v23 }
 0x6c9   :  { %v2241_v27 = vpop.xlane.xlu1 %2240 }
 0x6ca   :  { %v2238_v3 = vpop.xlane.xlu0 %2237 }
 0x6cb   :  { %9183 = vrcp.f32 %v2238_v3 }
 0x6cc   :  { %9185 = vrcp.f32 %v2241_v27 }
 0x6cd   :  { %v2247_v26 = vpop.xlane.xlu1 %2246 }
 0x6ce   :  { %v2244_v13 = vpop.xlane.xlu0 %2243 }
 0x6cf   :  { %9187 = vrcp.f32 %v2244_v13 }
 0x6d0   :  { %9189 = vrcp.f32 %v2247_v26 }
 0x6d1   :  { %v2253_v42 = vpop.xlane.xlu1 %2252 }
 0x6d2   :  { %v2250_v11 = vpop.xlane.xlu0 %2249 }
 0x6d3   :  { %9191 = vrcp.f32 %v2250_v11 }
 0x6d4   :  { %9193 = vrcp.f32 %v2253_v42 }
 0x6d5   :  { %v2259_v53 = vpop.xlane.xlu1 %2258  ;;  %v9184_v52 = vpop.eup %9183 }
 0x6d6   :  { %v2256_v30 = vpop.xlane.xlu0 %2255  ;;  %v9186_v48 = vpop.eup %9185 }
 0x6d7   :  { %9195 = vrcp.f32 %v2256_v30 }
 0x6d9   :  { %v1048_v17 = vpop.xlane.xlu1 %1047  ;;  %v9188_v19 = vpop.eup %9187 }
 0x6da   :  { %v1045_v63 = vpop.xlane.xlu0 %1044  ;;  %v9190_v2 = vpop.eup %9189 }
 0x6db   :  { %9197 = vrcp.f32 %v1045_v63 }
 0x6dc   :  { %9199 = vrcp.f32 %v2259_v53 }
 0x6dd   :  { %v1054_v16 = vpop.xlane.xlu1 %1053  ;;  %9201 = vrcp.f32 %v1048_v17  ;;  %v9192_v49 = vpop.eup %9191 }
 0x6de   :  { %v1051_v56 = vpop.xlane.xlu0 %1050  ;;  %v9194_v22 = vpop.eup %9193 }
 0x6df   :  { %9203 = vrcp.f32 %v1051_v56 }
 0x6e0   :  { %9205 = vrcp.f32 %v1054_v16 }
 0x6e1   :  { %v1060_v15 = vpop.xlane.xlu1 %1059  ;;  %v9196_v18 = vpop.eup %9195 }
 0x6e2   :  { %v1057_v38 = vpop.xlane.xlu0 %1056 }
 0x6e3   :  { %9207 = vrcp.f32 %v1057_v38 }
 0x6e4   :  { %9209 = vrcp.f32 %v1060_v15 }
 0x6e5   :  { %v9198_v54 = vpop.eup %9197  ;;  %v1066_v13 = vpop.xlane.xlu1 %1065 }
 0x6e6   :  { %v1063_v44 = vpop.xlane.xlu0 %1062  ;;  %v9200_v3 = vpop.eup %9199  ;;  %v1204_v42 = vmul.f32 %v9198_v54, %v10454_v9 }
 0x6e7   :  { %9211 = vrcp.f32 %v1063_v44  ;;  %v9202_v11 = vpop.eup %9201 }
 0x6e8   :  { %9213 = vrcp.f32 %v1066_v13  ;;  %v1205_v53 = vmul.f32 %v9202_v11, %v10452_v57  ;;  %v12327_v57 = vld [vmem:[#allocation12_spill] sm:$0xff] }
 0x6e9   :  { %v9204_v30 = vpop.eup %9203 }
 0x6ea   :  { %v9206_v63 = vpop.eup %9205  ;;  %v1206_v17 = vmul.f32 %v9204_v30, %v10458_v32 }
 0x6eb   :  { %v1207_v9 = vmul.f32 %v9206_v63, %v10456_v45  ;;  %v12328_v45 = vld [vmem:[#allocation13_spill] sm:$0xff] }
 0x6ed   :  { %v9208_v56 = vpop.eup %9207 }
 0x710   :  { %v8304_v59 = vpop.f32.mrb[64].mxu1 }
 0x711   :  { %v2350_v40 = vpop.f32.mrb[65].mxu1  ;;  %v2398_v31 = vmul.f32 %v9186_v48, %v8304_v59  ;;  %v9210_v59 = vpop.eup %9209 }
 0x712   :  { %v2397_v50 = vmul.f32 %v9184_v52, %v2350_v40  ;;  %v1208_v52 = vmul.f32 %v9208_v56, %v10462_v24  ;;  %v9212_v40 = vpop.eup %9211  ;;  %v1209_v32 = vmul.f32 %v9210_v59, %v10460_v55 }
 0x713   :  { %v9214_v48 = vpop.eup %9213 }
 0x714   :  { %v8307_v5 = vpop.f32.mrb[66].mxu1  ;;  %8318 = vmatprep.mubr.msk.f32.mxu0 %vm840_vm1, %v2397_v50  ;;  %v1210_v50 = vmul.f32 %v9212_v40, %v10466_v36  ;;  %v1211_v24 = vmul.f32 %v9214_v48, %v10464_v51 }
 0x715   :  { %v2360_v46 = vpop.f32.mrb[67].mxu1  ;;  %8319 = vmatmul.mubr.msk.f32.vlgmr.msra.gmra.mrb[72].mxu0 %vm840_vm1, %v2398_v31  ;;  %v2400_v60 = vmul.f32 %v9190_v2, %v8307_v5 }
 0x716   :  { %v2399_v61 = vmul.f32 %v9188_v19, %v2360_v46  ;;  %8933 = vmatpush3.bf16.msra.mxu0 %v10622_v1 }
 0x717   :  { %8959 = vmatprep.subr.bf16.mxu0 %v12326_v8 }
 0x718   :  { %v8310_v0 = vpop.f32.mrb[68].mxu1  ;;  %8321 = vmatprep.mubr.msk.f32.mxu0 %vm840_vm1, %v2399_v61 }
 0x719   :  { %v2370_v41 = vpop.f32.mrb[69].mxu1  ;;  %8322 = vmatmul.mubr.msk.f32.gmra.mrb[74].mxu0 %vm840_vm1, %v2400_v60  ;;  %v2402_v23 = vmul.f32 %v9194_v22, %v8310_v0 }
 0x71a   :  { %v2401_v6 = vmul.f32 %v9192_v49, %v2370_v41 }
 0x71c   :  { %v8313_v43 = vpop.f32.mrb[70].mxu1  ;;  %8324 = vmatprep.mubr.msk.f32.mxu0 %vm840_vm1, %v2401_v6 }
 0x71d   :  { %v2380_v39 = vpop.f32.mrb[71].mxu1  ;;  %8325 = vmatmul.mubr.msk.f32.gmra.mrb[76].mxu0 %vm840_vm1, %v2402_v23  ;;  %v2404_v26 = vmul.f32 %v9200_v3, %v8313_v43 }
 0x71e   :  { %v2403_v27 = vmul.f32 %v9196_v18, %v2380_v39 }
 0x720   :  { %8327 = vmatprep.mubr.msk.f32.mxu0 %vm840_vm1, %v2403_v27 }
 0x721   :  { %8328 = vmatmul.mubr.msk.f32.gmra.mrb[78].mxu0 %vm840_vm1, %v2404_v26 }
 0x722   :  { %8334 = vmatprep.mubr.msk.f32.mxu0 %vm840_vm1, %v1204_v42 }
 0x725   :  { %8335 = vmatmul.mubr.msk.f32.vlgmr.msra.gmra.mrb[72].mxu0 %vm840_vm1, %v1205_v53 }
 0x726   :  { %8961 = vmatpush3.bf16.msra.mxu0 %v12326_v8  ;;  %8337 = vmatprep.mubr.msk.f32.mxu0 %vm840_vm1, %v1206_v17 }
 0x727   :  { %8963 = vmatprep.subr.bf16.mxu0 %v10313_v35 }
 0x729   :  { %8338 = vmatmul.mubr.msk.f32.gmra.mrb[74].mxu0 %vm840_vm1, %v1207_v9 }
 0x72a   :  { %8965 = vmatpush3.bf16.msra.mxu0 %v10313_v35  ;;  %8340 = vmatprep.mubr.msk.f32.mxu0 %vm840_vm1, %v1208_v52 }
 0x72b   :  { %8967 = vmatprep.subr.bf16.mxu0 %v12327_v57 }
 0x72d   :  { %8341 = vmatmul.mubr.msk.f32.gmra.mrb[76].mxu0 %vm840_vm1, %v1209_v32 }
 0x72e   :  { %8969 = vmatpush3.bf16.msra.mxu0 %v12327_v57  ;;  %8343 = vmatprep.mubr.msk.f32.mxu0 %vm840_vm1, %v1210_v50 }
 0x72f   :  { %8971 = vmatprep.subr.bf16.mxu0 %v12328_v45 }
 0x730   :  { %v8364_v35 = vpop.f32.mrb[72].mxu1 }
 0x731   :  { %v2777_v16 = vpop.f32.mrb[73].mxu1  ;;  %v2819_v31 = vsel %vm994_vm3, %v8364_v35, -inf  ;;  %8344 = vmatmul.mubr.msk.f32.gmra.mrb[78].mxu0 %vm840_vm1, %v1211_v24 }
 0x732   :  { %2820 = vmax.xlane.f32.xlu1 %v2819_v31  ;;  %8973 = vmatpush3.bf16.msra.mxu0 %v12328_v45  ;;  %v2816_v55 = vsel %vm994_vm3, %v2777_v16, -inf }
 0x733   :  { %2817 = vmax.xlane.f32.xlu0 %v2816_v55 }
 0x734   :  { %v8367_v36 = vpop.f32.mrb[74].mxu1 }
 0x735   :  { %v2787_v5 = vpop.f32.mrb[75].mxu1  ;;  %v2825_v19 = vsel %vm994_vm3, %v8367_v36, -inf }
 0x736   :  { %2826 = vmax.xlane.f32.xlu1 %v2825_v19  ;;  %v2822_v46 = vsel %vm994_vm3, %v2787_v5, -inf }
 0x737   :  { %2823 = vmax.xlane.f32.xlu0 %v2822_v46 }
 0x738   :  { %v8370_v51 = vpop.f32.mrb[76].mxu1 }
 0x739   :  { %v2797_v2 = vpop.f32.mrb[77].mxu1  ;;  %v2831_v38 = vsel %vm994_vm3, %v8370_v51, -inf }
 0x73a   :  { %2832 = vmax.xlane.f32.xlu1 %v2831_v38  ;;  %v2828_v61 = vsel %vm994_vm3, %v2797_v2, -inf  ;;  %v1413_v38 = vsel %vm994_vm3, %v10386_v33, 0.0  ;;  %v1434_v33 = vsel %vm994_vm3, %v10412_v10, 0.0  ;;  %v9487_v10 = vld [vmem:[%s12296_s29 + $0x8] sm:$0xff] }
 0x73b   :  { %2829 = vmax.xlane.f32.xlu0 %v2828_v61  ;;  %v1422_v61 = vsel %vm994_vm3, %v10396_v29, 0.0  ;;  %v1431_v29 = vsel %vm994_vm3, %v10410_v20, 0.0  ;;  %v9488_v20 = vld [vmem:[%s12296_s29] sm:$0xff] }
 0x73c   :  { %v8373_v60 = vpop.f32.mrb[78].mxu1 }
 0x73d   :  { %v2807_v8 = vpop.f32.mrb[79].mxu1  ;;  %v2837_v0 = vsel %vm994_vm3, %v8373_v60, -inf }
 0x73e   :  { %2838 = vmax.xlane.f32.xlu1 %v2837_v0  ;;  %v2834_v49 = vsel %vm994_vm3, %v2807_v8, -inf }
 0x73f   :  { %2835 = vmax.xlane.f32.xlu0 %v2834_v49 }
 0x7bf   :  { %v2821_v15 = vpop.xlane.xlu1 %2820 }
 0x7c0   :  { %v2841_v41 = vsub.f32 %v8364_v35, %v2821_v15  ;;  %v2818_v22 = vpop.xlane.xlu0 %2817 }
 0x7c1   :  { %v2840_v6 = vsub.f32 %v2777_v16, %v2818_v22 }
 0x7c2   :  { %v2850_v23 = vmul.f32 1.442695, %v2841_v41 }
 0x7c3   :  { %v2848_v18 = vmul.f32 1.442695, %v2840_v6  ;;  %v2827_v44 = vpop.xlane.xlu1 %2826 }
 0x7c4   :  { %9215 = vpow2.f32 %v2850_v23  ;;  %v2843_v43 = vsub.f32 %v8367_v36, %v2827_v44  ;;  %v2824_v54 = vpop.xlane.xlu0 %2823 }
 0x7c5   :  { %9217 = vpow2.f32 %v2848_v18  ;;  %v2842_v39 = vsub.f32 %v2787_v5, %v2824_v54  ;;  %v9489_v54 = vld [vmem:[%s12296_s29 + $0x18] sm:$0xff] }
 0x7c6   :  { %v2854_v3 = vmul.f32 1.442695, %v2843_v43 }
 0x7c7   :  { %v2852_v27 = vmul.f32 1.442695, %v2842_v39  ;;  %v2833_v13 = vpop.xlane.xlu1 %2832 }
 0x7c8   :  { %9219 = vpow2.f32 %v2854_v3  ;;  %v2845_v26 = vsub.f32 %v8370_v51, %v2833_v13  ;;  %v2830_v11 = vpop.xlane.xlu0 %2829  ;;  %v9490_v3 = vld [vmem:[%s12296_s29 + $0x10] sm:$0xff] }
 0x7c9   :  { %9221 = vpow2.f32 %v2852_v27  ;;  %v2844_v42 = vsub.f32 %v2797_v2, %v2830_v11  ;;  %v1416_v2 = vsel %vm994_vm3, %v10388_v28, 0.0  ;;  %v1425_v28 = vsel %vm994_vm3, %v10402_v21, 0.0 }
 0x7ca   :  { %v2858_v30 = vmul.f32 1.442695, %v2845_v26 }
 0x7cb   :  { %v2856_v53 = vmul.f32 1.442695, %v2844_v42  ;;  %v2839_v63 = vpop.xlane.xlu1 %2838 }
 0x7cc   :  { %9223 = vpow2.f32 %v2858_v30  ;;  %v2847_v17 = vsub.f32 %v8373_v60, %v2839_v63  ;;  %v2836_v56 = vpop.xlane.xlu0 %2835  ;;  %v1419_v60 = vsel %vm994_vm3, %v10394_v34, 0.0  ;;  %v10702_v34 = vld [vmem:[%s12249_s8] ss:$0 sm:$0xff]  ;;  %v9491_v63 = vld [vmem:[%s12296_s29 + $0x28] sm:$0xff] }
 0x7cd   :  { %9225 = vpow2.f32 %v2856_v53  ;;  %v2846_v9 = vsub.f32 %v2807_v8, %v2836_v56  ;;  %v1428_v8 = vsel %vm994_vm3, %v10404_v12, 0.0  ;;  %v9492_v56 = vld [vmem:[%s12296_s29 + $0x20] sm:$0xff] }
 0x7ce   :  { %v9216_v59 = vpop.eup %9215  ;;  %v2862_v52 = vmul.f32 1.442695, %v2847_v17 }
 0x7cf   :  { %v9218_v40 = vpop.eup %9217  ;;  %v2860_v57 = vmul.f32 1.442695, %v2846_v9  ;;  %v2867_v32 = vsel %vm994_vm3, %v9216_v59, 0.0 }
 0x7d0   :  { %9227 = vpow2.f32 %v2862_v52  ;;  %2868 = vadd.xlane.f32.xlu1 %v2867_v32  ;;  %8390 = vmatprep.mubr.msk.f32.mxu0 %vm994_vm3, %v9218_v40  ;;  %v2864_v48 = vsel %vm994_vm3, %v9218_v40, 0.0 }
 0x7d1   :  { %9229 = vpow2.f32 %v2860_v57  ;;  %8391 = vmatmul.mubr.msk.f32.vlgmr.msra.gmra.mrb[80].mxu0 %vm994_vm3, %v9216_v59  ;;  %2865 = vadd.xlane.f32.xlu0 %v2864_v48 }
 0x7d2   :  { %v9220_v50 = vpop.eup %9219 }
 0x7d3   :  { %v9222_v45 = vpop.eup %9221  ;;  %v2873_v24 = vsel %vm994_vm3, %v9220_v50, 0.0 }
 0x7d4   :  { %2874 = vadd.xlane.f32.xlu1 %v2873_v24  ;;  %8393 = vmatprep.mubr.msk.f32.mxu0 %vm994_vm3, %v9222_v45  ;;  %v2870_v35 = vsel %vm994_vm3, %v9222_v45, 0.0  ;;  %v9494_v24 = vld [vmem:[%s12296_s29 + $0x30] sm:$0xff] }
 0x7d5   :  { %8394 = vmatmul.mubr.msk.f32.gmra.mrb[82].mxu0 %vm994_vm3, %v9220_v50  ;;  %2871 = vadd.xlane.f32.xlu0 %v2870_v35  ;;  %v9493_v50 = vld [vmem:[%s12296_s29 + $0x38] sm:$0xff] }
 0x7d6   :  { %v9224_v16 = vpop.eup %9223 }
 0x7d7   :  { %v9226_v31 = vpop.eup %9225  ;;  %v2879_v55 = vsel %vm994_vm3, %v9224_v16, 0.0 }
 0x7d8   :  { %2880 = vadd.xlane.f32.xlu1 %v2879_v55  ;;  %8396 = vmatprep.mubr.msk.f32.mxu0 %vm994_vm3, %v9226_v31  ;;  %v2876_v36 = vsel %vm994_vm3, %v9226_v31, 0.0 }
 0x7d9   :  { %8397 = vmatmul.mubr.msk.f32.gmra.mrb[84].mxu0 %vm994_vm3, %v9224_v16  ;;  %2877 = vadd.xlane.f32.xlu0 %v2876_v36 }
 0x7da   :  { %v9228_v5 = vpop.eup %9227 }
 0x7db   :  { %v9230_v19 = vpop.eup %9229  ;;  %v2885_v46 = vsel %vm994_vm3, %v9228_v5, 0.0 }
 0x7dc   :  { %2886 = vadd.xlane.f32.xlu1 %v2885_v46  ;;  %8399 = vmatprep.mubr.msk.f32.mxu0 %vm994_vm3, %v9230_v19  ;;  %v2882_v51 = vsel %vm994_vm3, %v9230_v19, 0.0 }
 0x7dd   :  { %8400 = vmatmul.mubr.msk.f32.gmra.mrb[86].mxu0 %vm994_vm3, %v9228_v5  ;;  %2883 = vadd.xlane.f32.xlu0 %v2882_v51 }
 0x7e0   :  { %1417 = vadd.xlane.f32.xlu1 %v1416_v2 }
 0x7e1   :  { %1414 = vadd.xlane.f32.xlu0 %v1413_v38 }
 0x7e4   :  { %1423 = vadd.xlane.f32.xlu1 %v1422_v61 }
 0x7e5   :  { %1420 = vadd.xlane.f32.xlu0 %v1419_v60 }
 0x7e8   :  { %1429 = vadd.xlane.f32.xlu1 %v1428_v8 }
 0x7e9   :  { %1426 = vadd.xlane.f32.xlu0 %v1425_v28 }
 0x7ec   :  { %1435 = vadd.xlane.f32.xlu1 %v1434_v33 }
 0x7ed   :  { %1432 = vadd.xlane.f32.xlu0 %v1431_v29 }
 0x7f8   :  { %v8336_v0 = vpop.f32.mrb[72].mxu0 }
 0x7f9   :  { %v3299_v12 = vadd.f32 %v8336_v0, %v10702_v34  ;;  %v2624_v49 = vpop.f32.mrb[73].mxu0 }
 0x7fa   :  { %v3298_v21 = vadd.f32 %v10702_v34, %v2624_v49 }
 0x7fb   :  { %v10709_v15 = vadd.f32 %v9487_v10, %v3299_v12 }
 0x7fc   :  { %v10714_v41 = vadd.f32 %v9488_v20, %v3298_v21  ;;  %v8339_v22 = vpop.f32.mrb[74].mxu0 }
 0x7fd   :  { %12329 = vst [vmem:[#allocation2_spill] sm:$0xff] %v10709_v15  ;;  %v3301_v6 = vadd.f32 %v8339_v22, %v10702_v34  ;;  %v2634_v23 = vpop.f32.mrb[75].mxu0  ;;  %v3335_v18 = vsel %vm89_vm0, %v10709_v15, 0.0 }
 0x7fe   :  { %12330 = vst [vmem:[#allocation4_spill] sm:$0xff] %v10714_v41  ;;  %v3300_v44 = vadd.f32 %v10702_v34, %v2634_v23  ;;  %3336 = vadd.xlane.f32.xlu1 %v3335_v18  ;;  %v3332_v43 = vsel %vm89_vm0, %v10714_v41, 0.0 }
 0x7ff   :  { %v10725_v39 = vadd.f32 %v9489_v54, %v3301_v6  ;;  %3333 = vadd.xlane.f32.xlu0 %v3332_v43 }
 0x800   :  { %v10730_v27 = vadd.f32 %v9490_v3, %v3300_v44  ;;  %v8342_v13 = vpop.f32.mrb[76].mxu0 }
 0x801   :  { %12331 = vst [vmem:[#allocation3_spill] sm:$0xff] %v10725_v39  ;;  %v3303_v26 = vadd.f32 %v8342_v13, %v10702_v34  ;;  %v2644_v11 = vpop.f32.mrb[77].mxu0  ;;  %v3341_v42 = vsel %vm89_vm0, %v10725_v39, 0.0 }
 0x802   :  { %12332 = vst [vmem:[#allocation6_spill] sm:$0xff] %v10730_v27  ;;  %v3302_v30 = vadd.f32 %v10702_v34, %v2644_v11  ;;  %3342 = vadd.xlane.f32.xlu1 %v3341_v42  ;;  %v3338_v53 = vsel %vm89_vm0, %v10730_v27, 0.0 }
 0x803   :  { %v10741_v17 = vadd.f32 %v9491_v63, %v3303_v26  ;;  %3339 = vadd.xlane.f32.xlu0 %v3338_v53 }
 0x804   :  { %v10746_v9 = vadd.f32 %v9492_v56, %v3302_v30  ;;  %v8345_v59 = vpop.f32.mrb[78].mxu0 }
 0x805   :  { %12333 = vst [vmem:[#allocation5_spill] sm:$0xff] %v10741_v17  ;;  %v3305_v52 = vadd.f32 %v8345_v59, %v10702_v34  ;;  %v2654_v40 = vpop.f32.mrb[79].mxu0  ;;  %v3347_v57 = vsel %vm89_vm0, %v10741_v17, 0.0 }
 0x806   :  { %12334 = vst [vmem:[#allocation8_spill] sm:$0xff] %v10746_v9  ;;  %v3304_v32 = vadd.f32 %v10702_v34, %v2654_v40  ;;  %3348 = vadd.xlane.f32.xlu1 %v3347_v57  ;;  %v3344_v48 = vsel %vm89_vm0, %v10746_v9, 0.0 }
 0x807   :  { %v10757_v45 = vadd.f32 %v9493_v50, %v3305_v52  ;;  %3345 = vadd.xlane.f32.xlu0 %v3344_v48 }
 0x808   :  { %v10762_v35 = vadd.f32 %v9494_v24, %v3304_v32 }
 0x809   :  { %12335 = vst [vmem:[#allocation7_spill] sm:$0xff] %v10757_v45  ;;  %v3353_v16 = vsel %vm89_vm0, %v10757_v45, 0.0 }
 0x80a   :  { %12336 = vst [vmem:[#allocation10_spill] sm:$0xff] %v10762_v35  ;;  %3354 = vadd.xlane.f32.xlu1 %v3353_v16  ;;  %v3350_v31 = vsel %vm89_vm0, %v10762_v35, 0.0 }
 0x80b   :  { %3351 = vadd.xlane.f32.xlu0 %v3350_v31 }
 0x85d   :  { %v2869_v36 = vpop.xlane.xlu1 %2868 }
 0x85e   :  { %v2866_v55 = vpop.xlane.xlu0 %2865 }
 0x85f   :  { %9231 = vrcp.f32 %v2866_v55 }
 0x860   :  { %9233 = vrcp.f32 %v2869_v36 }
 0x861   :  { %v2875_v19 = vpop.xlane.xlu1 %2874 }
 0x862   :  { %v2872_v5 = vpop.xlane.xlu0 %2871 }
 0x863   :  { %9235 = vrcp.f32 %v2872_v5 }
 0x864   :  { %9237 = vrcp.f32 %v2875_v19 }
 0x865   :  { %v2881_v51 = vpop.xlane.xlu1 %2880 }
 0x866   :  { %v2878_v46 = vpop.xlane.xlu0 %2877 }
 0x867   :  { %9239 = vrcp.f32 %v2878_v46 }
 0x868   :  { %9241 = vrcp.f32 %v2881_v51 }
 0x869   :  { %v2887_v38 = vpop.xlane.xlu1 %2886  ;;  %v9232_v33 = vpop.eup %9231 }
 0x86a   :  { %v2884_v2 = vpop.xlane.xlu0 %2883  ;;  %v9234_v0 = vpop.eup %9233 }
 0x86b   :  { %9243 = vrcp.f32 %v2884_v2 }
 0x86d   :  { %v1418_v60 = vpop.xlane.xlu1 %1417  ;;  %v9236_v20 = vpop.eup %9235 }
 0x86e   :  { %v1415_v61 = vpop.xlane.xlu0 %1414  ;;  %v9238_v6 = vpop.eup %9237 }
 0x86f   :  { %9245 = vrcp.f32 %v1415_v61 }
 0x870   :  { %9247 = vrcp.f32 %v2887_v38 }
 0x871   :  { %v1424_v49 = vpop.xlane.xlu1 %1423  ;;  %9249 = vrcp.f32 %v1418_v60  ;;  %v9240_v54 = vpop.eup %9239 }
 0x872   :  { %v1421_v8 = vpop.xlane.xlu0 %1420  ;;  %v9242_v26 = vpop.eup %9241 }
 0x873   :  { %9251 = vrcp.f32 %v1421_v8 }
 0x874   :  { %9253 = vrcp.f32 %v1424_v49 }
 0x875   :  { %v1430_v3 = vpop.xlane.xlu1 %1429  ;;  %v9244_v30 = vpop.eup %9243 }
 0x876   :  { %v1427_v23 = vpop.xlane.xlu0 %1426 }
 0x877   :  { %9255 = vrcp.f32 %v1427_v23 }
 0x878   :  { %9257 = vrcp.f32 %v1430_v3 }
 0x879   :  { %v1436_v40 = vpop.xlane.xlu1 %1435 }
 0x87a   :  { %v1433_v53 = vpop.xlane.xlu0 %1432 }
 0x87b   :  { %9259 = vrcp.f32 %v1433_v53 }
 0x87c   :  { %9261 = vrcp.f32 %v1436_v40 }
 0x88c   :  { %v3334_v2 = vpop.xlane.xlu0 %3333 }
 0x8a4   :  { %v8392_v28 = vpop.f32.mrb[80].mxu0 }
 0x8a5   :  { %v2978_v29 = vpop.f32.mrb[81].mxu0  ;;  %v3026_v21 = vmul.f32 %v9234_v0, %v8392_v28 }
 0x8a6   :  { %v3025_v12 = vmul.f32 %v9232_v33, %v2978_v29 }
 0x8a8   :  { %v8395_v10 = vpop.f32.mrb[82].mxu0  ;;  %8406 = vmatprep.mubr.msk.f32.mxu1 %vm840_vm1, %v3025_v12 }
 0x8a9   :  { %v2988_v22 = vpop.f32.mrb[83].mxu0  ;;  %8407 = vmatmul.mubr.msk.f32.vlgmr.msra.gmra.mrb[80].mxu1 %vm840_vm1, %v3026_v21  ;;  %v3028_v44 = vmul.f32 %v9238_v6, %v8395_v10  ;;  %v3340_v10 = vpop.xlane.xlu0 %3339  ;;  %v9498_v6 = vld [vmem:[%s12296_s29 + $0x50] sm:$0xff] }
 0x8aa   :  { %v3027_v18 = vmul.f32 %v9236_v20, %v2988_v22  ;;  %8981 = vmatpush3.bf16.msra.mxu1 %v10622_v1  ;;  %v9246_v1 = vpop.eup %9245  ;;  %v9497_v20 = vld [vmem:[%s12296_s29 + $0x58] sm:$0xff] }
 0x8ab   :  { %v9248_v59 = vpop.eup %9247  ;;  %v1574_v48 = vmul.f32 %v9246_v1, %v10470_v62 }
 0x8ac   :  { %v8398_v43 = vpop.f32.mrb[84].mxu0  ;;  %8409 = vmatprep.mubr.msk.f32.mxu1 %vm840_vm1, %v3027_v18  ;;  %v9250_v32 = vpop.eup %9249 }
 0x8ad   :  { %v2998_v13 = vpop.f32.mrb[85].mxu0  ;;  %8410 = vmatmul.mubr.msk.f32.gmra.mrb[82].mxu1 %vm840_vm1, %v3028_v44  ;;  %v3030_v42 = vmul.f32 %v9242_v26, %v8398_v43  ;;  %v9252_v50 = vpop.eup %9251  ;;  %v1575_v24 = vmul.f32 %v9250_v32, %v10468_v58 }
 0x8ae   :  { %v3029_v11 = vmul.f32 %v9240_v54, %v2998_v13  ;;  %v9254_v16 = vpop.eup %9253  ;;  %v1576_v31 = vmul.f32 %v9252_v50, %v10474_v4  ;;  %v3380_v13 = vmul.f32 0.03125, %v3334_v2  ;;  %v3346_v40 = vpop.xlane.xlu0 %3345 }
 0x8af   :  { %v9256_v55 = vpop.eup %9255  ;;  %v1577_v36 = vmul.f32 %v9254_v16, %v10472_v37  ;;  %v3337_v37 = vpop.xlane.xlu1 %3336 }
 0x8b0   :  { %v8401_v63 = vpop.f32.mrb[86].mxu0  ;;  %8412 = vmatprep.mubr.msk.f32.mxu1 %vm840_vm1, %v3029_v11  ;;  %v9258_v5 = vpop.eup %9257  ;;  %v1578_v62 = vmul.f32 %v9256_v55, %v10478_v47  ;;  %v3381_v44 = vmul.f32 0.03125, %v3337_v37  ;;  %v10844_v50 = vsub.f32 %v10714_v41, %v3380_v13  ;;  %v9501_v55 = vld [vmem:[%s12296_s29 + $0x78] sm:$0xff] }
 0x8b1   :  { %v3008_v56 = vpop.f32.mrb[87].mxu0  ;;  %8413 = vmatmul.mubr.msk.f32.gmra.mrb[84].mxu1 %vm840_vm1, %v3030_v42  ;;  %v3032_v57 = vmul.f32 %v9248_v59, %v8401_v63  ;;  %v9260_v19 = vpop.eup %9259  ;;  %v1579_v58 = vmul.f32 %v9258_v5, %v10476_v7  ;;  %v9495_v7 = vld [vmem:[%s12296_s29 + $0x48] sm:$0xff]  ;;  %v9500_v63 = vld [vmem:[%s12296_s29 + $0x60] sm:$0xff]  ;;  %v9502_v5 = vld [vmem:[%s12296_s29 + $0x70] sm:$0xff] }
 0x8b2   :  { %v3031_v52 = vmul.f32 %v9244_v30, %v3008_v56  ;;  %v9262_v46 = vpop.eup %9261  ;;  %v1580_v4 = vmul.f32 %v9260_v19, %v10482_v25  ;;  %v9499_v42 = vld [vmem:[%s12296_s29 + $0x68] sm:$0xff]  ;;  %v10838_v59 = vsub.f32 %v10709_v15, %v3381_v44  ;;  %v3412_v2 = vmul.f32 %v10844_v50, %v10844_v50 }
 0x8b3   :  { %v1581_v51 = vmul.f32 %v9262_v46, %v10480_v14  ;;  %v9496_v14 = vld [vmem:[%s12296_s29 + $0x40] sm:$0xff]  ;;  %v3343_v12 = vpop.xlane.xlu1 %3342 }
 0x8b4   :  { %8415 = vmatprep.mubr.msk.f32.mxu1 %vm840_vm1, %v3031_v52  ;;  %v3383_v52 = vmul.f32 0.03125, %v3343_v12  ;;  %v3413_v46 = vmul.f32 %v10838_v59, %v10838_v59 }
 0x8b5   :  { %8416 = vmatmul.mubr.msk.f32.gmra.mrb[86].mxu1 %vm840_vm1, %v3032_v57 }
 0x8b6   :  { %8422 = vmatprep.mubr.msk.f32.mxu1 %vm840_vm1, %v1574_v48  ;;  %v10860_v19 = vsub.f32 %v10725_v39, %v3383_v52  ;;  %v3588_v52 = vld [vmem:[%s12250_s11 + $0x10] sm:$0xff] }
 0x8b7   :  { %v3349_v53 = vpop.xlane.xlu1 %3348 }
 0x8b9   :  { %8423 = vmatmul.mubr.msk.f32.vlgmr.msra.gmra.mrb[80].mxu1 %vm840_vm1, %v1575_v24  ;;  %v3382_v24 = vmul.f32 0.03125, %v3340_v10 }
 0x8ba   :  { %8425 = vmatprep.mubr.msk.f32.mxu1 %vm840_vm1, %v1576_v31 }
 0x8bb   :  { %v3355_v37 = vpop.xlane.xlu1 %3354 }
 0x8bd   :  { %8426 = vmatmul.mubr.msk.f32.gmra.mrb[82].mxu1 %vm840_vm1, %v1577_v36 }
 0x8be   :  { %8428 = vmatprep.mubr.msk.f32.mxu1 %vm840_vm1, %v1578_v62 }
 0x8c1   :  { %8429 = vmatmul.mubr.msk.f32.gmra.mrb[84].mxu1 %vm840_vm1, %v1579_v58 }
 0x8c2   :  { %8431 = vmatprep.mubr.msk.f32.mxu1 %vm840_vm1, %v1580_v4  ;;  %v10867_v4 = vsub.f32 %v10730_v27, %v3382_v24 }
 0x8c5   :  { %8432 = vmatmul.mubr.msk.f32.gmra.mrb[86].mxu1 %vm840_vm1, %v1581_v51  ;;  %v3384_v51 = vmul.f32 0.03125, %v3346_v40  ;;  %v3589_v40 = vld [vmem:[%s12250_s11 + $0x18] sm:$0xff] }
 0x98c   :  { %v8424_v47 = vpop.f32.mrb[80].mxu1 }
 0x98d   :  { %v3307_v38 = vadd.f32 %v8424_v47, %v10702_v34  ;;  %v3252_v61 = vpop.f32.mrb[81].mxu1 }
 0x98e   :  { %v3306_v60 = vadd.f32 %v10702_v34, %v3252_v61 }
 0x98f   :  { %v10798_v25 = vadd.f32 %v9495_v7, %v3307_v38  ;;  %v3352_v38 = vpop.xlane.xlu0 %3351  ;;  %v3431_v7 = vsel %vm89_vm0, %v3413_v46, 0.0 }
 0x990   :  { %v10803_v8 = vadd.f32 %v9496_v14, %v3306_v60  ;;  %v8427_v28 = vpop.f32.mrb[82].mxu1  ;;  %v3387_v60 = vmul.f32 0.03125, %v3355_v37  ;;  %v3415_v14 = vmul.f32 %v10860_v19, %v10860_v19 }
 0x991   :  { %12337 = vst [vmem:[#allocation9_spill] sm:$0xff] %v10798_v25  ;;  %v3309_v33 = vadd.f32 %v8427_v28, %v10702_v34  ;;  %v3262_v29 = vpop.f32.mrb[83].mxu1  ;;  %v3359_v0 = vsel %vm89_vm0, %v10798_v25, 0.0  ;;  %v10880_v28 = vsub.f32 %v10746_v9, %v3384_v51 }
 0x992   :  { %12338 = vst [vmem:[#allocation11_spill] sm:$0xff] %v10803_v8  ;;  %v3308_v49 = vadd.f32 %v10702_v34, %v3262_v29  ;;  %3360 = vadd.xlane.f32.xlu1 %v3359_v0  ;;  %v3356_v21 = vsel %vm89_vm0, %v10803_v8, 0.0  ;;  %v3428_v29 = vsel %vm89_vm0, %v3412_v2, 0.0  ;;  %v3414_v0 = vmul.f32 %v10867_v4, %v10867_v4 }
 0x993   :  { %v10814_v22 = vadd.f32 %v9497_v20, %v3309_v33  ;;  %3357 = vadd.xlane.f32.xlu0 %v3356_v21  ;;  %v3386_v33 = vmul.f32 0.03125, %v3352_v38  ;;  %v10886_v12 = vsub.f32 %v10757_v45, %v3387_v60 }
 0x994   :  { %v10819_v23 = vadd.f32 %v9498_v6, %v3308_v49  ;;  %v8430_v18 = vpop.f32.mrb[84].mxu1  ;;  %v3437_v49 = vsel %vm89_vm0, %v3415_v14, 0.0  ;;  %v3434_v20 = vsel %vm89_vm0, %v3414_v0, 0.0  ;;  %v3416_v6 = vmul.f32 %v10880_v28, %v10880_v28 }
 0x995   :  { %12339 = vst [vmem:[#allocation12_spill] sm:$0xff] %v10814_v22  ;;  %v3311_v43 = vadd.f32 %v8430_v18, %v10702_v34  ;;  %v3272_v54 = vpop.f32.mrb[85].mxu1  ;;  %v3365_v3 = vsel %vm89_vm0, %v10814_v22, 0.0  ;;  %v10892_v10 = vsub.f32 %v10762_v35, %v3386_v33  ;;  %v3419_v44 = vmul.f32 %v10886_v12, %v10886_v12 }
 0x996   :  { %12340 = vst [vmem:[#allocation13_spill] sm:$0xff] %v10819_v23  ;;  %v3310_v26 = vadd.f32 %v10702_v34, %v3272_v54  ;;  %3366 = vadd.xlane.f32.xlu1 %v3365_v3  ;;  %v3362_v11 = vsel %vm89_vm0, %v10819_v23, 0.0 }
 0x997   :  { %v10830_v30 = vadd.f32 %v9499_v42, %v3311_v43  ;;  %3363 = vadd.xlane.f32.xlu0 %v3362_v11  ;;  %v3440_v43 = vsel %vm89_vm0, %v3416_v6, 0.0  ;;  %v3418_v54 = vmul.f32 %v10892_v10, %v10892_v10  ;;  %v3449_v3 = vsel %vm89_vm0, %v3419_v44, 0.0  ;;  %v3587_v11 = vld [vmem:[%s12250_s11 + $0x8] sm:$0xff] }
 0x998   :  { %v10835_v1 = vadd.f32 %v9500_v63, %v3310_v26  ;;  %v8433_v56 = vpop.f32.mrb[86].mxu1  ;;  %v3586_v26 = vld [vmem:[%s12250_s11] sm:$0xff]  ;;  %v3784_v63 = vld [vmem:[%s12251_s12 + $0x8] sm:$0xff] }
 0x999   :  { %12341 = vst [vmem:[#allocation14_spill] sm:$0xff] %v10830_v30  ;;  %v3313_v57 = vadd.f32 %v8433_v56, %v10702_v34  ;;  %v3282_v32 = vpop.f32.mrb[87].mxu1  ;;  %v3371_v48 = vsel %vm89_vm0, %v10830_v30, 0.0  ;;  %v3446_v13 = vsel %vm89_vm0, %v3418_v54, 0.0  ;;  %v8982_v42 = vpack.c.bf16 %v3587_v11, %v3586_v26 }
 0x99a   :  { %12342 = vst [vmem:[#allocation15_spill] sm:$0xff] %v10835_v1  ;;  %v3312_v16 = vadd.f32 %v10702_v34, %v3282_v32  ;;  %3372 = vadd.xlane.f32.xlu1 %v3371_v48  ;;  %v3368_v31 = vsel %vm89_vm0, %v10835_v1, 0.0  ;;  %v3385_v34 = vmul.f32 0.03125, %v3349_v53  ;;  %v3783_v53 = vld [vmem:[%s12251_s12] sm:$0xff]  ;;  %v10931_v48 = vld [vmem:[%s12252_s1 + $0x8] sm:$0xff] }
 0x99b   :  { %v10852_v36 = vadd.f32 %v9501_v55, %v3313_v57  ;;  %3369 = vadd.xlane.f32.xlu0 %v3368_v31  ;;  %v8990_v56 = vpack.c.bf16 %v3784_v63, %v3783_v53  ;;  %8983 = vmatprep.subr.bf16.mxu0 %v8982_v42  ;;  %v8986_v57 = vpack.c.bf16 %v3589_v40, %v3588_v52  ;;  %v10926_v32 = vld [vmem:[%s12252_s1] sm:$0xff] }
 0x99c   :  { %v10857_v62 = vadd.f32 %v9502_v5, %v3312_v16  ;;  %v10874_v61 = vsub.f32 %v10741_v17, %v3385_v34  ;;  %8985 = vmatpush3.bf16.msra.mxu0 %v8982_v42  ;;  %8470 = vmatprep.mubr.msk.f32.mxu1 %vm840_vm1, %v10926_v32 }
 0x99d   :  { %12343 = vst [vmem:[#allocation16_spill] sm:$0xff] %v10852_v36  ;;  %v3377_v58 = vsel %vm89_vm0, %v10852_v36, 0.0  ;;  %8991 = vmatprep.subr.bf16.mxu1 %v8990_v56  ;;  %8987 = vmatprep.subr.bf16.mxu0 %v8986_v57 }
 0x99e   :  { %12344 = vst [vmem:[#allocation17_spill] sm:$0xff] %v10857_v62  ;;  %3378 = vadd.xlane.f32.xlu1 %v3377_v58  ;;  %v3374_v47 = vsel %vm89_vm0, %v10857_v62, 0.0  ;;  %v3417_v21 = vmul.f32 %v10874_v61, %v10874_v61  ;;  %8993 = vmatpush3.bf16.msra.mxu1 %v8990_v56 }
 0x99f   :  { %3375 = vadd.xlane.f32.xlu0 %v3374_v47 }
 0x9a0   :  { %v3443_v18 = vsel %vm89_vm0, %v3417_v21, 0.0  ;;  %8989 = vmatpush3.bf16.msra.mxu0 %v8986_v57 }
 0x9a1   :  { %8471 = vmatmul.mubr.msk.f32.vlgmr.msra.gmra.mrb[88].mxu1 %vm840_vm1, %v10931_v48 }
 0x9a2   :  { %3432 = vadd.xlane.f32.xlu1 %v3431_v7  ;;  %8477 = vmatprep.mubr.msk.f32.mxu1 %vm840_vm1, %v10926_v32 }
 0x9a3   :  { %3429 = vadd.xlane.f32.xlu0 %v3428_v29 }
 0x9a6   :  { %3438 = vadd.xlane.f32.xlu1 %v3437_v49 }
 0x9a7   :  { %3435 = vadd.xlane.f32.xlu0 %v3434_v20 }
 0x9aa   :  { %3444 = vadd.xlane.f32.xlu1 %v3443_v18 }
 0x9ab   :  { %3441 = vadd.xlane.f32.xlu0 %v3440_v43 }
 0x9ae   :  { %3450 = vadd.xlane.f32.xlu1 %v3449_v3 }
 0x9af   :  { %3447 = vadd.xlane.f32.xlu0 %v3446_v13 }
 0xa1f   :  { %v3361_v24 = vpop.xlane.xlu1 %3360 }
 0xa20   :  { %v3389_v16 = vmul.f32 0.03125, %v3361_v24  ;;  %v3358_v31 = vpop.xlane.xlu0 %3357 }
 0xa21   :  { %v3388_v55 = vmul.f32 0.03125, %v3358_v31 }
 0xa22   :  { %v10940_v5 = vsub.f32 %v10798_v25, %v3389_v16 }
 0xa23   :  { %v10943_v34 = vsub.f32 %v10803_v8, %v3388_v55  ;;  %v3367_v58 = vpop.xlane.xlu1 %3366 }
 0xa24   :  { %v3391_v46 = vmul.f32 0.03125, %v3367_v58  ;;  %v3364_v51 = vpop.xlane.xlu0 %3363  ;;  %v3421_v37 = vmul.f32 %v10940_v5, %v10940_v5 }
 0xa25   :  { %v3390_v47 = vmul.f32 0.03125, %v3364_v51  ;;  %v3420_v2 = vmul.f32 %v10943_v34, %v10943_v34 }
 0xa26   :  { %v10950_v38 = vsub.f32 %v10814_v22, %v3391_v46  ;;  %v3455_v60 = vsel %vm89_vm0, %v3421_v37, 0.0 }
 0xa27   :  { %v10954_v7 = vsub.f32 %v10819_v23, %v3390_v47  ;;  %v3373_v14 = vpop.xlane.xlu1 %3372  ;;  %3456 = vadd.xlane.f32.xlu1 %v3455_v60  ;;  %v3452_v33 = vsel %vm89_vm0, %v3420_v2, 0.0 }
 0xa28   :  { %v3393_v29 = vmul.f32 0.03125, %v3373_v14  ;;  %3453 = vadd.xlane.f32.xlu0 %v3452_v33  ;;  %v3370_v0 = vpop.xlane.xlu0 %3369  ;;  %v3423_v49 = vmul.f32 %v10950_v38, %v10950_v38 }
 0xa29   :  { %v3392_v21 = vmul.f32 0.03125, %v3370_v0  ;;  %v3422_v20 = vmul.f32 %v10954_v7, %v10954_v7 }
 0xa2a   :  { %v10962_v6 = vsub.f32 %v10830_v30, %v3393_v29  ;;  %v3461_v18 = vsel %vm89_vm0, %v3423_v49, 0.0 }
 0xa2b   :  { %v10966_v44 = vsub.f32 %v10835_v1, %v3392_v21  ;;  %3462 = vadd.xlane.f32.xlu1 %v3461_v18  ;;  %v3379_v43 = vpop.xlane.xlu1 %3378  ;;  %v3458_v54 = vsel %vm89_vm0, %v3422_v20, 0.0 }
 0xa2c   :  { %v3395_v3 = vmul.f32 0.03125, %v3379_v43  ;;  %3459 = vadd.xlane.f32.xlu0 %v3458_v54  ;;  %v3376_v13 = vpop.xlane.xlu0 %3375  ;;  %v3425_v26 = vmul.f32 %v10962_v6, %v10962_v6 }
 0xa2d   :  { %v3394_v11 = vmul.f32 0.03125, %v3376_v13  ;;  %v3424_v42 = vmul.f32 %v10966_v44, %v10966_v44 }
 0xa2e   :  { %v10974_v53 = vsub.f32 %v10852_v36, %v3395_v3  ;;  %v3467_v63 = vsel %vm89_vm0, %v3425_v26, 0.0 }
 0xa2f   :  { %v10978_v56 = vsub.f32 %v10857_v62, %v3394_v11  ;;  %3468 = vadd.xlane.f32.xlu1 %v3467_v63  ;;  %v3433_v52 = vpop.xlane.xlu1 %3432  ;;  %v3464_v40 = vsel %vm89_vm0, %v3424_v42, 0.0  ;;  %v10990_v42 = vld [vmem:[%s12253_s9] ss:$0 sm:$0xff] }
 0xa30   :  { %v3477_v57 = vmul.f32 0.03125, %v3433_v52  ;;  %3465 = vadd.xlane.f32.xlu0 %v3464_v40  ;;  %v3430_v24 = vpop.xlane.xlu0 %3429  ;;  %v3427_v16 = vmul.f32 %v10974_v53, %v10974_v53 }
 0xa31   :  { %v3476_v31 = vmul.f32 0.03125, %v3430_v24  ;;  %v3426_v55 = vmul.f32 %v10978_v56, %v10978_v56 }
 0xa32   :  { %v3493_v58 = vadd.f32 1e-05, %v3477_v57  ;;  %v3473_v46 = vsel %vm89_vm0, %v3427_v16, 0.0 }
 0xa33   :  { %v3492_v51 = vadd.f32 1e-05, %v3476_v31  ;;  %3474 = vadd.xlane.f32.xlu1 %v3473_v46  ;;  %v3439_v37 = vpop.xlane.xlu1 %3438  ;;  %v3470_v47 = vsel %vm89_vm0, %v3426_v55, 0.0  ;;  %v10998_v31 = vld [vmem:[%s12254_s10] ss:$0 sm:$0xff] }
 0xa34   :  { %9263 = vrsqrt.f32 %v3493_v58  ;;  %v3479_v2 = vmul.f32 0.03125, %v3439_v37  ;;  %3471 = vadd.xlane.f32.xlu0 %v3470_v47  ;;  %v3436_v60 = vpop.xlane.xlu0 %3435 }
 0xa35   :  { %9265 = vrsqrt.f32 %v3492_v51  ;;  %v3478_v14 = vmul.f32 0.03125, %v3436_v60 }
 0xa36   :  { %v3495_v33 = vadd.f32 1e-05, %v3479_v2 }
 0xa37   :  { %v3494_v29 = vadd.f32 1e-05, %v3478_v14  ;;  %v3445_v0 = vpop.xlane.xlu1 %3444 }
 0xa38   :  { %9267 = vrsqrt.f32 %v3495_v33  ;;  %v3481_v49 = vmul.f32 0.03125, %v3445_v0  ;;  %v3442_v21 = vpop.xlane.xlu0 %3441 }
 0xa39   :  { %9269 = vrsqrt.f32 %v3494_v29  ;;  %v3480_v20 = vmul.f32 0.03125, %v3442_v21 }
 0xa3a   :  { %v3497_v18 = vadd.f32 1e-05, %v3481_v49 }
 0xa3b   :  { %v3496_v43 = vadd.f32 1e-05, %v3480_v20  ;;  %v3451_v54 = vpop.xlane.xlu1 %3450 }
 0xa3c   :  { %9271 = vrsqrt.f32 %v3497_v18  ;;  %v3483_v3 = vmul.f32 0.03125, %v3451_v54  ;;  %v3448_v13 = vpop.xlane.xlu0 %3447 }
 0xa3d   :  { %9273 = vrsqrt.f32 %v3496_v43  ;;  %v3482_v26 = vmul.f32 0.03125, %v3448_v13 }
 0xa3e   :  { %v9264_v11 = vpop.eup %9263  ;;  %v3499_v63 = vadd.f32 1e-05, %v3483_v3 }
 0xa3f   :  { %v9266_v52 = vpop.eup %9265  ;;  %v3525_v40 = vmul.f32 %v9264_v11, %v10838_v59  ;;  %v3498_v57 = vadd.f32 1e-05, %v3482_v26  ;;  %v3867_v26 = vld [vmem:[%s12255_s13 + $0x8] sm:$0xff] }
 0xa40   :  { %9275 = vrsqrt.f32 %v3499_v63  ;;  %v3524_v24 = vmul.f32 %v9266_v52, %v10844_v50 }
 0xa41   :  { %v3547_v16 = vmul.f32 %v10990_v42, %v3525_v40  ;;  %9277 = vrsqrt.f32 %v3498_v57 }
 0xa42   :  { %v9268_v55 = vpop.eup %9267  ;;  %v3546_v58 = vmul.f32 %v10990_v42, %v3524_v24 }
 0xa43   :  { %v9270_v46 = vpop.eup %9269  ;;  %v3527_v51 = vmul.f32 %v9268_v55, %v10860_v19  ;;  %v11007_v50 = vadd.f32 %v10998_v31, %v3547_v16 }
 0xa44   :  { %v11003_v59 = vadd.f32 %v10998_v31, %v3546_v58  ;;  %v3526_v37 = vmul.f32 %v9270_v46, %v10867_v4 }
 0xa45   :  { %v3549_v47 = vmul.f32 %v10990_v42, %v3527_v51 }
 0xa46   :  { %v9272_v2 = vpop.eup %9271  ;;  %8442 = vmatprep.mubr.msk.f32.mxu0 %vm89_vm0, %v11003_v59  ;;  %v3548_v60 = vmul.f32 %v10990_v42, %v3526_v37 }
 0xa47   :  { %v9274_v14 = vpop.eup %9273  ;;  %8443 = vmatmul.mubr.msk.f32.vlgmr.msra.gmra.mrb[88].mxu0 %vm89_vm0, %v11007_v50  ;;  %v3529_v19 = vmul.f32 %v9272_v2, %v10874_v61  ;;  %v11021_v29 = vadd.f32 %v10998_v31, %v3549_v47 }
 0xa48   :  { %v11017_v33 = vadd.f32 %v10998_v31, %v3548_v60  ;;  %v3528_v4 = vmul.f32 %v9274_v14, %v10880_v28 }
 0xa49   :  { %v3551_v0 = vmul.f32 %v10990_v42, %v3529_v19 }
 0xa4a   :  { %v9276_v49 = vpop.eup %9275  ;;  %8445 = vmatprep.mubr.msk.f32.mxu0 %vm89_vm0, %v11017_v33  ;;  %v3550_v21 = vmul.f32 %v10990_v42, %v3528_v4 }
 0xa4b   :  { %v9278_v20 = vpop.eup %9277  ;;  %8446 = vmatmul.mubr.msk.f32.gmra.mrb[90].mxu0 %vm89_vm0, %v11021_v29  ;;  %v3531_v61 = vmul.f32 %v9276_v49, %v10886_v12  ;;  %v11035_v43 = vadd.f32 %v10998_v31, %v3551_v0 }
 0xa4c   :  { %v11031_v18 = vadd.f32 %v10998_v31, %v3550_v21  ;;  %v3530_v28 = vmul.f32 %v9278_v20, %v10892_v10  ;;  %v3866_v10 = vld [vmem:[%s12255_s13] sm:$0xff] }
 0xa4d   :  { %v3553_v54 = vmul.f32 %v10990_v42, %v3531_v61  ;;  %v8994_v11 = vpack.c.bf16 %v3867_v26, %v3866_v10 }
 0xa4e   :  { %8448 = vmatprep.mubr.msk.f32.mxu0 %vm89_vm0, %v11031_v18  ;;  %v3552_v3 = vmul.f32 %v10990_v42, %v3530_v28 }
 0xa4f   :  { %8449 = vmatmul.mubr.msk.f32.gmra.mrb[92].mxu0 %vm89_vm0, %v11035_v43  ;;  %v11047_v13 = vadd.f32 %v10998_v31, %v3553_v54  ;;  %8995 = vmatprep.subr.bf16.mxu1 %v8994_v11 }
 0xa50   :  { %v11044_v12 = vadd.f32 %v10998_v31, %v3552_v3  ;;  %8997 = vmatpush3.bf16.msra.mxu1 %v8994_v11 }
 0xa52   :  { %8451 = vmatprep.mubr.msk.f32.mxu0 %vm89_vm0, %v11044_v12 }
 0xa53   :  { %8452 = vmatmul.mubr.msk.f32.gmra.mrb[94].mxu0 %vm89_vm0, %v11047_v13  ;;  %8478 = vmatmul.mubr.msk.f32.vlgmr.msra.gmra.mrb[90].mxu1 %vm840_vm1, %v10931_v48 }
 0xa74   :  { %v11061_v63 = vpop.f32.mrb[88].mxu1 }
 0xa75   :  { %v3857_v52 = vpop.f32.mrb[89].mxu1 }
 0xa76   :  { %8480 = vmatprep.subr.msk.mxu1 %vm840_vm1, %v3857_v52 }
 0xa77   :  { %8481 = vmatpush3.xpose.msk.msra.mxu1 %vm840_vm1, %v3857_v52 }
 0xa78   :  { %8508 = vmatprep.subr.msk.mxu1 %vm840_vm1, %v11061_v63 }
 0xab4   :  { %v3457_v40 = vpop.xlane.xlu1 %3456 }
 0xab5   :  { %v3485_v57 = vmul.f32 0.03125, %v3457_v40  ;;  %v3454_v24 = vpop.xlane.xlu0 %3453 }
 0xab6   :  { %v3484_v16 = vmul.f32 0.03125, %v3454_v24 }
 0xab7   :  { %v3501_v55 = vadd.f32 1e-05, %v3485_v57 }
 0xab8   :  { %v3500_v58 = vadd.f32 1e-05, %v3484_v16  ;;  %v3463_v46 = vpop.xlane.xlu1 %3462 }
 0xab9   :  { %9279 = vrsqrt.f32 %v3501_v55  ;;  %v3487_v51 = vmul.f32 0.03125, %v3463_v46  ;;  %v3460_v37 = vpop.xlane.xlu0 %3459 }
 0xaba   :  { %9281 = vrsqrt.f32 %v3500_v58  ;;  %v3486_v47 = vmul.f32 0.03125, %v3460_v37 }
 0xabb   :  { %v3503_v2 = vadd.f32 1e-05, %v3487_v51 }
 0xabc   :  { %v3502_v60 = vadd.f32 1e-05, %v3486_v47  ;;  %v3469_v14 = vpop.xlane.xlu1 %3468 }
 0xabd   :  { %9283 = vrsqrt.f32 %v3503_v2  ;;  %v3489_v19 = vmul.f32 0.03125, %v3469_v14  ;;  %v3466_v4 = vpop.xlane.xlu0 %3465 }
 0xabe   :  { %9285 = vrsqrt.f32 %v3502_v60  ;;  %v3488_v0 = vmul.f32 0.03125, %v3466_v4 }
 0xabf   :  { %v3505_v49 = vadd.f32 1e-05, %v3489_v19 }
 0xac0   :  { %v3504_v21 = vadd.f32 1e-05, %v3488_v0  ;;  %v3475_v20 = vpop.xlane.xlu1 %3474 }
 0xac1   :  { %9287 = vrsqrt.f32 %v3505_v49  ;;  %v3491_v61 = vmul.f32 0.03125, %v3475_v20  ;;  %v3472_v28 = vpop.xlane.xlu0 %3471 }
 0xac2   :  { %9289 = vrsqrt.f32 %v3504_v21  ;;  %v3490_v54 = vmul.f32 0.03125, %v3472_v28 }
 0xac3   :  { %v9280_v3 = vpop.eup %9279  ;;  %v3507_v10 = vadd.f32 1e-05, %v3491_v61 }
 0xac4   :  { %v9282_v26 = vpop.eup %9281  ;;  %v3506_v11 = vadd.f32 1e-05, %v3490_v54  ;;  %v3533_v52 = vmul.f32 %v9280_v3, %v10940_v5 }
 0xac5   :  { %9291 = vrsqrt.f32 %v3507_v10  ;;  %v3532_v40 = vmul.f32 %v9282_v26, %v10943_v34 }
 0xac6   :  { %9293 = vrsqrt.f32 %v3506_v11  ;;  %v3555_v57 = vmul.f32 %v10990_v42, %v3533_v52 }
 0xac7   :  { %v9284_v24 = vpop.eup %9283  ;;  %v3554_v16 = vmul.f32 %v10990_v42, %v3532_v40  ;;  %v7350_v40 = vld [vmem:[%s12250_s11 + $0x20] sm:$0xff] }
 0xac8   :  { %v9286_v55 = vpop.eup %9285  ;;  %v3535_v58 = vmul.f32 %v9284_v24, %v10950_v38  ;;  %v11077_v37 = vadd.f32 %v10998_v31, %v3555_v57 }
 0xac9   :  { %v11073_v46 = vadd.f32 %v10998_v31, %v3554_v16  ;;  %v3534_v51 = vmul.f32 %v9286_v55, %v10954_v7  ;;  %v7352_v55 = vld [vmem:[%s12250_s11 + $0x30] sm:$0xff] }
 0xaca   :  { %v3557_v5 = vmul.f32 %v10990_v42, %v3535_v58  ;;  %v7353_v58 = vld [vmem:[%s12250_s11 + $0x38] sm:$0xff] }
 0xacb   :  { %v9288_v34 = vpop.eup %9287  ;;  %8454 = vmatprep.mubr.msk.f32.mxu0 %vm89_vm0, %v11073_v46  ;;  %v3556_v47 = vmul.f32 %v10990_v42, %v3534_v51 }
 0xacc   :  { %v9290_v2 = vpop.eup %9289  ;;  %8455 = vmatmul.mubr.msk.f32.gmra.mrb[96].mxu0 %vm89_vm0, %v11077_v37  ;;  %v3537_v38 = vmul.f32 %v9288_v34, %v10962_v6  ;;  %v11091_v14 = vadd.f32 %v10998_v31, %v3557_v5  ;;  %v9002_v34 = vpack.c.bf16 %v7353_v58, %v7352_v55 }
 0xacd   :  { %v11087_v60 = vadd.f32 %v10998_v31, %v3556_v47  ;;  %v3536_v7 = vmul.f32 %v9290_v2, %v10966_v44 }
 0xace   :  { %v3559_v19 = vmul.f32 %v10990_v42, %v3537_v38 }
 0xacf   :  { %v9292_v4 = vpop.eup %9291  ;;  %8457 = vmatprep.mubr.msk.f32.mxu0 %vm89_vm0, %v11087_v60  ;;  %v3558_v0 = vmul.f32 %v10990_v42, %v3536_v7 }
 0xad0   :  { %v9294_v49 = vpop.eup %9293  ;;  %8458 = vmatmul.mubr.msk.f32.gmra.mrb[98].mxu0 %vm89_vm0, %v11091_v14  ;;  %v3539_v6 = vmul.f32 %v9292_v4, %v10974_v53  ;;  %v11105_v20 = vadd.f32 %v10998_v31, %v3559_v19 }
 0xad1   :  { %v11101_v21 = vadd.f32 %v10998_v31, %v3558_v0  ;;  %v3538_v44 = vmul.f32 %v9294_v49, %v10978_v56 }
 0xad2   :  { %v3561_v61 = vmul.f32 %v10990_v42, %v3539_v6 }
 0xad3   :  { %8460 = vmatprep.mubr.msk.f32.mxu0 %vm89_vm0, %v11101_v21  ;;  %v3560_v28 = vmul.f32 %v10990_v42, %v3538_v44 }
 0xad4   :  { %8461 = vmatmul.mubr.msk.f32.gmra.mrb[100].mxu0 %vm89_vm0, %v11105_v20  ;;  %v11117_v54 = vadd.f32 %v10998_v31, %v3561_v61 }
 0xad5   :  { %v11114_v53 = vadd.f32 %v10998_v31, %v3560_v28 }
 0xad7   :  { %8463 = vmatprep.mubr.msk.f32.mxu0 %vm89_vm0, %v11114_v53 }
 0xad8   :  { %8464 = vmatmul.mubr.msk.f32.gmra.mrb[102].mxu0 %vm89_vm0, %v11117_v54 }
 0xb1a   :  { %v8444_v56 = vpop.f32.mrb[88].mxu0 }
 0xb1b   :  { %v3704_v3 = vpop.f32.mrb[89].mxu0 }
 0xb1c   :  { %8482 = vmatprep.mubr.msk.f32.mxu1 %vm840_vm1, %v3704_v3 }
 0xb1d   :  { %8483 = vmatmul.mubr.msk.f32.vlgmr.msra.gmra.mrb[92].mxu1 %vm840_vm1, %v8444_v56 }
 0xb1e   :  { %v8447_v42 = vpop.f32.mrb[90].mxu0  ;;  %8509 = vmatpush3.xpose.msk.msra.mxu1 %vm840_vm1, %v11061_v63  ;;  %v7351_v63 = vld [vmem:[%s12250_s11 + $0x28] sm:$0xff] }
 0xb1f   :  { %v3714_v10 = vpop.f32.mrb[91].mxu0  ;;  %v8998_v57 = vpack.c.bf16 %v7351_v63, %v7350_v40 }
 0xb20   :  { %8485 = vmatprep.mubr.msk.f32.mxu1 %vm840_vm1, %v3714_v10 }
 0xb21   :  { %8486 = vmatmul.mubr.msk.f32.gmra.mrb[94].mxu1 %vm840_vm1, %v8447_v42  ;;  %8999 = vmatprep.subr.bf16.mxu1 %v8998_v57 }
 0xb22   :  { %v8450_v31 = vpop.f32.mrb[92].mxu0 }
 0xb23   :  { %v3724_v26 = vpop.f32.mrb[93].mxu0 }
 0xb24   :  { %8488 = vmatprep.mubr.msk.f32.mxu1 %vm840_vm1, %v3724_v26 }
 0xb25   :  { %8489 = vmatmul.mubr.msk.f32.gmra.mrb[96].mxu1 %vm840_vm1, %v8450_v31 }
 0xb26   :  { %v8453_v11 = vpop.f32.mrb[94].mxu0  ;;  %v11139_v24 = vpop.f32.mrb[90].mxu1 }
 0xb27   :  { %v3734_v52 = vpop.f32.mrb[95].mxu0  ;;  %v3934_v16 = vpop.f32.mrb[91].mxu1 }
 0xb28   :  { %8491 = vmatprep.mubr.msk.f32.mxu1 %vm840_vm1, %v3734_v52  ;;  %8494 = vmatprep.subr.mxu0 %v3934_v16 }
 0xb29   :  { %8492 = vmatmul.mubr.msk.f32.gmra.mrb[98].mxu1 %vm840_vm1, %v8453_v11  ;;  %8495 = vmatpush3.msra.mxu0 %v3934_v16 }
 0xb2a   :  { %8522 = vmatprep.subr.mxu0 %v11139_v24 }
 0xb9f   :  { %v8456_v51 = vpop.f32.mrb[96].mxu0 }
 0xba0   :  { %v3744_v5 = vpop.f32.mrb[97].mxu0 }
 0xba1   :  { %8510 = vmatprep.mubr.msk.f32.mxu1 %vm840_vm1, %v3744_v5 }
 0xba2   :  { %8511 = vmatmul.mubr.msk.f32.vlgmr.msra.gmra.mrb[100].mxu1 %vm840_vm1, %v8456_v51 }
 0xba3   :  { %v8459_v47 = vpop.f32.mrb[98].mxu0  ;;  %9001 = vmatpush3.bf16.msra.mxu1 %v8998_v57 }
 0xba4   :  { %v3754_v2 = vpop.f32.mrb[99].mxu0  ;;  %9003 = vmatprep.subr.bf16.mxu1 %v9002_v34 }
 0xba5   :  { %8513 = vmatprep.mubr.msk.f32.mxu1 %vm840_vm1, %v3754_v2 }
 0xba6   :  { %8514 = vmatmul.mubr.msk.f32.gmra.mrb[102].mxu1 %vm840_vm1, %v8459_v47 }
 0xba7   :  { %v8462_v38 = vpop.f32.mrb[100].mxu0  ;;  %9005 = vmatpush3.bf16.msra.mxu1 %v9002_v34 }
 0xba8   :  { %v3764_v7 = vpop.f32.mrb[101].mxu0 }
 0xba9   :  { %8516 = vmatprep.mubr.msk.f32.mxu1 %vm840_vm1, %v3764_v7 }
 0xbaa   :  { %8517 = vmatmul.mubr.msk.f32.gmra.mrb[104].mxu1 %vm840_vm1, %v8462_v38 }
 0xbab   :  { %v8465_v19 = vpop.f32.mrb[102].mxu0 }
 0xbac   :  { %v3774_v4 = vpop.f32.mrb[103].mxu0 }
 0xbad   :  { %8519 = vmatprep.mubr.msk.f32.mxu1 %vm840_vm1, %v3774_v4 }
 0xbae   :  { %8520 = vmatmul.mubr.msk.f32.gmra.mrb[106].mxu1 %vm840_vm1, %v8465_v19 }
 0xbaf   :  { %8544 = vmatprep.mubr.msk.f32.mxu1 %vm89_vm0, %v11003_v59 }
 0xbb2   :  { %8545 = vmatmul.mubr.msk.f32.vlgmr.msra.gmra.mrb[108].mxu1 %vm89_vm0, %v11007_v50 }
 0xbb3   :  { %8547 = vmatprep.mubr.msk.f32.mxu1 %vm89_vm0, %v11017_v33 }
 0xbb6   :  { %8548 = vmatmul.mubr.msk.f32.gmra.mrb[110].mxu1 %vm89_vm0, %v11021_v29 }
 0xbb7   :  { %8550 = vmatprep.mubr.msk.f32.mxu1 %vm89_vm0, %v11031_v18 }
 0xbba   :  { %8551 = vmatmul.mubr.msk.f32.gmra.mrb[112].mxu1 %vm89_vm0, %v11035_v43 }
 0xbbb   :  { %8553 = vmatprep.mubr.msk.f32.mxu1 %vm89_vm0, %v11044_v12 }
 0xbbe   :  { %8554 = vmatmul.mubr.msk.f32.gmra.mrb[114].mxu1 %vm89_vm0, %v11047_v13 }
 0xbbf   :  { %8556 = vmatprep.mubr.msk.f32.mxu1 %vm89_vm0, %v11073_v46 }
 0xbc2   :  { %8557 = vmatmul.mubr.msk.f32.gmra.mrb[116].mxu1 %vm89_vm0, %v11077_v37 }
 0xbc3   :  { %8559 = vmatprep.mubr.msk.f32.mxu1 %vm89_vm0, %v11087_v60 }
 0xbc6   :  { %8560 = vmatmul.mubr.msk.f32.gmra.mrb[118].mxu1 %vm89_vm0, %v11091_v14 }
 0xbc7   :  { %8562 = vmatprep.mubr.msk.f32.mxu1 %vm89_vm0, %v11101_v21 }
 0xbca   :  { %8563 = vmatmul.mubr.msk.f32.gmra.mrb[120].mxu1 %vm89_vm0, %v11105_v20 }
 0xbcb   :  { %8565 = vmatprep.mubr.msk.f32.mxu1 %vm89_vm0, %v11114_v53 }
 0xbce   :  { %8566 = vmatmul.mubr.msk.f32.gmra.mrb[122].mxu1 %vm89_vm0, %v11117_v54 }
 0xbf0   :  { %v8484_v59 = vpop.f32.mrb[92].mxu1 }
 0xbf1   :  { %v4038_v50 = vpop.f32.mrb[93].mxu1  ;;  %v4081_v33 = vsel %vm4077_vm4, %v8484_v59, -inf }
 0xbf2   :  { %4082 = vmax.xlane.f32.xlu1 %v4081_v33  ;;  %v4078_v29 = vsel %vm4077_vm4, %v4038_v50, -inf }
 0xbf3   :  { %4079 = vmax.xlane.f32.xlu0 %v4078_v29 }
 0xbf4   :  { %v8487_v18 = vpop.f32.mrb[94].mxu1 }
 0xbf5   :  { %v4048_v43 = vpop.f32.mrb[95].mxu1  ;;  %v4087_v12 = vsel %vm4077_vm4, %v8487_v18, -inf }
 0xbf6   :  { %4088 = vmax.xlane.f32.xlu1 %v4087_v12  ;;  %v4084_v13 = vsel %vm4077_vm4, %v4048_v43, -inf }
 0xbf7   :  { %4085 = vmax.xlane.f32.xlu0 %v4084_v13 }
 0xbf8   :  { %v8490_v46 = vpop.f32.mrb[96].mxu1 }
 0xbf9   :  { %v4058_v37 = vpop.f32.mrb[97].mxu1  ;;  %v4093_v60 = vsel %vm4077_vm4, %v8490_v46, -inf }
 0xbfa   :  { %4094 = vmax.xlane.f32.xlu1 %v4093_v60  ;;  %v4090_v14 = vsel %vm4077_vm4, %v4058_v37, -inf }
 0xbfb   :  { %4091 = vmax.xlane.f32.xlu0 %v4090_v14 }
 0xbfc   :  { %v11194_v0 = vpop.f32.mrb[98].mxu1 }
 0xbfd   :  { %v11196_v49 = vpop.f32.mrb[99].mxu1  ;;  %v4099_v6 = vsel %vm4077_vm4, %v11194_v0, -inf }
 0xbfe   :  { %4100 = vmax.xlane.f32.xlu1 %v4099_v6  ;;  %v4096_v21 = vsel %vm4077_vm4, %v11196_v49, -inf }
 0xbff   :  { %4097 = vmax.xlane.f32.xlu0 %v4096_v21 }
 0xc75   :  { %v11202_v44 = vpop.f32.mrb[100].mxu1 }
 0xc76   :  { %v11204_v20 = vpop.f32.mrb[101].mxu1  ;;  %v4430_v61 = vsel %vm4077_vm4, %v11202_v44, -inf }
 0xc77   :  { %4431 = vmax.xlane.f32.xlu1 %v4430_v61  ;;  %v4427_v28 = vsel %vm4077_vm4, %v11204_v20, -inf }
 0xc78   :  { %4428 = vmax.xlane.f32.xlu0 %v4427_v28 }
 0xc79   :  { %v11210_v53 = vpop.f32.mrb[102].mxu1 }
 0xc7a   :  { %v11212_v54 = vpop.f32.mrb[103].mxu1  ;;  %v4436_v56 = vsel %vm4077_vm4, %v11210_v53, -inf }
 0xc7b   :  { %4437 = vmax.xlane.f32.xlu1 %v4436_v56  ;;  %v4433_v3 = vsel %vm4077_vm4, %v11212_v54, -inf }
 0xc7c   :  { %4434 = vmax.xlane.f32.xlu0 %v4433_v3 }
 0xc7d   :  { %v11218_v42 = vpop.f32.mrb[104].mxu1 }
 0xc7e   :  { %v11220_v10 = vpop.f32.mrb[105].mxu1  ;;  %v4442_v31 = vsel %vm4077_vm4, %v11218_v42, -inf }
 0xc7f   :  { %v4083_v26 = vpop.xlane.xlu1 %4082  ;;  %4443 = vmax.xlane.f32.xlu1 %v4442_v31  ;;  %v4439_v11 = vsel %vm4077_vm4, %v11220_v10, -inf }
 0xc80   :  { %v4103_v52 = vsub.f32 %v8484_v59, %v4083_v26  ;;  %4440 = vmax.xlane.f32.xlu0 %v4439_v11  ;;  %v4080_v40 = vpop.xlane.xlu0 %4079 }
 0xc81   :  { %v4102_v63 = vsub.f32 %v4038_v50, %v4080_v40  ;;  %v11226_v57 = vpop.f32.mrb[106].mxu1 }
 0xc82   :  { %v4112_v16 = vmul.f32 1.442695, %v4103_v52  ;;  %v11228_v55 = vpop.f32.mrb[107].mxu1  ;;  %v4448_v58 = vsel %vm4077_vm4, %v11226_v57, -inf }
 0xc83   :  { %v4110_v51 = vmul.f32 1.442695, %v4102_v63  ;;  %v4089_v5 = vpop.xlane.xlu1 %4088  ;;  %4449 = vmax.xlane.f32.xlu1 %v4448_v58  ;;  %v4445_v34 = vsel %vm4077_vm4, %v11228_v55, -inf  ;;  %v7371_v63 = vld [vmem:[%s12251_s12 + $0x18] sm:$0xff] }
 0xc84   :  { %v4105_v47 = vsub.f32 %v8487_v18, %v4089_v5  ;;  %4446 = vmax.xlane.f32.xlu0 %v4445_v34  ;;  %v4086_v2 = vpop.xlane.xlu0 %4085 }
 0xc85   :  { %9295 = vpow2.f32 %v4110_v51  ;;  %v4104_v38 = vsub.f32 %v4048_v43, %v4086_v2  ;;  %v11234_v7 = vpop.f32.mrb[108].mxu1 }
 0xc86   :  { %9297 = vpow2.f32 %v4112_v16  ;;  %v4116_v19 = vmul.f32 1.442695, %v4105_v47  ;;  %v11236_v4 = vpop.f32.mrb[109].mxu1 }
 0xc87   :  { %v4114_v59 = vmul.f32 1.442695, %v4104_v38  ;;  %v4095_v50 = vpop.xlane.xlu1 %4094 }
 0xc88   :  { %v4107_v33 = vsub.f32 %v8490_v46, %v4095_v50  ;;  %v4092_v29 = vpop.xlane.xlu0 %4091 }
 0xc89   :  { %9299 = vpow2.f32 %v4114_v59  ;;  %v4106_v12 = vsub.f32 %v4058_v37, %v4092_v29  ;;  %v11238_v13 = vpop.f32.mrb[110].mxu1 }
 0xc8a   :  { %9301 = vpow2.f32 %v4116_v19  ;;  %v4120_v18 = vmul.f32 1.442695, %v4107_v33  ;;  %v11240_v60 = vpop.f32.mrb[111].mxu1 }
 0xc8b   :  { %v4118_v14 = vmul.f32 1.442695, %v4106_v12  ;;  %v4101_v43 = vpop.xlane.xlu1 %4100 }
 0xc8c   :  { %v4109_v6 = vsub.f32 %v11194_v0, %v4101_v43  ;;  %v4098_v21 = vpop.xlane.xlu0 %4097 }
 0xc8d   :  { %9303 = vpow2.f32 %v4118_v14  ;;  %v4108_v61 = vsub.f32 %v11196_v49, %v4098_v21  ;;  %v11244_v28 = vpop.f32.mrb[112].mxu1 }
 0xc8e   :  { %9305 = vpow2.f32 %v4120_v18  ;;  %v4124_v46 = vmul.f32 1.442695, %v4109_v6  ;;  %v11246_v56 = vpop.f32.mrb[113].mxu1 }
 0xc8f   :  { %v11248_v37 = vpop.eup %9295  ;;  %v4122_v3 = vmul.f32 1.442695, %v4108_v61 }
 0xc90   :  { %v11250_v31 = vpop.eup %9297  ;;  %8496 = vmatprep.mubr.msk.f32.mxu0 %vm4077_vm4, %v11248_v37 }
 0xc91   :  { %9307 = vpow2.f32 %v4122_v3  ;;  %8497 = vmatmul.mubr.msk.f32.vlgmr.msra.gmra.mrb[104].mxu0 %vm4077_vm4, %v11250_v31  ;;  %v11256_v0 = vpop.f32.mrb[114].mxu1 }
 0xc92   :  { %9309 = vpow2.f32 %v4124_v46  ;;  %8523 = vmatpush3.msra.mxu0 %v11139_v24  ;;  %v11259_v49 = vpop.f32.mrb[115].mxu1  ;;  %v7370_v24 = vld [vmem:[%s12251_s12 + $0x10] sm:$0xff] }
 0xc93   :  { %v11261_v26 = vpop.eup %9299  ;;  %v9006_v58 = vpack.c.bf16 %v7371_v63, %v7370_v24 }
 0xc94   :  { %v11263_v11 = vpop.eup %9301  ;;  %8499 = vmatprep.mubr.msk.f32.mxu0 %vm4077_vm4, %v11261_v26 }
 0xc95   :  { %8500 = vmatmul.mubr.msk.f32.gmra.mrb[106].mxu0 %vm4077_vm4, %v11263_v11  ;;  %v11269_v52 = vpop.f32.mrb[116].mxu1  ;;  %9007 = vmatprep.subr.bf16.mxu0 %v9006_v58 }
 0xc96   :  { %v11271_v40 = vpop.f32.mrb[117].mxu1 }
 0xc97   :  { %v11279_v16 = vpop.eup %9303 }
 0xc98   :  { %v11281_v51 = vpop.eup %9305  ;;  %8502 = vmatprep.mubr.msk.f32.mxu0 %vm4077_vm4, %v11279_v16 }
 0xc99   :  { %8503 = vmatmul.mubr.msk.f32.gmra.mrb[108].mxu0 %vm4077_vm4, %v11281_v51  ;;  %v11287_v5 = vpop.f32.mrb[118].mxu1 }
 0xc9a   :  { %v11289_v34 = vpop.f32.mrb[119].mxu1 }
 0xc9b   :  { %v11291_v47 = vpop.eup %9307 }
 0xc9c   :  { %v11293_v2 = vpop.eup %9309  ;;  %8505 = vmatprep.mubr.msk.f32.mxu0 %vm4077_vm4, %v11291_v47 }
 0xc9d   :  { %8506 = vmatmul.mubr.msk.f32.gmra.mrb[110].mxu0 %vm4077_vm4, %v11293_v2  ;;  %v11299_v38 = vpop.f32.mrb[120].mxu1 }
 0xc9e   :  { %v11301_v19 = vpop.f32.mrb[121].mxu1 }
 0xca1   :  { %v11303_v59 = vpop.f32.mrb[122].mxu1 }
 0xca2   :  { %v11305_v50 = vpop.f32.mrb[123].mxu1 }
 0xd04   :  { %v4432_v33 = vpop.xlane.xlu1 %4431 }
 0xd05   :  { %v4452_v29 = vsub.f32 %v11202_v44, %v4432_v33  ;;  %v4429_v12 = vpop.xlane.xlu0 %4428 }
 0xd06   :  { %v4451_v18 = vsub.f32 %v11204_v20, %v4429_v12 }
 0xd07   :  { %v4461_v14 = vmul.f32 1.442695, %v4452_v29 }
 0xd08   :  { %v4459_v43 = vmul.f32 1.442695, %v4451_v18  ;;  %v4438_v6 = vpop.xlane.xlu1 %4437  ;;  %v7375_v18 = vld [vmem:[%s12255_s13 + $0x18] sm:$0xff] }
 0xd09   :  { %v4454_v21 = vsub.f32 %v11210_v53, %v4438_v6  ;;  %v4435_v61 = vpop.xlane.xlu0 %4434 }
 0xd0a   :  { %9311 = vpow2.f32 %v4459_v43  ;;  %v4453_v46 = vsub.f32 %v11212_v54, %v4435_v61  ;;  %v7374_v54 = vld [vmem:[%s12255_s13 + $0x10] sm:$0xff] }
 0xd0b   :  { %9313 = vpow2.f32 %v4461_v14  ;;  %v4465_v3 = vmul.f32 1.442695, %v4454_v21  ;;  %v9010_v14 = vpack.c.bf16 %v7375_v18, %v7374_v54 }
 0xd0c   :  { %v4463_v24 = vmul.f32 1.442695, %v4453_v46  ;;  %v4444_v63 = vpop.xlane.xlu1 %4443 }
 0xd0d   :  { %v4456_v62 = vsub.f32 %v11218_v42, %v4444_v63  ;;  %v4441_v36 = vpop.xlane.xlu0 %4440 }
 0xd0e   :  { %9315 = vpow2.f32 %v4463_v24  ;;  %v4455_v44 = vsub.f32 %v11220_v10, %v4441_v36 }
 0xd0f   :  { %9317 = vpow2.f32 %v4465_v3  ;;  %v4469_v20 = vmul.f32 1.442695, %v4456_v62 }
 0xd10   :  { %v4467_v33 = vmul.f32 1.442695, %v4455_v44  ;;  %v4450_v29 = vpop.xlane.xlu1 %4449 }
 0xd11   :  { %v4458_v53 = vsub.f32 %v11226_v57, %v4450_v29  ;;  %v4447_v12 = vpop.xlane.xlu0 %4446 }
 0xd12   :  { %9319 = vpow2.f32 %v4467_v33  ;;  %v4457_v42 = vsub.f32 %v11228_v55, %v4447_v12 }
 0xd13   :  { %9321 = vpow2.f32 %v4469_v20  ;;  %v4473_v36 = vmul.f32 1.442695, %v4458_v53 }
 0xd14   :  { %v11321_v10 = vpop.eup %9311  ;;  %v4471_v62 = vmul.f32 1.442695, %v4457_v42 }
 0xd15   :  { %v11323_v43 = vpop.eup %9313  ;;  %8524 = vmatprep.mubr.msk.f32.mxu0 %vm4077_vm4, %v11321_v10 }
 0xd16   :  { %9323 = vpow2.f32 %v4471_v62  ;;  %8525 = vmatmul.mubr.msk.f32.vlgmr.msra.gmra.mrb[112].mxu0 %vm4077_vm4, %v11323_v43 }
 0xd17   :  { %9325 = vpow2.f32 %v4473_v36  ;;  %9009 = vmatpush3.bf16.msra.mxu0 %v9006_v58 }
 0xd18   :  { %v11329_v57 = vpop.eup %9315  ;;  %9011 = vmatprep.subr.bf16.mxu0 %v9010_v14 }
 0xd19   :  { %v11331_v55 = vpop.eup %9317  ;;  %8527 = vmatprep.mubr.msk.f32.mxu0 %vm4077_vm4, %v11329_v57 }
 0xd1a   :  { %8528 = vmatmul.mubr.msk.f32.gmra.mrb[114].mxu0 %vm4077_vm4, %v11331_v55 }
 0xd1c   :  { %v11337_v6 = vpop.eup %9319 }
 0xd1d   :  { %v11339_v21 = vpop.eup %9321  ;;  %8530 = vmatprep.mubr.msk.f32.mxu0 %vm4077_vm4, %v11337_v6 }
 0xd1e   :  { %8531 = vmatmul.mubr.msk.f32.gmra.mrb[116].mxu0 %vm4077_vm4, %v11339_v21 }
 0xd20   :  { %v11345_v58 = vpop.eup %9323 }
 0xd21   :  { %v11347_v61 = vpop.eup %9325  ;;  %8533 = vmatprep.mubr.msk.f32.mxu0 %vm4077_vm4, %v11345_v58 }
 0xd22   :  { %8534 = vmatmul.mubr.msk.f32.gmra.mrb[118].mxu0 %vm4077_vm4, %v11347_v61 }
 0xd23   :  { %8572 = vmatprep.mubr.msk.f32.mxu0 %vm840_vm1, %v10926_v32 }
 0xd26   :  { %8573 = vmatmul.mubr.msk.f32.vlgmr.msra.gmra.mrb[120].mxu0 %vm840_vm1, %v10931_v48 }
 0xd27   :  { %9013 = vmatpush3.bf16.msra.mxu0 %v9010_v14  ;;  %8579 = vmatprep.mubr.msk.f32.mxu0 %vm840_vm1, %v10926_v32 }
 0xd2a   :  { %8580 = vmatmul.mubr.msk.f32.vlgmr.msra.gmra.mrb[122].mxu0 %vm840_vm1, %v10931_v48 }
 0xd2b   :  { %8584 = vmatprep.mubr.msk.f32.mxu0 %vm840_vm1, %v11236_v4 }
 0xd64   :  { %v11363_v46 = vpop.f32.mrb[104].mxu0 }
 0xd65   :  { %v11365_v3 = vpop.f32.mrb[105].mxu0 }
 0xd68   :  { %v11367_v24 = vpop.f32.mrb[106].mxu0 }
 0xd69   :  { %v11369_v63 = vpop.f32.mrb[107].mxu0 }
 0xd6c   :  { %v11371_v44 = vpop.f32.mrb[108].mxu0 }
 0xd6d   :  { %v11373_v20 = vpop.f32.mrb[109].mxu0 }
 0xd70   :  { %v11375_v33 = vpop.f32.mrb[110].mxu0 }
 0xd71   :  { %v11377_v32 = vpop.f32.mrb[111].mxu0 }
 0xde9   :  { %v11379_v48 = vpop.f32.mrb[112].mxu0 }
 0xdea   :  { %v11381_v29 = vpop.f32.mrb[113].mxu0 }
 0xded   :  { %v11383_v4 = vpop.f32.mrb[114].mxu0 }
 0xdee   :  { %v11385_v53 = vpop.f32.mrb[115].mxu0 }
 0xdf1   :  { %v11387_v12 = vpop.f32.mrb[116].mxu0 }
 0xdf2   :  { %12345 = vst [vmem:[#allocation18_spill] sm:$0xff] %v11387_v12  ;;  %v11389_v54 = vpop.f32.mrb[117].mxu0 }
 0xdf5   :  { %v11391_v18 = vpop.f32.mrb[118].mxu0 }
 0xdf6   :  { %12346 = vst [vmem:[#allocation19_spill] sm:$0xff] %v11391_v18  ;;  %v11393_v42 = vpop.f32.mrb[119].mxu0 }
 0xdf7   :  { %12347 = vst [vmem:[#allocation20_spill] sm:$0xff] %v11393_v42 }
 0xdf9   :  { %v11395_v36 = vpop.f32.mrb[120].mxu0 }
 0xdfa   :  { %v4863_v62 = vpop.f32.mrb[121].mxu0 }
 0xdfb   :  { %8582 = vmatprep.subr.msk.mxu0 %vm840_vm1, %v4863_v62 }
 0xdfc   :  { %8583 = vmatpush3.xpose.msk.msra.mxu0 %vm840_vm1, %v4863_v62 }
 0xdfd   :  { %v11399_v14 = vpop.f32.mrb[122].mxu0 }
 0xdfe   :  { %v4941_v1 = vpop.f32.mrb[123].mxu0 }
 0xdff   :  { %8585 = vmatmul.mubr.msk.f32.vlgmr.msra.gmra.mrb[124].mxu0 %vm840_vm1, %v11234_v7  ;;  %8596 = vmatprep.subr.mxu0 %v4941_v1 }
 0xe00   :  { %8587 = vmatprep.mubr.msk.f32.mxu0 %vm840_vm1, %v11240_v60  ;;  %8597 = vmatpush3.msra.mxu0 %v4941_v1 }
 0xe01   :  { %8642 = vmatprep.subr.msk.mxu0 %vm840_vm1, %v11395_v36 }
 0xe03   :  { %8588 = vmatmul.mubr.msk.f32.gmra.mrb[126].mxu0 %vm840_vm1, %v11238_v13 }
 0xe04   :  { %8590 = vmatprep.mubr.msk.f32.mxu0 %vm840_vm1, %v11246_v56 }
 0xe07   :  { %8591 = vmatmul.mubr.msk.f32.gmra.mrb[128].mxu0 %vm840_vm1, %v11244_v28 }
 0xe08   :  { %8593 = vmatprep.mubr.msk.f32.mxu0 %vm840_vm1, %v11259_v49 }
 0xe0b   :  { %8594 = vmatmul.mubr.msk.f32.gmra.mrb[130].mxu0 %vm840_vm1, %v11256_v0 }
 0xed2   :  { %v8586_v7 = vpop.f32.mrb[124].mxu0 }
 0xed3   :  { %v5046_v1 = vpop.f32.mrb[125].mxu0  ;;  %v5088_v60 = vsel %vm4077_vm4, %v8586_v7, -inf }
 0xed4   :  { %5089 = vmax.xlane.f32.xlu1 %v5088_v60  ;;  %v5085_v62 = vsel %vm4077_vm4, %v5046_v1, -inf }
 0xed5   :  { %5086 = vmax.xlane.f32.xlu0 %v5085_v62 }
 0xed6   :  { %v8589_v13 = vpop.f32.mrb[126].mxu0 }
 0xed7   :  { %v5056_v30 = vpop.f32.mrb[127].mxu0  ;;  %v5094_v56 = vsel %vm4077_vm4, %v8589_v13, -inf }
 0xed8   :  { %5095 = vmax.xlane.f32.xlu1 %v5094_v56  ;;  %v5091_v28 = vsel %vm4077_vm4, %v5056_v30, -inf }
 0xed9   :  { %5092 = vmax.xlane.f32.xlu0 %v5091_v28 }
 0xeda   :  { %v8592_v49 = vpop.f32.mrb[128].mxu0 }
 0xedb   :  { %v5066_v23 = vpop.f32.mrb[129].mxu0  ;;  %v5100_v0 = vsel %vm4077_vm4, %v8592_v49, -inf }
 0xedc   :  { %5101 = vmax.xlane.f32.xlu1 %v5100_v0  ;;  %v5097_v22 = vsel %vm4077_vm4, %v5066_v23, -inf }
 0xedd   :  { %5098 = vmax.xlane.f32.xlu0 %v5097_v22 }
 0xede   :  { %v8595_v60 = vpop.f32.mrb[130].mxu0 }
 0xedf   :  { %v5076_v8 = vpop.f32.mrb[131].mxu0  ;;  %v5106_v62 = vsel %vm4077_vm4, %v8595_v60, -inf }
 0xee0   :  { %5107 = vmax.xlane.f32.xlu1 %v5106_v62  ;;  %v5103_v25 = vsel %vm4077_vm4, %v5076_v8, -inf }
 0xee1   :  { %5104 = vmax.xlane.f32.xlu0 %v5103_v25 }
 0xf61   :  { %v5090_v56 = vpop.xlane.xlu1 %5089 }
 0xf62   :  { %v5110_v35 = vsub.f32 %v8586_v7, %v5090_v56  ;;  %v5087_v45 = vpop.xlane.xlu0 %5086 }
 0xf63   :  { %v5109_v28 = vsub.f32 %v5046_v1, %v5087_v45 }
 0xf64   :  { %v5119_v9 = vmul.f32 1.442695, %v5110_v35 }
 0xf65   :  { %v5117_v17 = vmul.f32 1.442695, %v5109_v28  ;;  %v5096_v27 = vpop.xlane.xlu1 %5095 }
 0xf66   :  { %v5112_v39 = vsub.f32 %v8589_v13, %v5096_v27  ;;  %v5093_v0 = vpop.xlane.xlu0 %5092 }
 0xf67   :  { %9327 = vpow2.f32 %v5117_v17  ;;  %v5111_v41 = vsub.f32 %v5056_v30, %v5093_v0 }
 0xf68   :  { %9329 = vpow2.f32 %v5119_v9  ;;  %v5123_v22 = vmul.f32 1.442695, %v5112_v39 }
 0xf69   :  { %v5121_v15 = vmul.f32 1.442695, %v5111_v41  ;;  %v5102_v18 = vpop.xlane.xlu1 %5101 }
 0xf6a   :  { %v5114_v42 = vsub.f32 %v8592_v49, %v5102_v18  ;;  %v5099_v62 = vpop.xlane.xlu0 %5098 }
 0xf6b   :  { %9331 = vpow2.f32 %v5121_v15  ;;  %v5113_v12 = vsub.f32 %v5066_v23, %v5099_v62 }
 0xf6c   :  { %9333 = vpow2.f32 %v5123_v22  ;;  %v5127_v25 = vmul.f32 1.442695, %v5114_v42 }
 0xf6d   :  { %v5125_v7 = vmul.f32 1.442695, %v5113_v12  ;;  %v5108_v56 = vpop.xlane.xlu1 %5107 }
 0xf6e   :  { %v5116_v45 = vsub.f32 %v8595_v60, %v5108_v56  ;;  %v5105_v35 = vpop.xlane.xlu0 %5104 }
 0xf6f   :  { %9335 = vpow2.f32 %v5125_v7  ;;  %v5115_v1 = vsub.f32 %v5076_v8, %v5105_v35 }
 0xf70   :  { %9337 = vpow2.f32 %v5127_v25  ;;  %v5131_v27 = vmul.f32 1.442695, %v5116_v45 }
 0xf71   :  { %v11425_v17 = vpop.eup %9327  ;;  %v5129_v9 = vmul.f32 1.442695, %v5115_v1 }
 0xf72   :  { %v9330_v39 = vpop.eup %9329  ;;  %8598 = vmatprep.mubr.msk.f32.mxu0 %vm4077_vm4, %v11425_v17 }
 0xf73   :  { %9339 = vpow2.f32 %v5129_v9  ;;  %8599 = vmatmul.mubr.msk.f32.vlgmr.msra.gmra.mrb[132].mxu0 %vm4077_vm4, %v9330_v39  ;;  %v5136_v1 = vsel %vm4077_vm4, %v9330_v39, 0.0 }
 0xf74   :  { %9341 = vpow2.f32 %v5131_v27  ;;  %8643 = vmatpush3.xpose.msk.msra.mxu0 %vm840_vm1, %v11395_v36  ;;  %v5133_v27 = vsel %vm4077_vm4, %v11425_v17, 0.0  ;;  %v4129_v17 = vsel %vm4077_vm4, %v11250_v31, 0.0  ;;  %v4138_v31 = vsel %vm4077_vm4, %v11279_v16, 0.0 }
 0xf75   :  { %v9332_v15 = vpop.eup %9331  ;;  %8656 = vmatprep.subr.mxu0 %v11399_v14  ;;  %v4144_v16 = vsel %vm4077_vm4, %v11291_v47, 0.0 }
 0xf76   :  { %v9334_v41 = vpop.eup %9333  ;;  %8601 = vmatprep.mubr.msk.f32.mxu0 %vm4077_vm4, %v9332_v15 }
 0xf77   :  { %8602 = vmatmul.mubr.msk.f32.gmra.mrb[134].mxu0 %vm4077_vm4, %v9334_v41  ;;  %v5142_v9 = vsel %vm4077_vm4, %v9334_v41, 0.0  ;;  %v4135_v41 = vsel %vm4077_vm4, %v11263_v11, 0.0  ;;  %v7379_v11 = vld [vmem:[%s12256_s14 + $0x18] sm:$0xff] }
 0xf79   :  { %v9336_v8 = vpop.eup %9335 }
 0xf7a   :  { %v9338_v23 = vpop.eup %9337  ;;  %8604 = vmatprep.mubr.msk.f32.mxu0 %vm4077_vm4, %v9336_v8 }
 0xf7b   :  { %8605 = vmatmul.mubr.msk.f32.gmra.mrb[136].mxu0 %vm4077_vm4, %v9338_v23 }
 0xf7d   :  { %v9340_v30 = vpop.eup %9339 }
 0xf7e   :  { %v9342_v12 = vpop.eup %9341  ;;  %8607 = vmatprep.mubr.msk.f32.mxu0 %vm4077_vm4, %v9340_v30  ;;  %v5151_v39 = vsel %vm4077_vm4, %v9340_v30, 0.0 }
 0xf7f   :  { %8608 = vmatmul.mubr.msk.f32.gmra.mrb[138].mxu0 %vm4077_vm4, %v9342_v12 }
 0xf80   :  { %8644 = vmatprep.mubr.msk.f32.mxu0 %vm840_vm1, %v11271_v40 }
 0xf83   :  { %8645 = vmatmul.mubr.msk.f32.vlgmr.msra.gmra.mrb[140].mxu0 %vm840_vm1, %v11269_v52 }
 0xf84   :  { %8657 = vmatpush3.msra.mxu0 %v11399_v14  ;;  %8647 = vmatprep.mubr.msk.f32.mxu0 %vm840_vm1, %v11289_v34 }
 0xf87   :  { %8648 = vmatmul.mubr.msk.f32.gmra.mrb[142].mxu0 %vm840_vm1, %v11287_v5 }
 0xf88   :  { %8650 = vmatprep.mubr.msk.f32.mxu0 %vm840_vm1, %v11301_v19 }
 0xf8b   :  { %8651 = vmatmul.mubr.msk.f32.gmra.mrb[144].mxu0 %vm840_vm1, %v11299_v38 }
 0xf8c   :  { %8653 = vmatprep.mubr.msk.f32.mxu0 %vm840_vm1, %v11305_v50 }
 0xf8f   :  { %8654 = vmatmul.mubr.msk.f32.gmra.mrb[146].mxu0 %vm840_vm1, %v11303_v59 }
0x1046   :  { %v11456_v52 = vpop.f32.mrb[132].mxu0 }
0x1047   :  { %v11458_v40 = vpop.f32.mrb[133].mxu0 }
0x104a   :  { %v11460_v34 = vpop.f32.mrb[134].mxu0 }
0x104b   :  { %v11462_v18 = vpop.f32.mrb[135].mxu0 }
0x104e   :  { %v11464_v5 = vpop.f32.mrb[136].mxu0 }
0x104f   :  { %v11466_v19 = vpop.f32.mrb[137].mxu0 }
0x1052   :  { %v11468_v42 = vpop.f32.mrb[138].mxu0 }
0x1053   :  { %v11470_v38 = vpop.f32.mrb[139].mxu0 }
0x1056   :  { %v11472_v50 = vpop.f32.mrb[140].mxu0 }
0x1057   :  { %v11474_v36 = vpop.f32.mrb[141].mxu0  ;;  %v5695_v59 = vsel %vm4077_vm4, %v11472_v50, -inf }
0x1058   :  { %5696 = vmax.xlane.f32.xlu1 %v5695_v59  ;;  %v5692_v14 = vsel %vm4077_vm4, %v11474_v36, -inf  ;;  %v5139_v59 = vsel %vm4077_vm4, %v9332_v15, 0.0  ;;  %v4126_v15 = vsel %vm4077_vm4, %v11248_v37, 0.0  ;;  %v7378_v37 = vld [vmem:[%s12256_s14 + $0x10] sm:$0xff] }
0x1059   :  { %5693 = vmax.xlane.f32.xlu0 %v5692_v14  ;;  %v5148_v14 = vsel %vm4077_vm4, %v9338_v23, 0.0  ;;  %v4141_v23 = vsel %vm4077_vm4, %v11281_v51, 0.0  ;;  %v11531_v30 = vpack.c.bf16 %v7379_v11, %v7378_v37  ;;  %v3943_v51 = vld [vmem:[%s12256_s14] sm:$0xff] }
0x105a   :  { %v11480_v13 = vpop.f32.mrb[142].mxu0 }
0x105b   :  { %v11482_v49 = vpop.f32.mrb[143].mxu0  ;;  %v5701_v60 = vsel %vm4077_vm4, %v11480_v13, -inf  ;;  %9015 = vmatprep.subr.bf16.mxu1 %v11531_v30 }
0x105c   :  { %5702 = vmax.xlane.f32.xlu1 %v5701_v60  ;;  %v5698_v28 = vsel %vm4077_vm4, %v11482_v49, -inf  ;;  %v5145_v60 = vsel %vm4077_vm4, %v9336_v8, 0.0  ;;  %v4132_v8 = vsel %vm4077_vm4, %v11261_v26, 0.0  ;;  %v4147_v26 = vsel %vm4077_vm4, %v11293_v2, 0.0  ;;  %9017 = vmatpush3.bf16.msra.mxu1 %v11531_v30 }
0x105d   :  { %5699 = vmax.xlane.f32.xlu0 %v5698_v28  ;;  %v5154_v28 = vsel %vm4077_vm4, %v9342_v12, 0.0  ;;  %v3944_v12 = vld [vmem:[%s12256_s14 + $0x8] sm:$0xff] }
0x105e   :  { %v11488_v0 = vpop.f32.mrb[144].mxu0 }
0x105f   :  { %v11490_v22 = vpop.f32.mrb[145].mxu0  ;;  %v5707_v62 = vsel %vm4077_vm4, %v11488_v0, -inf }
0x1060   :  { %5708 = vmax.xlane.f32.xlu1 %v5707_v62  ;;  %v5704_v25 = vsel %vm4077_vm4, %v11490_v22, -inf  ;;  %v11545_v62 = vpack.c.bf16 %v3944_v12, %v3943_v51 }
0x1061   :  { %5705 = vmax.xlane.f32.xlu0 %v5704_v25 }
0x1062   :  { %v11496_v7 = vpop.f32.mrb[146].mxu0  ;;  %9019 = vmatprep.subr.bf16.mxu1 %v11545_v62 }
0x1063   :  { %v11498_v56 = vpop.f32.mrb[147].mxu0  ;;  %v5713_v45 = vsel %vm4077_vm4, %v11496_v7, -inf }
0x1064   :  { %5714 = vmax.xlane.f32.xlu1 %v5713_v45  ;;  %v5710_v35 = vsel %vm4077_vm4, %v11498_v56, -inf }
0x1065   :  { %5711 = vmax.xlane.f32.xlu0 %v5710_v35 }
0x1068   :  { %5137 = vadd.xlane.f32.xlu1 %v5136_v1 }
0x1069   :  { %5134 = vadd.xlane.f32.xlu0 %v5133_v27 }
0x106c   :  { %5143 = vadd.xlane.f32.xlu1 %v5142_v9 }
0x106d   :  { %5140 = vadd.xlane.f32.xlu0 %v5139_v59 }
0x1070   :  { %5149 = vadd.xlane.f32.xlu1 %v5148_v14 }
0x1071   :  { %5146 = vadd.xlane.f32.xlu0 %v5145_v60 }
0x1074   :  { %5155 = vadd.xlane.f32.xlu1 %v5154_v28 }
0x1075   :  { %5152 = vadd.xlane.f32.xlu0 %v5151_v39 }
0x1078   :  { %4130 = vadd.xlane.f32.xlu1 %v4129_v17 }
0x1079   :  { %4127 = vadd.xlane.f32.xlu0 %v4126_v15 }
0x107c   :  { %4136 = vadd.xlane.f32.xlu1 %v4135_v41 }
0x107d   :  { %4133 = vadd.xlane.f32.xlu0 %v4132_v8 }
0x1080   :  { %4142 = vadd.xlane.f32.xlu1 %v4141_v23 }
0x1081   :  { %4139 = vadd.xlane.f32.xlu0 %v4138_v31 }
0x1084   :  { %4148 = vadd.xlane.f32.xlu1 %v4147_v26 }
0x1085   :  { %4145 = vadd.xlane.f32.xlu0 %v4144_v16 }
0x10e5   :  { %v5697_v2 = vpop.xlane.xlu1 %5696 }
0x10e6   :  { %v5717_v25 = vsub.f32 %v11472_v50, %v5697_v2  ;;  %v5694_v45 = vpop.xlane.xlu0 %5693 }
0x10e7   :  { %v5716_v47 = vsub.f32 %v11474_v36, %v5694_v45 }
0x10e8   :  { %v5726_v35 = vmul.f32 1.442695, %v5717_v25 }
0x10e9   :  { %v5724_v1 = vmul.f32 1.442695, %v5716_v47  ;;  %v5703_v27 = vpop.xlane.xlu1 %5702 }
0x10ea   :  { %9343 = vpow2.f32 %v5726_v35  ;;  %v5719_v9 = vsub.f32 %v11480_v13, %v5703_v27  ;;  %v5700_v59 = vpop.xlane.xlu0 %5699 }
0x10eb   :  { %9345 = vpow2.f32 %v5724_v1  ;;  %v5718_v14 = vsub.f32 %v11482_v49, %v5700_v59 }
0x10ec   :  { %v5730_v60 = vmul.f32 1.442695, %v5719_v9 }
0x10ed   :  { %v5728_v28 = vmul.f32 1.442695, %v5718_v14  ;;  %v5709_v39 = vpop.xlane.xlu1 %5708 }
0x10ee   :  { %9347 = vpow2.f32 %v5730_v60  ;;  %v5721_v17 = vsub.f32 %v11488_v0, %v5709_v39  ;;  %v5706_v50 = vpop.xlane.xlu0 %5705 }
0x10ef   :  { %9349 = vpow2.f32 %v5728_v28  ;;  %v5720_v36 = vsub.f32 %v11490_v22, %v5706_v50 }
0x10f0   :  { %v5734_v15 = vmul.f32 1.442695, %v5721_v17 }
0x10f1   :  { %v5732_v41 = vmul.f32 1.442695, %v5720_v36  ;;  %v5715_v8 = vpop.xlane.xlu1 %5714 }
0x10f2   :  { %9351 = vpow2.f32 %v5734_v15  ;;  %v5723_v13 = vsub.f32 %v11496_v7, %v5715_v8  ;;  %v5712_v23 = vpop.xlane.xlu0 %5711 }
0x10f3   :  { %9353 = vpow2.f32 %v5732_v41  ;;  %v5722_v49 = vsub.f32 %v11498_v56, %v5712_v23 }
0x10f4   :  { %v9344_v31 = vpop.eup %9343  ;;  %v5738_v37 = vmul.f32 1.442695, %v5723_v13 }
0x10f5   :  { %v9346_v11 = vpop.eup %9345  ;;  %v5736_v26 = vmul.f32 1.442695, %v5722_v49  ;;  %v5138_v16 = vpop.xlane.xlu1 %5137  ;;  %v5743_v0 = vsel %vm4077_vm4, %v9344_v31, 0.0  ;;  %v4478_v49 = vsel %vm4077_vm4, %v11323_v43, 0.0 }
0x10f6   :  { %9355 = vpow2.f32 %v5738_v37  ;;  %8658 = vmatprep.mubr.msk.f32.mxu0 %vm4077_vm4, %v9346_v11  ;;  %5744 = vadd.xlane.f32.xlu1 %v5743_v0  ;;  %v5135_v22 = vpop.xlane.xlu0 %5134  ;;  %v5740_v51 = vsel %vm4077_vm4, %v9346_v11, 0.0  ;;  %v4475_v11 = vsel %vm4077_vm4, %v11321_v10, 0.0  ;;  %v4481_v0 = vsel %vm4077_vm4, %v11329_v57, 0.0 }
0x10f7   :  { %9357 = vpow2.f32 %v5736_v26  ;;  %8659 = vmatmul.mubr.msk.f32.vlgmr.msra.gmra.mrb[148].mxu0 %vm4077_vm4, %v9344_v31  ;;  %5741 = vadd.xlane.f32.xlu0 %v5740_v51  ;;  %v4487_v57 = vsel %vm4077_vm4, %v11337_v6, 0.0  ;;  %v4493_v6 = vsel %vm4077_vm4, %v11345_v58, 0.0 }
0x10f8   :  { %v9348_v7 = vpop.eup %9347  ;;  %9359 = vrcp.f32 %v5138_v16  ;;  %v4484_v16 = vsel %vm4077_vm4, %v11331_v55, 0.0 }
0x10f9   :  { %v9350_v56 = vpop.eup %9349  ;;  %9361 = vrcp.f32 %v5135_v22  ;;  %v5144_v12 = vpop.xlane.xlu1 %5143  ;;  %v5749_v2 = vsel %vm4077_vm4, %v9348_v7, 0.0 }
0x10fa   :  { %8661 = vmatprep.mubr.msk.f32.mxu0 %vm4077_vm4, %v9350_v56  ;;  %5750 = vadd.xlane.f32.xlu1 %v5749_v2  ;;  %v5141_v25 = vpop.xlane.xlu0 %5140  ;;  %v5746_v45 = vsel %vm4077_vm4, %v9350_v56, 0.0 }
0x10fb   :  { %9363 = vrcp.f32 %v5141_v25  ;;  %8662 = vmatmul.mubr.msk.f32.gmra.mrb[150].mxu0 %vm4077_vm4, %v9348_v7  ;;  %5747 = vadd.xlane.f32.xlu0 %v5746_v45  ;;  %v4490_v7 = vsel %vm4077_vm4, %v11339_v21, 0.0  ;;  %v4496_v21 = vsel %vm4077_vm4, %v11347_v61, 0.0 }
0x10fc   :  { %v9352_v47 = vpop.eup %9351  ;;  %9365 = vrcp.f32 %v5144_v12 }
0x10fd   :  { %v9354_v35 = vpop.eup %9353  ;;  %v5150_v1 = vpop.xlane.xlu1 %5149  ;;  %v5755_v27 = vsel %vm4077_vm4, %v9352_v47, 0.0 }
0x10fe   :  { %8664 = vmatprep.mubr.msk.f32.mxu0 %vm4077_vm4, %v9354_v35  ;;  %5756 = vadd.xlane.f32.xlu1 %v5755_v27  ;;  %v5147_v9 = vpop.xlane.xlu0 %5146  ;;  %v5752_v59 = vsel %vm4077_vm4, %v9354_v35, 0.0 }
0x10ff   :  { %9367 = vrcp.f32 %v5147_v9  ;;  %8665 = vmatmul.mubr.msk.f32.gmra.mrb[152].mxu0 %vm4077_vm4, %v9352_v47  ;;  %5753 = vadd.xlane.f32.xlu0 %v5752_v59 }
0x1100   :  { %v9356_v14 = vpop.eup %9355  ;;  %9369 = vrcp.f32 %v5150_v1 }
0x1101   :  { %v9358_v60 = vpop.eup %9357  ;;  %v5156_v28 = vpop.xlane.xlu1 %5155  ;;  %v5761_v39 = vsel %vm4077_vm4, %v9356_v14, 0.0 }
0x1102   :  { %v9360_v17 = vpop.eup %9359  ;;  %5762 = vadd.xlane.f32.xlu1 %v5761_v39  ;;  %8667 = vmatprep.mubr.msk.f32.mxu0 %vm4077_vm4, %v9358_v60  ;;  %v5153_v50 = vpop.xlane.xlu0 %5152  ;;  %v5758_v36 = vsel %vm4077_vm4, %v9358_v60, 0.0 }
0x1103   :  { %v9362_v15 = vpop.eup %9361  ;;  %9371 = vrcp.f32 %v5153_v50  ;;  %8668 = vmatmul.mubr.msk.f32.gmra.mrb[154].mxu0 %vm4077_vm4, %v9356_v14  ;;  %5759 = vadd.xlane.f32.xlu0 %v5758_v36  ;;  %v5295_v13 = vmul.f32 %v9360_v17, %v11456_v52 }
0x1104   :  { %9373 = vrcp.f32 %v5156_v28  ;;  %v5294_v41 = vmul.f32 %v9362_v15, %v11458_v40 }
0x1105   :  { %v9364_v8 = vpop.eup %9363  ;;  %v4131_v23 = vpop.xlane.xlu1 %4130 }
0x1106   :  { %v9366_v31 = vpop.eup %9365  ;;  %8614 = vmatprep.mubr.msk.f32.mxu1 %vm840_vm1, %v5294_v41  ;;  %4479 = vadd.xlane.f32.xlu1 %v4478_v49  ;;  %v4128_v37 = vpop.xlane.xlu0 %4127  ;;  %v5296_v26 = vmul.f32 %v9364_v8, %v11462_v18 }
0x1107   :  { %8615 = vmatmul.mubr.msk.f32.vlgmr.msra.gmra.mrb[124].mxu1 %vm840_vm1, %v5295_v13  ;;  %9375 = vrcp.f32 %v4128_v37  ;;  %4476 = vadd.xlane.f32.xlu0 %v4475_v11  ;;  %v5297_v40 = vmul.f32 %v9366_v31, %v11460_v34 }
0x1108   :  { %9377 = vrcp.f32 %v4131_v23  ;;  %8617 = vmatprep.mubr.msk.f32.mxu1 %vm840_vm1, %v5296_v26  ;;  %9021 = vmatpush3.bf16.msra.mxu1 %v11545_v62 }
0x1109   :  { %v9368_v43 = vpop.eup %9367  ;;  %v4137_v52 = vpop.xlane.xlu1 %4136  ;;  %9023 = vmatprep.subr.bf16.mxu1 %v11531_v30 }
0x110a   :  { %v9370_v10 = vpop.eup %9369  ;;  %4485 = vadd.xlane.f32.xlu1 %v4484_v16  ;;  %v4134_v18 = vpop.xlane.xlu0 %4133  ;;  %v5298_v22 = vmul.f32 %v9368_v43, %v11466_v19 }
0x110b   :  { %8618 = vmatmul.mubr.msk.f32.gmra.mrb[126].mxu1 %vm840_vm1, %v5297_v40  ;;  %9379 = vrcp.f32 %v4134_v18  ;;  %4482 = vadd.xlane.f32.xlu0 %v4481_v0  ;;  %v5299_v55 = vmul.f32 %v9370_v10, %v11464_v5 }
0x110c   :  { %9381 = vrcp.f32 %v4137_v52  ;;  %8620 = vmatprep.mubr.msk.f32.mxu1 %vm840_vm1, %v5298_v22 }
0x110d   :  { %v9372_v34 = vpop.eup %9371  ;;  %v4143_v51 = vpop.xlane.xlu1 %4142 }
0x110e   :  { %v9374_v56 = vpop.eup %9373  ;;  %4491 = vadd.xlane.f32.xlu1 %v4490_v7  ;;  %v4140_v12 = vpop.xlane.xlu0 %4139  ;;  %v5300_v19 = vmul.f32 %v9372_v34, %v11470_v38 }
0x110f   :  { %8621 = vmatmul.mubr.msk.f32.gmra.mrb[128].mxu1 %vm840_vm1, %v5299_v55  ;;  %9383 = vrcp.f32 %v4140_v12  ;;  %4488 = vadd.xlane.f32.xlu0 %v4487_v57  ;;  %v5301_v25 = vmul.f32 %v9374_v56, %v11468_v42 }
0x1110   :  { %9385 = vrcp.f32 %v4143_v51  ;;  %8623 = vmatprep.mubr.msk.f32.mxu1 %vm840_vm1, %v5300_v19 }
0x1111   :  { %v9376_v2 = vpop.eup %9375  ;;  %v4149_v5 = vpop.xlane.xlu1 %4148 }
0x1112   :  { %v9378_v45 = vpop.eup %9377  ;;  %4497 = vadd.xlane.f32.xlu1 %v4496_v21  ;;  %v4146_v47 = vpop.xlane.xlu0 %4145  ;;  %v4287_v38 = vmul.f32 %v9376_v2, %v11365_v3 }
0x1113   :  { %8624 = vmatmul.mubr.msk.f32.gmra.mrb[130].mxu1 %vm840_vm1, %v5301_v25  ;;  %9387 = vrcp.f32 %v4146_v47  ;;  %4494 = vadd.xlane.f32.xlu0 %v4493_v6  ;;  %v4288_v42 = vmul.f32 %v9378_v45, %v11363_v46 }
0x1114   :  { %9389 = vrcp.f32 %v4149_v5  ;;  %8630 = vmatprep.mubr.msk.f32.mxu1 %vm840_vm1, %v4287_v38 }
0x1115   :  { %v9380_v35 = vpop.eup %9379 }
0x1116   :  { %v9382_v1 = vpop.eup %9381  ;;  %v4289_v61 = vmul.f32 %v9380_v35, %v11369_v63 }
0x1117   :  { %8631 = vmatmul.mubr.msk.f32.vlgmr.msra.gmra.mrb[124].mxu1 %vm840_vm1, %v4288_v42  ;;  %v4290_v3 = vmul.f32 %v9382_v1, %v11367_v24 }
0x1118   :  { %8633 = vmatprep.mubr.msk.f32.mxu1 %vm840_vm1, %v4289_v61  ;;  %9025 = vmatpush3.bf16.msra.mxu1 %v11531_v30 }
0x1119   :  { %v9384_v58 = vpop.eup %9383  ;;  %9027 = vmatprep.subr.bf16.mxu1 %v11545_v62 }
0x111a   :  { %v9386_v27 = vpop.eup %9385  ;;  %v4291_v9 = vmul.f32 %v9384_v58, %v11373_v20 }
0x111b   :  { %8634 = vmatmul.mubr.msk.f32.gmra.mrb[126].mxu1 %vm840_vm1, %v4290_v3  ;;  %v4292_v63 = vmul.f32 %v9386_v27, %v11371_v44  ;;  %v12348_v3 = vld [vmem:[#allocation18_spill] sm:$0xff] }
0x111c   :  { %8636 = vmatprep.mubr.msk.f32.mxu1 %vm840_vm1, %v4291_v9  ;;  %v12349_v9 = vld [vmem:[#allocation20_spill] sm:$0xff] }
0x111d   :  { %v9388_v46 = vpop.eup %9387 }
0x111e   :  { %v9390_v59 = vpop.eup %9389  ;;  %v4293_v14 = vmul.f32 %v9388_v46, %v11377_v32  ;;  %v11649_v46 = vld [vmem:[%s12257_s15] ss:$0 sm:$0xff] }
0x111f   :  { %8637 = vmatmul.mubr.msk.f32.gmra.mrb[128].mxu1 %vm840_vm1, %v4292_v63  ;;  %v4294_v24 = vmul.f32 %v9390_v59, %v11375_v33 }
0x1120   :  { %8639 = vmatprep.mubr.msk.f32.mxu1 %vm840_vm1, %v4293_v14 }
0x1123   :  { %8640 = vmatmul.mubr.msk.f32.gmra.mrb[130].mxu1 %vm840_vm1, %v4294_v24 }
0x1183   :  { %v5745_v20 = vpop.xlane.xlu1 %5744 }
0x1184   :  { %v5742_v30 = vpop.xlane.xlu0 %5741 }
0x1185   :  { %9391 = vrcp.f32 %v5742_v30  ;;  %v12351_v30 = vld [vmem:[#allocation2_spill] sm:$0xff] }
0x1186   :  { %9393 = vrcp.f32 %v5745_v20 }
0x1187   :  { %v5751_v28 = vpop.xlane.xlu1 %5750 }
0x1188   :  { %v5748_v60 = vpop.xlane.xlu0 %5747 }
0x1189   :  { %9395 = vrcp.f32 %v5748_v60  ;;  %v12352_v60 = vld [vmem:[#allocation4_spill] sm:$0xff] }
0x118a   :  { %9397 = vrcp.f32 %v5751_v28 }
0x118b   :  { %v5757_v17 = vpop.xlane.xlu1 %5756 }
0x118c   :  { %v5754_v39 = vpop.xlane.xlu0 %5753 }
0x118d   :  { %9399 = vrcp.f32 %v5754_v39 }
0x118e   :  { %9401 = vrcp.f32 %v5757_v17 }
0x118f   :  { %v5763_v44 = vpop.xlane.xlu1 %5762  ;;  %v9392_v41 = vpop.eup %9391 }
0x1190   :  { %v5760_v50 = vpop.xlane.xlu0 %5759  ;;  %v9394_v13 = vpop.eup %9393 }
0x1191   :  { %9403 = vrcp.f32 %v5760_v50 }
0x1193   :  { %v4480_v32 = vpop.xlane.xlu1 %4479  ;;  %v9396_v11 = vpop.eup %9395 }
0x1194   :  { %v4477_v36 = vpop.xlane.xlu0 %4476  ;;  %v9398_v43 = vpop.eup %9397 }
0x1195   :  { %9405 = vrcp.f32 %v4477_v36 }
0x1196   :  { %9407 = vrcp.f32 %v5763_v44 }
0x1197   :  { %v4486_v49 = vpop.xlane.xlu1 %4485  ;;  %9409 = vrcp.f32 %v4480_v32  ;;  %v9400_v18 = vpop.eup %9399 }
0x1198   :  { %v4483_v15 = vpop.xlane.xlu0 %4482  ;;  %v9402_v34 = vpop.eup %9401 }
0x1199   :  { %9411 = vrcp.f32 %v4483_v15  ;;  %v12353_v15 = vld [vmem:[#allocation3_spill] sm:$0xff] }
0x119a   :  { %9413 = vrcp.f32 %v4486_v49 }
0x119b   :  { %v4492_v0 = vpop.xlane.xlu1 %4491  ;;  %v9404_v7 = vpop.eup %9403 }
0x119c   :  { %v4489_v52 = vpop.xlane.xlu0 %4488 }
0x119d   :  { %9415 = vrcp.f32 %v4489_v52  ;;  %v12356_v52 = vld [vmem:[#allocation8_spill] sm:$0xff] }
0x119e   :  { %9417 = vrcp.f32 %v4492_v0 }
0x119f   :  { %v4498_v5 = vpop.xlane.xlu1 %4497 }
0x11a0   :  { %v4495_v56 = vpop.xlane.xlu0 %4494 }
0x11a1   :  { %9419 = vrcp.f32 %v4495_v56 }
0x11a2   :  { %9421 = vrcp.f32 %v4498_v5 }
0x11ca   :  { %v8660_v33 = vpop.f32.mrb[148].mxu0 }
0x11cb   :  { %v5854_v8 = vpop.f32.mrb[149].mxu0  ;;  %v5902_v31 = vmul.f32 %v9394_v13, %v8660_v33 }
0x11cc   :  { %v5901_v23 = vmul.f32 %v9392_v41, %v5854_v8  ;;  %v12354_v41 = vld [vmem:[#allocation6_spill] sm:$0xff] }
0x11ce   :  { %v8663_v37 = vpop.f32.mrb[150].mxu0  ;;  %8674 = vmatprep.mubr.msk.f32.mxu1 %vm840_vm1, %v5901_v23 }
0x11cf   :  { %v5864_v26 = vpop.f32.mrb[151].mxu0  ;;  %8675 = vmatmul.mubr.msk.f32.vlgmr.msra.gmra.mrb[132].mxu1 %vm840_vm1, %v5902_v31  ;;  %v5904_v16 = vmul.f32 %v9398_v43, %v8663_v37 }
0x11d0   :  { %v5903_v40 = vmul.f32 %v9396_v11, %v5864_v26  ;;  %9029 = vmatpush3.bf16.msra.mxu1 %v11545_v62  ;;  %v9406_v62 = vpop.eup %9405  ;;  %v12355_v26 = vld [vmem:[#allocation5_spill] sm:$0xff] }
0x11d1   :  { %v9408_v19 = vpop.eup %9407  ;;  %v4636_v45 = vmul.f32 %v9406_v62, %v11381_v29 }
0x11d2   :  { %v8666_v10 = vpop.f32.mrb[152].mxu0  ;;  %8677 = vmatprep.mubr.msk.f32.mxu1 %vm840_vm1, %v5903_v40  ;;  %v9410_v21 = vpop.eup %9409 }
0x11d3   :  { %v5874_v22 = vpop.f32.mrb[153].mxu0  ;;  %8678 = vmatmul.mubr.msk.f32.gmra.mrb[134].mxu1 %vm840_vm1, %v5904_v16  ;;  %v5906_v55 = vmul.f32 %v9402_v34, %v8666_v10  ;;  %v9412_v47 = vpop.eup %9411  ;;  %v4637_v6 = vmul.f32 %v9410_v21, %v11379_v48 }
0x11d4   :  { %v5905_v51 = vmul.f32 %v9400_v18, %v5874_v22  ;;  %v9414_v38 = vpop.eup %9413  ;;  %v4638_v35 = vmul.f32 %v9412_v47, %v11385_v53 }
0x11d5   :  { %v9416_v42 = vpop.eup %9415  ;;  %v4639_v1 = vmul.f32 %v9414_v38, %v11383_v4  ;;  %v12350_v4 = vld [vmem:[#allocation19_spill] sm:$0xff] }
0x11d6   :  { %v8669_v12 = vpop.f32.mrb[154].mxu0  ;;  %8680 = vmatprep.mubr.msk.f32.mxu1 %vm840_vm1, %v5905_v51  ;;  %v9418_v61 = vpop.eup %9417  ;;  %v4640_v29 = vmul.f32 %v9416_v42, %v11389_v54  ;;  %v12357_v51 = vld [vmem:[#allocation7_spill] sm:$0xff] }
0x11d7   :  { %v5884_v57 = vpop.f32.mrb[155].mxu0  ;;  %8681 = vmatmul.mubr.msk.f32.gmra.mrb[136].mxu1 %vm840_vm1, %v5906_v55  ;;  %v5908_v25 = vmul.f32 %v9408_v19, %v8669_v12  ;;  %v9420_v58 = vpop.eup %9419  ;;  %v4641_v48 = vmul.f32 %v9418_v61, %v12348_v3 }
0x11d8   :  { %v5907_v2 = vmul.f32 %v9404_v7, %v5884_v57  ;;  %v9422_v27 = vpop.eup %9421  ;;  %v4642_v53 = vmul.f32 %v9420_v58, %v12349_v9  ;;  %v12358_v7 = vld [vmem:[#allocation10_spill] sm:$0xff] }
0x11d9   :  { %v4643_v54 = vmul.f32 %v9422_v27, %v12350_v4  ;;  %v12361_v27 = vld [vmem:[#allocation12_spill] sm:$0xff] }
0x11da   :  { %8683 = vmatprep.mubr.msk.f32.mxu1 %vm840_vm1, %v5907_v2 }
0x11db   :  { %8684 = vmatmul.mubr.msk.f32.gmra.mrb[138].mxu1 %vm840_vm1, %v5908_v25 }
0x11dc   :  { %8690 = vmatprep.mubr.msk.f32.mxu1 %vm840_vm1, %v4636_v45  ;;  %v12359_v45 = vld [vmem:[#allocation9_spill] sm:$0xff] }
0x11df   :  { %8691 = vmatmul.mubr.msk.f32.vlgmr.msra.gmra.mrb[132].mxu1 %vm840_vm1, %v4637_v6  ;;  %v12360_v6 = vld [vmem:[#allocation11_spill] sm:$0xff] }
0x11e0   :  { %8693 = vmatprep.mubr.msk.f32.mxu1 %vm840_vm1, %v4638_v35 }
0x11e3   :  { %8694 = vmatmul.mubr.msk.f32.gmra.mrb[134].mxu1 %vm840_vm1, %v4639_v1 }
0x11e4   :  { %8696 = vmatprep.mubr.msk.f32.mxu1 %vm840_vm1, %v4640_v29 }
0x11e7   :  { %8697 = vmatmul.mubr.msk.f32.gmra.mrb[136].mxu1 %vm840_vm1, %v4641_v48 }
0x11e8   :  { %8699 = vmatprep.mubr.msk.f32.mxu1 %vm840_vm1, %v4642_v53  ;;  %v12362_v53 = vld [vmem:[#allocation13_spill] sm:$0xff] }
0x11ea   :  { %v8632_v63 = vpop.f32.mrb[124].mxu1 }
0x11eb   :  { %v6175_v59 = vadd.f32 %v8632_v63, %v11649_v46  ;;  %v5521_v14 = vpop.f32.mrb[125].mxu1  ;;  %8700 = vmatmul.mubr.msk.f32.gmra.mrb[138].mxu1 %vm840_vm1, %v4643_v54 }
0x11ec   :  { %v6174_v24 = vadd.f32 %v11649_v46, %v5521_v14 }
0x11ed   :  { %v11657_v20 = vadd.f32 %v6175_v59, %v12351_v30 }
0x11ee   :  { %v11660_v28 = vadd.f32 %v6174_v24, %v12352_v60  ;;  %v8635_v39 = vpop.f32.mrb[126].mxu1 }
0x11ef   :  { %v6177_v17 = vadd.f32 %v8635_v39, %v11649_v46  ;;  %v5531_v50 = vpop.f32.mrb[127].mxu1  ;;  %v6211_v44 = vsel %vm89_vm0, %v11657_v20, 0.0 }
0x11f0   :  { %v6176_v36 = vadd.f32 %v11649_v46, %v5531_v50  ;;  %6212 = vadd.xlane.f32.xlu1 %v6211_v44  ;;  %v6208_v32 = vsel %vm89_vm0, %v11660_v28, 0.0 }
0x11f1   :  { %v11669_v33 = vadd.f32 %v6177_v17, %v12353_v15  ;;  %6209 = vadd.xlane.f32.xlu0 %v6208_v32  ;;  %v12363_v17 = vld [vmem:[#allocation14_spill] sm:$0xff] }
0x11f2   :  { %v11672_v8 = vadd.f32 %v6176_v36, %v12354_v41  ;;  %v8638_v13 = vpop.f32.mrb[128].mxu1  ;;  %v12364_v36 = vld [vmem:[#allocation15_spill] sm:$0xff] }
0x11f3   :  { %v6179_v23 = vadd.f32 %v8638_v13, %v11649_v46  ;;  %v5541_v49 = vpop.f32.mrb[129].mxu1  ;;  %v6217_v31 = vsel %vm89_vm0, %v11669_v33, 0.0 }
0x11f4   :  { %v6178_v37 = vadd.f32 %v11649_v46, %v5541_v49  ;;  %6218 = vadd.xlane.f32.xlu1 %v6217_v31  ;;  %v6214_v11 = vsel %vm89_vm0, %v11672_v8, 0.0 }
0x11f5   :  { %v11681_v43 = vadd.f32 %v6179_v23, %v12355_v26  ;;  %6215 = vadd.xlane.f32.xlu0 %v6214_v11 }
0x11f6   :  { %v11684_v40 = vadd.f32 %v6178_v37, %v12356_v52  ;;  %v8641_v16 = vpop.f32.mrb[130].mxu1 }
0x11f7   :  { %v6181_v10 = vadd.f32 %v8641_v16, %v11649_v46  ;;  %v5551_v18 = vpop.f32.mrb[131].mxu1  ;;  %v6223_v0 = vsel %vm89_vm0, %v11681_v43, 0.0 }
0x11f8   :  { %v6180_v22 = vadd.f32 %v11649_v46, %v5551_v18  ;;  %6224 = vadd.xlane.f32.xlu1 %v6223_v0  ;;  %v6220_v34 = vsel %vm89_vm0, %v11684_v40, 0.0  ;;  %v12366_v0 = vld [vmem:[#allocation17_spill] sm:$0xff] }
0x11f9   :  { %v11693_v55 = vadd.f32 %v6181_v10, %v12357_v51  ;;  %6221 = vadd.xlane.f32.xlu0 %v6220_v34  ;;  %v12365_v10 = vld [vmem:[#allocation16_spill] sm:$0xff] }
0x11fa   :  { %v11696_v56 = vadd.f32 %v6180_v22, %v12358_v7 }
0x11fb   :  { %v6229_v12 = vsel %vm89_vm0, %v11693_v55, 0.0 }
0x11fc   :  { %6230 = vadd.xlane.f32.xlu1 %v6229_v12  ;;  %v6226_v62 = vsel %vm89_vm0, %v11696_v56, 0.0 }
0x11fd   :  { %6227 = vadd.xlane.f32.xlu0 %v6226_v62 }
0x127d   :  { %v6213_v57 = vpop.xlane.xlu1 %6212 }
0x127e   :  { %v6210_v2 = vpop.xlane.xlu0 %6209  ;;  %v6257_v63 = vmul.f32 0.03125, %v6213_v57 }
0x127f   :  { %v6256_v30 = vmul.f32 0.03125, %v6210_v2 }
0x1280   :  { %v11735_v41 = vsub.f32 %v11657_v20, %v6257_v63 }
0x1281   :  { %v6219_v29 = vpop.xlane.xlu1 %6218  ;;  %v11741_v11 = vsub.f32 %v11660_v28, %v6256_v30 }
0x1282   :  { %v6216_v48 = vpop.xlane.xlu0 %6215  ;;  %v6259_v13 = vmul.f32 0.03125, %v6219_v29 }
0x1283   :  { %v6258_v26 = vmul.f32 0.03125, %v6216_v48  ;;  %v6288_v2 = vmul.f32 %v11741_v11, %v11741_v11 }
0x1284   :  { %v11753_v34 = vsub.f32 %v11669_v33, %v6259_v13  ;;  %v6465_v13 = vld [vmem:[%s12258_s18 + $0x28] sm:$0xff] }
0x1285   :  { %v6225_v44 = vpop.xlane.xlu1 %6224  ;;  %v11760_v12 = vsub.f32 %v11672_v8, %v6258_v26 }
0x1286   :  { %v6222_v23 = vpop.xlane.xlu0 %6221  ;;  %v6261_v51 = vmul.f32 0.03125, %v6225_v44  ;;  %v6460_v44 = vld [vmem:[%s12258_s18] sm:$0xff] }
0x1287   :  { %v6260_v62 = vmul.f32 0.03125, %v6222_v23  ;;  %v6467_v23 = vld [vmem:[%s12258_s18 + $0x38] sm:$0xff] }
0x1289   :  { %v6231_v57 = vpop.xlane.xlu1 %6230 }
0x12b2   :  { %v8692_v19 = vpop.f32.mrb[132].mxu1 }
0x12b3   :  { %v6183_v5 = vadd.f32 %v8692_v19, %v11649_v46  ;;  %v6128_v25 = vpop.f32.mrb[133].mxu1 }
0x12b4   :  { %v6182_v21 = vadd.f32 %v11649_v46, %v6128_v25  ;;  %v11767_v25 = vsub.f32 %v11681_v43, %v6261_v51 }
0x12b5   :  { %v11705_v47 = vadd.f32 %v6183_v5, %v12359_v45  ;;  %v6228_v5 = vpop.xlane.xlu0 %6227 }
0x12b6   :  { %v11708_v38 = vadd.f32 %v6182_v21, %v12360_v6  ;;  %v8695_v35 = vpop.f32.mrb[134].mxu1  ;;  %v6263_v21 = vmul.f32 0.03125, %v6231_v57  ;;  %v6291_v6 = vmul.f32 %v11753_v34, %v11753_v34 }
0x12b7   :  { %v6185_v42 = vadd.f32 %v8695_v35, %v11649_v46  ;;  %v6138_v1 = vpop.f32.mrb[135].mxu1  ;;  %v6235_v61 = vsel %vm89_vm0, %v11705_v47, 0.0  ;;  %v11773_v35 = vsub.f32 %v11684_v40, %v6260_v62 }
0x12b8   :  { %v6184_v58 = vadd.f32 %v11649_v46, %v6138_v1  ;;  %6236 = vadd.xlane.f32.xlu1 %v6235_v61  ;;  %v6232_v3 = vsel %vm89_vm0, %v11708_v38, 0.0  ;;  %v6304_v1 = vsel %vm89_vm0, %v6288_v2, 0.0  ;;  %v6290_v61 = vmul.f32 %v11760_v12, %v11760_v12 }
0x12b9   :  { %v11717_v9 = vadd.f32 %v6185_v42, %v12361_v27  ;;  %6233 = vadd.xlane.f32.xlu0 %v6232_v3  ;;  %v6262_v42 = vmul.f32 0.03125, %v6228_v5  ;;  %v11779_v29 = vsub.f32 %v11693_v55, %v6263_v21  ;;  %v6293_v3 = vmul.f32 %v11767_v25, %v11767_v25 }
0x12ba   :  { %v11720_v4 = vadd.f32 %v6184_v58, %v12362_v53  ;;  %v8698_v54 = vpop.f32.mrb[136].mxu1  ;;  %v6313_v58 = vsel %vm89_vm0, %v6291_v6, 0.0  ;;  %v6310_v27 = vsel %vm89_vm0, %v6290_v61, 0.0  ;;  %v6292_v53 = vmul.f32 %v11773_v35, %v11773_v35 }
0x12bb   :  { %v6187_v59 = vadd.f32 %v8698_v54, %v11649_v46  ;;  %v6148_v14 = vpop.f32.mrb[137].mxu1  ;;  %v6241_v24 = vsel %vm89_vm0, %v11717_v9, 0.0  ;;  %v11785_v48 = vsub.f32 %v11696_v56, %v6262_v42  ;;  %v6319_v54 = vsel %vm89_vm0, %v6293_v3, 0.0 }
0x12bc   :  { %v6186_v60 = vadd.f32 %v11649_v46, %v6148_v14  ;;  %6242 = vadd.xlane.f32.xlu1 %v6241_v24  ;;  %v6238_v39 = vsel %vm89_vm0, %v11720_v4, 0.0  ;;  %v6295_v63 = vmul.f32 %v11779_v29, %v11779_v29 }
0x12bd   :  { %v11729_v50 = vadd.f32 %v6187_v59, %v12363_v17  ;;  %6239 = vadd.xlane.f32.xlu0 %v6238_v39  ;;  %v6316_v59 = vsel %vm89_vm0, %v6292_v53, 0.0  ;;  %v6294_v14 = vmul.f32 %v11785_v48, %v11785_v48  ;;  %v6463_v39 = vld [vmem:[%s12258_s18 + $0x18] sm:$0xff] }
0x12be   :  { %v11732_v32 = vadd.f32 %v6186_v60, %v12364_v36  ;;  %v8701_v15 = vpop.f32.mrb[138].mxu1  ;;  %v6325_v24 = vsel %vm89_vm0, %v6295_v63, 0.0  ;;  %v6461_v60 = vld [vmem:[%s12258_s18 + $0x8] sm:$0xff]  ;;  %v6462_v36 = vld [vmem:[%s12258_s18 + $0x10] sm:$0xff] }
0x12bf   :  { %v6189_v49 = vadd.f32 %v8701_v15, %v11649_v46  ;;  %v6158_v31 = vpop.f32.mrb[139].mxu1  ;;  %v6247_v37 = vsel %vm89_vm0, %v11729_v50, 0.0  ;;  %v6322_v30 = vsel %vm89_vm0, %v6294_v14, 0.0  ;;  %v9030_v17 = vpack.c.bf16 %v6463_v39, %v6461_v60 }
0x12c0   :  { %v6188_v52 = vadd.f32 %v11649_v46, %v6158_v31  ;;  %6248 = vadd.xlane.f32.xlu1 %v6247_v37  ;;  %v6244_v16 = vsel %vm89_vm0, %v11732_v32, 0.0  ;;  %v6289_v46 = vmul.f32 %v11735_v41, %v11735_v41  ;;  %v9032_v15 = vpack.c.bf16 %v6462_v36, %v6460_v44  ;;  %v6464_v31 = vld [vmem:[%s12258_s18 + $0x20] sm:$0xff]  ;;  %v6466_v37 = vld [vmem:[%s12258_s18 + $0x30] sm:$0xff] }
0x12c1   :  { %v11747_v18 = vadd.f32 %v6189_v49, %v12365_v10  ;;  %6245 = vadd.xlane.f32.xlu0 %v6244_v16  ;;  %9031 = vmatprep.subr.bf16.mxu0 %v9030_v17  ;;  %v9034_v49 = vpack.c.bf16 %v6467_v23, %v6465_v13  ;;  %v9036_v26 = vpack.c.bf16 %v6466_v37, %v6464_v31 }
0x12c2   :  { %v11750_v22 = vadd.f32 %v6188_v52, %v12366_v0  ;;  %v6307_v45 = vsel %vm89_vm0, %v6289_v46, 0.0  ;;  %9033 = vmatpush1.bf16.msra.mxu0 %v9032_v15  ;;  %v9503_v52 = vmov 0.0  }
0x12c3   :  { %v6253_v7 = vsel %vm89_vm0, %v11747_v18, 0.0  ;;  %9035 = vmatprep.subr.bf16.mxu0 %v9034_v49  ;;  %6592 = vmatprep.mubr.f32.mxu0 %v9503_v52 }
0x12c4   :  { %6254 = vadd.xlane.f32.xlu1 %v6253_v7  ;;  %v6250_v19 = vsel %vm89_vm0, %v11750_v22, 0.0 }
0x12c5   :  { %6251 = vadd.xlane.f32.xlu0 %v6250_v19 }
0x12c6   :  { %9037 = vmatpush1.bf16.msra.mxu0 %v9036_v26 }
0x12c8   :  { %6308 = vadd.xlane.f32.xlu1 %v6307_v45 }
0x12c9   :  { %6305 = vadd.xlane.f32.xlu0 %v6304_v1 }
0x12cc   :  { %6314 = vadd.xlane.f32.xlu1 %v6313_v58 }
0x12cd   :  { %6311 = vadd.xlane.f32.xlu0 %v6310_v27 }
0x12d0   :  { %6320 = vadd.xlane.f32.xlu1 %v6319_v54 }
0x12d1   :  { %6317 = vadd.xlane.f32.xlu0 %v6316_v59 }
0x12d4   :  { %6326 = vadd.xlane.f32.xlu1 %v6325_v24 }
0x12d5   :  { %6323 = vadd.xlane.f32.xlu0 %v6322_v30 }
0x1345   :  { %v6237_v16 = vpop.xlane.xlu1 %6236 }
0x1346   :  { %v6265_v10 = vmul.f32 0.03125, %v6237_v16  ;;  %v6234_v0 = vpop.xlane.xlu0 %6233 }
0x1347   :  { %v6264_v51 = vmul.f32 0.03125, %v6234_v0 }
0x1348   :  { %v11824_v7 = vsub.f32 %v11705_v47, %v6265_v10 }
0x1349   :  { %v11827_v46 = vsub.f32 %v11708_v38, %v6264_v51  ;;  %v6243_v62 = vpop.xlane.xlu1 %6242 }
0x134a   :  { %v6267_v57 = vmul.f32 0.03125, %v6243_v62  ;;  %v6240_v19 = vpop.xlane.xlu0 %6239  ;;  %v6297_v2 = vmul.f32 %v11824_v7, %v11824_v7 }
0x134b   :  { %v6266_v5 = vmul.f32 0.03125, %v6240_v19  ;;  %v6296_v21 = vmul.f32 %v11827_v46, %v11827_v46 }
0x134c   :  { %v11834_v45 = vsub.f32 %v11717_v9, %v6267_v57  ;;  %v6331_v6 = vsel %vm89_vm0, %v6297_v2, 0.0 }
0x134d   :  { %v11838_v42 = vsub.f32 %v11720_v4, %v6266_v5  ;;  %v6249_v1 = vpop.xlane.xlu1 %6248  ;;  %6332 = vadd.xlane.f32.xlu1 %v6331_v6  ;;  %v6328_v61 = vsel %vm89_vm0, %v6296_v21, 0.0 }
0x134e   :  { %v6269_v58 = vmul.f32 0.03125, %v6249_v1  ;;  %6329 = vadd.xlane.f32.xlu0 %v6328_v61  ;;  %v6246_v3 = vpop.xlane.xlu0 %6245  ;;  %v6299_v27 = vmul.f32 %v11834_v45, %v11834_v45 }
0x134f   :  { %v6268_v53 = vmul.f32 0.03125, %v6246_v3  ;;  %v6298_v54 = vmul.f32 %v11838_v42, %v11838_v42 }
0x1350   :  { %v11846_v63 = vsub.f32 %v11729_v50, %v6269_v58  ;;  %v6337_v59 = vsel %vm89_vm0, %v6299_v27, 0.0 }
0x1351   :  { %v11850_v14 = vsub.f32 %v11732_v32, %v6268_v53  ;;  %6338 = vadd.xlane.f32.xlu1 %v6337_v59  ;;  %v6255_v24 = vpop.xlane.xlu1 %6254  ;;  %v6334_v30 = vsel %vm89_vm0, %v6298_v54, 0.0 }
0x1352   :  { %v6271_v60 = vmul.f32 0.03125, %v6255_v24  ;;  %6335 = vadd.xlane.f32.xlu0 %v6334_v30  ;;  %v6252_v39 = vpop.xlane.xlu0 %6251  ;;  %v6301_v17 = vmul.f32 %v11846_v63, %v11846_v63 }
0x1353   :  { %v6270_v44 = vmul.f32 0.03125, %v6252_v39  ;;  %v6300_v36 = vmul.f32 %v11850_v14, %v11850_v14 }
0x1354   :  { %v11858_v15 = vsub.f32 %v11747_v18, %v6271_v60  ;;  %v6343_v13 = vsel %vm89_vm0, %v6301_v17, 0.0  ;;  %v11874_v60 = vld [vmem:[%s12259_s16] ss:$0 sm:$0xff] }
0x1355   :  { %v11862_v23 = vsub.f32 %v11750_v22, %v6270_v44  ;;  %6344 = vadd.xlane.f32.xlu1 %v6343_v13  ;;  %v6309_v49 = vpop.xlane.xlu1 %6308  ;;  %v6340_v31 = vsel %vm89_vm0, %v6300_v36, 0.0 }
0x1356   :  { %v6353_v37 = vmul.f32 0.03125, %v6309_v49  ;;  %6341 = vadd.xlane.f32.xlu0 %v6340_v31  ;;  %v6306_v26 = vpop.xlane.xlu0 %6305  ;;  %v6303_v16 = vmul.f32 %v11858_v15, %v11858_v15  ;;  %v11881_v49 = vld [vmem:[%s12260_s17] ss:$0 sm:$0xff] }
0x1357   :  { %v6352_v10 = vmul.f32 0.03125, %v6306_v26  ;;  %v6302_v0 = vmul.f32 %v11862_v23, %v11862_v23 }
0x1358   :  { %v6369_v51 = vadd.f32 1e-05, %v6353_v37  ;;  %v6349_v62 = vsel %vm89_vm0, %v6303_v16, 0.0 }
0x1359   :  { %v6368_v57 = vadd.f32 1e-05, %v6352_v10  ;;  %6350 = vadd.xlane.f32.xlu1 %v6349_v62  ;;  %v6315_v19 = vpop.xlane.xlu1 %6314  ;;  %v6346_v2 = vsel %vm89_vm0, %v6302_v0, 0.0 }
0x135a   :  { %9423 = vrsqrt.f32 %v6369_v51  ;;  %v6355_v5 = vmul.f32 0.03125, %v6315_v19  ;;  %6347 = vadd.xlane.f32.xlu0 %v6346_v2  ;;  %v6312_v21 = vpop.xlane.xlu0 %6311 }
0x135b   :  { %9425 = vrsqrt.f32 %v6368_v57  ;;  %v6354_v6 = vmul.f32 0.03125, %v6312_v21 }
0x135c   :  { %v6371_v1 = vadd.f32 1e-05, %v6355_v5 }
0x135d   :  { %v6370_v61 = vadd.f32 1e-05, %v6354_v6  ;;  %v6321_v58 = vpop.xlane.xlu1 %6320 }
0x135e   :  { %v6318_v3 = vpop.xlane.xlu0 %6317  ;;  %v6357_v53 = vmul.f32 0.03125, %v6321_v58 }
0x135f   :  { %9427 = vrsqrt.f32 %v6370_v61  ;;  %v6356_v27 = vmul.f32 0.03125, %v6318_v3 }
0x1360   :  { %9429 = vrsqrt.f32 %v6371_v1  ;;  %v6373_v39 = vadd.f32 1e-05, %v6357_v53 }
0x1361   :  { %v6372_v54 = vadd.f32 1e-05, %v6356_v27  ;;  %v6327_v36 = vpop.xlane.xlu1 %6326 }
0x1362   :  { %v6324_v59 = vpop.xlane.xlu0 %6323  ;;  %v6359_v26 = vmul.f32 0.03125, %v6327_v36  ;;  %v6852_v36 = vld [vmem:[%s12261_s20 + $0x18] sm:$0xff] }
0x1363   :  { %9431 = vrsqrt.f32 %v6372_v54  ;;  %v6358_v17 = vmul.f32 0.03125, %v6324_v59 }
0x1364   :  { %v9424_v24 = vpop.eup %9423  ;;  %9433 = vrsqrt.f32 %v6373_v39  ;;  %v6850_v39 = vld [vmem:[%s12261_s20 + $0x8] sm:$0xff] }
0x1365   :  { %v9426_v30 = vpop.eup %9425  ;;  %v6401_v13 = vmul.f32 %v9424_v24, %v11735_v41  ;;  %v6374_v16 = vadd.f32 1e-05, %v6358_v17  ;;  %v6375_v41 = vadd.f32 1e-05, %v6359_v26 }
0x1366   :  { %v6400_v44 = vmul.f32 %v9426_v30, %v11741_v11 }
0x1367   :  { %v6423_v0 = vmul.f32 %v11874_v60, %v6401_v13  ;;  %9435 = vrsqrt.f32 %v6374_v16  ;;  %v6855_v16 = vld [vmem:[%s12261_s20 + $0x30] sm:$0xff] }
0x1368   :  { %v6422_v31 = vmul.f32 %v11874_v60, %v6400_v44  ;;  %9437 = vrsqrt.f32 %v6375_v41  ;;  %v6851_v44 = vld [vmem:[%s12261_s20 + $0x10] sm:$0xff] }
0x1369   :  { %v9428_v37 = vpop.eup %9427  ;;  %v6445_v62 = vadd.f32 %v11881_v49, %v6423_v0  ;;  %v9042_v13 = vpack.c.bf16 %v6852_v36, %v6851_v44 }
0x136a   :  { %v6444_v10 = vadd.f32 %v11881_v49, %v6422_v31  ;;  %v6402_v11 = vmul.f32 %v9428_v37, %v11760_v12  ;;  %v9430_v51 = vpop.eup %9429  ;;  %v6853_v31 = vld [vmem:[%s12261_s20 + $0x20] sm:$0xff]  ;;  %v6854_v37 = vld [vmem:[%s12261_s20 + $0x28] sm:$0xff] }
0x136b   :  { %v6403_v19 = vmul.f32 %v9430_v51, %v11753_v34  ;;  %v9046_v26 = vpack.c.bf16 %v6854_v37, %v6853_v31  ;;  %v6858_v51 = vld [vmem:[%s12261_s20 + $0x48] sm:$0xff] }
0x136c   :  { %7449 = vmatmul.mubr.msk.f32.vlgmr.msra.gmra.mrb[156].mxu0 %vm89_vm0, %v6444_v10  ;;  %v6424_v57 = vmul.f32 %v11874_v60, %v6402_v11  ;;  %v6856_v10 = vld [vmem:[%s12261_s20 + $0x38] sm:$0xff]  ;;  %v6857_v11 = vld [vmem:[%s12261_s20 + $0x40] sm:$0xff] }
0x136d   :  { %6598 = vmatprep.mubr.f32.mxu0 %v9503_v52  ;;  %v9432_v2 = vpop.eup %9431  ;;  %v6425_v5 = vmul.f32 %v11874_v60, %v6403_v19  ;;  %v9050_v0 = vpack.c.bf16 %v6856_v10, %v6855_v16  ;;  %v9054_v41 = vpack.c.bf16 %v6858_v51, %v6857_v11 }
0x136e   :  { %v6446_v12 = vadd.f32 %v11881_v49, %v6424_v57  ;;  %v6404_v21 = vmul.f32 %v9432_v2, %v11773_v35  ;;  %v9434_v6 = vpop.eup %9433  ;;  %v6860_v57 = vld [vmem:[%s12261_s20 + $0x58] sm:$0xff]  ;;  %v6861_v2 = vld [vmem:[%s12261_s20 + $0x60] sm:$0xff] }
0x136f   :  { %v6447_v1 = vadd.f32 %v11881_v49, %v6425_v5  ;;  %v6405_v61 = vmul.f32 %v9434_v6, %v11767_v25 }
0x1370   :  { %7450 = vmatmul.mubr.msk.f32.gmra.mrb[158].mxu0 %vm89_vm0, %v6445_v62  ;;  %v6426_v34 = vmul.f32 %v11874_v60, %v6404_v21  ;;  %v6859_v62 = vld [vmem:[%s12261_s20 + $0x50] sm:$0xff] }
0x1371   :  { %6604 = vmatprep.mubr.f32.mxu0 %v9503_v52  ;;  %v9436_v58 = vpop.eup %9435  ;;  %v6427_v35 = vmul.f32 %v11874_v60, %v6405_v61  ;;  %v9058_v19 = vpack.c.bf16 %v6860_v57, %v6859_v62 }
0x1372   :  { %v6448_v3 = vadd.f32 %v11881_v49, %v6426_v34  ;;  %v6406_v27 = vmul.f32 %v9436_v58, %v11785_v48  ;;  %v9438_v53 = vpop.eup %9437  ;;  %v6863_v58 = vld [vmem:[%s12261_s20 + $0x70] sm:$0xff] }
0x1373   :  { %v6449_v54 = vadd.f32 %v11881_v49, %v6427_v35  ;;  %v6407_v59 = vmul.f32 %v9438_v53, %v11779_v29  ;;  %v6849_v29 = vld [vmem:[%s12261_s20] sm:$0xff] }
0x1374   :  { %7451 = vmatmul.mubr.msk.f32.gmra.mrb[160].mxu0 %vm89_vm0, %v6446_v12  ;;  %v6428_v25 = vmul.f32 %v11874_v60, %v6406_v27  ;;  %v9038_v17 = vpack.c.bf16 %v6850_v39, %v6849_v29  ;;  %v6862_v12 = vld [vmem:[%s12261_s20 + $0x68] sm:$0xff] }
0x1375   :  { %6610 = vmatprep.mubr.f32.mxu0 %v9503_v52  ;;  %v6429_v30 = vmul.f32 %v11874_v60, %v6407_v59  ;;  %v9062_v21 = vpack.c.bf16 %v6862_v12, %v6861_v2 }
0x1376   :  { %v6450_v24 = vadd.f32 %v11881_v49, %v6428_v25  ;;  %9039 = vmatprep.subr.bf16.mxu1 %v9038_v17 }
0x1377   :  { %v6451_v48 = vadd.f32 %v11881_v49, %v6429_v30  ;;  %9041 = vmatpush3.bf16.msra.mxu1 %v9038_v17 }
0x1378   :  { %7452 = vmatmul.mubr.msk.f32.gmra.mrb[162].mxu0 %vm89_vm0, %v6447_v1  ;;  %9043 = vmatprep.subr.bf16.mxu1 %v9042_v13 }
0x1379   :  { %6616 = vmatprep.mubr.f32.mxu0 %v9503_v52 }
0x137b   :  { %9045 = vmatpush3.bf16.msra.mxu1 %v9042_v13 }
0x137c   :  { %7453 = vmatmul.mubr.msk.f32.gmra.mrb[164].mxu0 %vm89_vm0, %v6448_v3  ;;  %9047 = vmatprep.subr.bf16.mxu1 %v9046_v26  ;;  %v6864_v3 = vld [vmem:[%s12261_s20 + $0x78] sm:$0xff] }
0x137d   :  { %6622 = vmatprep.mubr.f32.mxu0 %v9503_v52  ;;  %v9066_v53 = vpack.c.bf16 %v6864_v3, %v6863_v58 }
0x137f   :  { %9049 = vmatpush3.bf16.msra.mxu1 %v9046_v26 }
0x1380   :  { %7454 = vmatmul.mubr.msk.f32.gmra.mrb[166].mxu0 %vm89_vm0, %v6449_v54  ;;  %9051 = vmatprep.subr.bf16.mxu1 %v9050_v0 }
0x1381   :  { %6628 = vmatprep.mubr.f32.mxu0 %v9503_v52 }
0x1383   :  { %9053 = vmatpush3.bf16.msra.mxu1 %v9050_v0 }
0x1384   :  { %7455 = vmatmul.mubr.msk.f32.gmra.mrb[168].mxu0 %vm89_vm0, %v6450_v24  ;;  %9055 = vmatprep.subr.bf16.mxu1 %v9054_v41 }
0x1385   :  { %6634 = vmatprep.mubr.f32.mxu0 %v9503_v52 }
0x1387   :  { %9057 = vmatpush3.bf16.msra.mxu1 %v9054_v41 }
0x1388   :  { %7456 = vmatmul.mubr.msk.f32.gmra.mrb[170].mxu0 %vm89_vm0, %v6451_v48  ;;  %9059 = vmatprep.subr.bf16.mxu1 %v9058_v19 }
0x1389   :  { %6640 = vmatprep.mubr.f32.mxu0 %v9503_v52 }
0x138b   :  { %9061 = vmatpush3.bf16.msra.mxu1 %v9058_v19 }
0x138c   :  { %9063 = vmatprep.subr.bf16.mxu1 %v9062_v21 }
0x138f   :  { %9065 = vmatpush3.bf16.msra.mxu1 %v9062_v21 }
0x1390   :  { %9067 = vmatprep.subr.bf16.mxu1 %v9066_v53 }
0x1393   :  { %9069 = vmatpush3.bf16.msra.mxu1 %v9066_v53 }
0x13da   :  { %v6333_v5 = vpop.xlane.xlu1 %6332 }
0x13db   :  { %v6361_v6 = vmul.f32 0.03125, %v6333_v5  ;;  %v6330_v1 = vpop.xlane.xlu0 %6329 }
0x13dc   :  { %v6360_v34 = vmul.f32 0.03125, %v6330_v1 }
0x13dd   :  { %v6377_v61 = vadd.f32 1e-05, %v6361_v6 }
0x13de   :  { %v6376_v35 = vadd.f32 1e-05, %v6360_v34  ;;  %v6339_v27 = vpop.xlane.xlu1 %6338 }
0x13df   :  { %9439 = vrsqrt.f32 %v6377_v61  ;;  %v6363_v54 = vmul.f32 0.03125, %v6339_v27  ;;  %v6336_v25 = vpop.xlane.xlu0 %6335 }
0x13e0   :  { %9441 = vrsqrt.f32 %v6376_v35  ;;  %v6362_v59 = vmul.f32 0.03125, %v6336_v25 }
0x13e1   :  { %v6379_v24 = vadd.f32 1e-05, %v6363_v54 }
0x13e2   :  { %v6378_v30 = vadd.f32 1e-05, %v6362_v59  ;;  %v6345_v48 = vpop.xlane.xlu1 %6344 }
0x13e3   :  { %v6342_v29 = vpop.xlane.xlu0 %6341  ;;  %v6365_v17 = vmul.f32 0.03125, %v6345_v48  ;;  %v6470_v48 = vlaneseq }
0x13e4   :  { %9443 = vrsqrt.f32 %v6378_v30  ;;  %v6364_v39 = vmul.f32 0.03125, %v6342_v29 }
0x13e5   :  { %9445 = vrsqrt.f32 %v6379_v24  ;;  %v6381_v37 = vadd.f32 1e-05, %v6365_v17  ;;  %v6471_v29 = vshrl.u32 %v6470_v48, 7 }
0x13e6   :  { %v6380_v44 = vadd.f32 1e-05, %v6364_v39  ;;  %v6351_v16 = vpop.xlane.xlu1 %6350 }
0x13e7   :  { %v6348_v36 = vpop.xlane.xlu0 %6347  ;;  %v6367_v41 = vmul.f32 0.03125, %v6351_v16  ;;  %v6476_v39 = vsub.s32 1, %v6471_v29 }
0x13e8   :  { %9447 = vrsqrt.f32 %v6380_v44  ;;  %v6366_v26 = vmul.f32 0.03125, %v6348_v36 }
0x13e9   :  { %v9440_v13 = vpop.eup %9439  ;;  %9449 = vrsqrt.f32 %v6381_v37  ;;  %v6383_v5 = vadd.f32 1e-05, %v6367_v41 }
0x13ea   :  { %v9442_v31 = vpop.eup %9441  ;;  %v6409_v0 = vmul.f32 %v9440_v13, %v11824_v7  ;;  %v6382_v62 = vadd.f32 1e-05, %v6366_v26 }
0x13eb   :  { %v6408_v10 = vmul.f32 %v9442_v31, %v11827_v46 }
0x13ec   :  { %v6431_v19 = vmul.f32 %v11874_v60, %v6409_v0  ;;  %9451 = vrsqrt.f32 %v6382_v62 }
0x13ed   :  { %v6430_v11 = vmul.f32 %v11874_v60, %v6408_v10  ;;  %9453 = vrsqrt.f32 %v6383_v5 }
0x13ee   :  { %v9444_v51 = vpop.eup %9443  ;;  %v6453_v7 = vadd.f32 %v11881_v49, %v6431_v19 }
0x13ef   :  { %v6452_v57 = vadd.f32 %v11881_v49, %v6430_v11  ;;  %v6410_v2 = vmul.f32 %v9444_v51, %v11838_v42  ;;  %v9446_v12 = vpop.eup %9445 }
0x13f0   :  { %v6411_v21 = vmul.f32 %v9446_v12, %v11834_v45 }
0x13f1   :  { %7457 = vmatmul.mubr.msk.f32.gmra.mrb[172].mxu0 %vm89_vm0, %v6452_v57  ;;  %v6432_v46 = vmul.f32 %v11874_v60, %v6410_v2 }
0x13f2   :  { %6646 = vmatprep.mubr.f32.mxu0 %v9503_v52  ;;  %v9448_v6 = vpop.eup %9447  ;;  %v6433_v1 = vmul.f32 %v11874_v60, %v6411_v21 }
0x13f3   :  { %v6454_v42 = vadd.f32 %v11881_v49, %v6432_v46  ;;  %v6412_v34 = vmul.f32 %v9448_v6, %v11850_v14  ;;  %v9450_v61 = vpop.eup %9449 }
0x13f4   :  { %v6455_v58 = vadd.f32 %v11881_v49, %v6433_v1  ;;  %v6413_v3 = vmul.f32 %v9450_v61, %v11846_v63 }
0x13f5   :  { %7458 = vmatmul.mubr.msk.f32.gmra.mrb[174].mxu0 %vm89_vm0, %v6453_v7  ;;  %v6434_v45 = vmul.f32 %v11874_v60, %v6412_v34 }
0x13f6   :  { %6652 = vmatprep.mubr.f32.mxu0 %v9503_v52  ;;  %v9452_v35 = vpop.eup %9451  ;;  %v6435_v14 = vmul.f32 %v11874_v60, %v6413_v3  ;;  %v6472_v3 = vsub.s32 0, %v6471_v29 }
0x13f7   :  { %v6456_v27 = vadd.f32 %v11881_v49, %v6434_v45  ;;  %v6414_v53 = vmul.f32 %v9452_v35, %v11862_v23  ;;  %v9454_v54 = vpop.eup %9453 }
0x13f8   :  { %v6457_v25 = vadd.f32 %v11881_v49, %v6435_v14  ;;  %v6415_v59 = vmul.f32 %v9454_v54, %v11858_v15  ;;  %v6468_v15 = vld [vmem:[%s12262_s19] sm:$0x3] }
0x13f9   :  { %7459 = vmatmul.mubr.msk.f32.gmra.mrb[176].mxu0 %vm89_vm0, %v6454_v42  ;;  %v6436_v63 = vmul.f32 %v11874_v60, %v6414_v53  ;;  %v12011_v17 = vrot.slane %v6468_v15, %v6476_v39 }
0x13fa   :  { %6658 = vmatprep.mubr.f32.mxu0 %v9503_v52  ;;  %v6437_v30 = vmul.f32 %v11874_v60, %v6415_v59 }
0x13fb   :  { %v6458_v24 = vadd.f32 %v11881_v49, %v6436_v63 }
0x13fc   :  { %v6459_v23 = vadd.f32 %v11881_v49, %v6437_v30 }
0x13fd   :  { %7460 = vmatmul.mubr.msk.f32.gmra.mrb[178].mxu0 %vm89_vm0, %v6455_v58 }
0x13fe   :  { %6664 = vmatprep.mubr.f32.mxu0 %v9503_v52 }
0x1401   :  { %7461 = vmatmul.mubr.msk.f32.gmra.mrb[180].mxu0 %vm89_vm0, %v6456_v27 }
0x1402   :  { %6670 = vmatprep.mubr.f32.mxu0 %v9503_v52 }
0x1405   :  { %7462 = vmatmul.mubr.msk.f32.gmra.mrb[182].mxu0 %vm89_vm0, %v6457_v25 }
0x1406   :  { %6676 = vmatprep.mubr.f32.mxu0 %v9503_v52 }
0x1409   :  { %7463 = vmatmul.mubr.msk.f32.gmra.mrb[184].mxu0 %vm89_vm0, %v6458_v24  ;;  %v12047_v24 = vrot.slane %v6468_v15, %v6472_v3 }
0x140a   :  { %6682 = vmatprep.mubr.f32.mxu0 %v9503_v52 }
0x140d   :  { %7464 = vmatmul.mubr.msk.f32.gmra.mrb[186].mxu0 %vm89_vm0, %v6459_v23 }
0x143f   :  { %v6594_v44 = vpop.f32.mrb[156].mxu0 }
0x1440   :  { %v6596_v36 = vpop.f32.mrb[157].mxu0 }
0x1441   :  { %v6597_v60 = vadd.f32 %v6596_v36, %v12011_v17 }
0x1443   :  { %v6705_v13 = vmul.f32 0.044715, %v6597_v60  ;;  %v12014_v31 = vpop.f32.mrb[158].mxu0 }
0x1444   :  { %v6602_v52 = vpop.f32.mrb[159].mxu0 }
0x1445   :  { %v6721_v49 = vmul.f32 %v6705_v13, %v6597_v60  ;;  %v6603_v37 = vadd.f32 %v6602_v52, %v12011_v17  ;;  %v6689_v13 = vmul.f32 0.5, %v6597_v60 }
0x1447   :  { %v6737_v26 = vmul.f32 %v6721_v49, %v6597_v60  ;;  %v6706_v16 = vmul.f32 0.044715, %v6603_v37  ;;  %v12017_v10 = vpop.f32.mrb[160].mxu0 }
0x1448   :  { %v6608_v0 = vpop.f32.mrb[161].mxu0 }
0x1449   :  { %v6722_v11 = vmul.f32 %v6706_v16, %v6603_v37  ;;  %v12020_v51 = vadd.f32 %v6608_v0, %v12011_v17  ;;  %v6753_v41 = vadd.f32 %v6737_v26, %v6597_v60  ;;  %v6595_v16 = vadd.f32 %v6594_v44, %v12047_v24 }
0x144b   :  { %v6738_v62 = vmul.f32 %v6722_v11, %v6603_v37  ;;  %v6707_v57 = vmul.f32 0.044715, %v12020_v51  ;;  %v12023_v19 = vpop.f32.mrb[162].mxu0  ;;  %v6769_v2 = vmul.f32 0.7978846, %v6753_v41 }
0x144c   :  { %v6614_v12 = vpop.f32.mrb[163].mxu0 }
0x144d   :  { %v6754_v5 = vadd.f32 %v6738_v62, %v6603_v37  ;;  %v6723_v7 = vmul.f32 %v6707_v57, %v12020_v51  ;;  %v12027_v46 = vadd.f32 %v6614_v12, %v12011_v17  ;;  %9455 = vtanh.f32 %v6769_v2 }
0x144e   :  { %v6690_v2 = vmul.f32 0.5, %v6603_v37 }
0x144f   :  { %v6770_v21 = vmul.f32 0.7978846, %v6754_v5  ;;  %v6739_v6 = vmul.f32 %v6723_v7, %v12020_v51  ;;  %v6708_v42 = vmul.f32 0.044715, %v12027_v46  ;;  %v12031_v1 = vpop.f32.mrb[164].mxu0 }
0x1450   :  { %v6620_v34 = vpop.f32.mrb[165].mxu0 }
0x1451   :  { %9457 = vtanh.f32 %v6770_v21  ;;  %v6724_v61 = vmul.f32 %v6708_v42, %v12027_v46  ;;  %v12035_v58 = vadd.f32 %v6620_v34, %v12011_v17  ;;  %v6755_v45 = vadd.f32 %v6739_v6, %v12020_v51 }
0x1452   :  { %v6601_v42 = vadd.f32 %v12014_v31, %v12047_v24 }
0x1453   :  { %v6740_v35 = vmul.f32 %v6724_v61, %v12027_v46  ;;  %v6709_v27 = vmul.f32 0.044715, %v12035_v58  ;;  %v12040_v14 = vpop.f32.mrb[166].mxu0  ;;  %v6771_v53 = vmul.f32 0.7978846, %v6755_v45 }
0x1454   :  { %v6626_v54 = vpop.f32.mrb[167].mxu0 }
0x1455   :  { %v6725_v25 = vmul.f32 %v6709_v27, %v12035_v58  ;;  %v12044_v63 = vadd.f32 %v6626_v54, %v12011_v17  ;;  %9459 = vtanh.f32 %v6771_v53  ;;  %v6756_v59 = vadd.f32 %v6740_v35, %v12027_v46 }
0x1456   :  { %v6691_v27 = vmul.f32 0.5, %v12020_v51  ;;  %v6613_v51 = vadd.f32 %v12023_v19, %v12047_v24  ;;  %v6625_v19 = vadd.f32 %v12040_v14, %v12047_v24 }
0x1457   :  { %v9456_v30 = vpop.eup %9455  ;;  %v6741_v23 = vmul.f32 %v6725_v25, %v12035_v58  ;;  %v6710_v48 = vmul.f32 0.044715, %v12044_v63  ;;  %v12051_v29 = vpop.f32.mrb[168].mxu0  ;;  %v6772_v39 = vmul.f32 0.7978846, %v6756_v59  ;;  %v6607_v59 = vadd.f32 %v12017_v10, %v12047_v24 }
0x1458   :  { %v6632_v36 = vpop.f32.mrb[169].mxu0  ;;  %v6801_v52 = vadd.f32 1.0, %v9456_v30  ;;  %v6693_v10 = vmul.f32 0.5, %v12035_v58 }
0x1459   :  { %v6726_v49 = vmul.f32 %v6710_v48, %v12044_v63  ;;  %v12055_v26 = vadd.f32 %v6632_v36, %v12011_v17  ;;  %9461 = vtanh.f32 %v6772_v39  ;;  %v6757_v15 = vadd.f32 %v6741_v23, %v12035_v58 }
0x145a   :  { %v6817_v0 = vmul.f32 %v6801_v52, %v6689_v13  ;;  %v6692_v36 = vmul.f32 0.5, %v12027_v46 }
0x145b   :  { %v9458_v11 = vpop.eup %9457  ;;  %v6742_v41 = vmul.f32 %v6726_v49, %v12044_v63  ;;  %v6711_v62 = vmul.f32 0.044715, %v12055_v26  ;;  %v12061_v57 = vpop.f32.mrb[170].mxu0  ;;  %v6773_v60 = vmul.f32 0.7978846, %v6757_v15  ;;  %v6695_v58 = vmul.f32 0.5, %v12055_v26 }
0x145c   :  { %v6638_v12 = vpop.f32.mrb[171].mxu0  ;;  %v6833_v5 = vmul.f32 %v6817_v0, %v6595_v16  ;;  %v6802_v7 = vadd.f32 1.0, %v9458_v11 }
0x145d   :  { %v6727_v21 = vmul.f32 %v6711_v62, %v12055_v26  ;;  %v6639_v6 = vadd.f32 %v6638_v12, %v12011_v17  ;;  %9463 = vtanh.f32 %v6773_v60  ;;  %v6758_v44 = vadd.f32 %v6742_v41, %v12044_v63 }
0x145e   :  { %8734 = vmatprep.mubr.f32.mxu1 %v6833_v5  ;;  %v6818_v34 = vmul.f32 %v6802_v7, %v6690_v2  ;;  %v6619_v41 = vadd.f32 %v12031_v1, %v12047_v24  ;;  %v6694_v2 = vmul.f32 0.5, %v12044_v63  ;;  %v6631_v1 = vadd.f32 %v12051_v29, %v12047_v24 }
0x145f   :  { %v9460_v61 = vpop.eup %9459  ;;  %v6743_v45 = vmul.f32 %v6727_v21, %v12055_v26  ;;  %v6712_v3 = vmul.f32 0.044715, %v6639_v6  ;;  %v6774_v37 = vmul.f32 0.7978846, %v6758_v44 }
0x1460   :  { %v6834_v35 = vmul.f32 %v6818_v34, %v6601_v42  ;;  %v6803_v53 = vadd.f32 1.0, %v9460_v61 }
0x1461   :  { %v6728_v54 = vmul.f32 %v6712_v3, %v6639_v6  ;;  %9465 = vtanh.f32 %v6774_v37  ;;  %v6759_v25 = vadd.f32 %v6743_v45, %v12055_v26  ;;  %v6696_v45 = vmul.f32 0.5, %v6639_v6 }
0x1462   :  { %8735 = vmatmul.mubr.f32.vlgmr.msra.gmra.mrb[140].mxu1 %v6834_v35  ;;  %v6819_v31 = vmul.f32 %v6803_v53, %v6691_v27  ;;  %v6637_v3 = vadd.f32 %v12061_v57, %v12047_v24 }
0x1463   :  { %v9462_v30 = vpop.eup %9461  ;;  %v6744_v23 = vmul.f32 %v6728_v54, %v6639_v6  ;;  %v6775_v48 = vmul.f32 0.7978846, %v6759_v25 }
0x1464   :  { %v6835_v39 = vmul.f32 %v6819_v31, %v6607_v59  ;;  %v6804_v13 = vadd.f32 1.0, %v9462_v30 }
0x1465   :  { %9467 = vtanh.f32 %v6775_v48  ;;  %v6760_v52 = vadd.f32 %v6744_v23, %v6639_v6 }
0x1466   :  { %8737 = vmatprep.mubr.f32.mxu1 %v6835_v39  ;;  %v6820_v49 = vmul.f32 %v6804_v13, %v6692_v36 }
0x1467   :  { %v9464_v15 = vpop.eup %9463  ;;  %v6776_v16 = vmul.f32 0.7978846, %v6760_v52 }
0x1468   :  { %v6836_v0 = vmul.f32 %v6820_v49, %v6613_v51  ;;  %v6805_v11 = vadd.f32 1.0, %v9464_v15 }
0x1469   :  { %9469 = vtanh.f32 %v6776_v16 }
0x146a   :  { %8738 = vmatmul.mubr.f32.gmra.mrb[142].mxu1 %v6836_v0  ;;  %v6821_v46 = vmul.f32 %v6805_v11, %v6693_v10 }
0x146b   :  { %v9466_v62 = vpop.eup %9465 }
0x146c   :  { %v6837_v60 = vmul.f32 %v6821_v46, %v6619_v41  ;;  %v6806_v12 = vadd.f32 1.0, %v9466_v62 }
0x146e   :  { %8740 = vmatprep.mubr.f32.mxu1 %v6837_v60  ;;  %v6822_v5 = vmul.f32 %v6806_v12, %v6694_v2 }
0x146f   :  { %v9468_v7 = vpop.eup %9467 }
0x1470   :  { %v6838_v21 = vmul.f32 %v6822_v5, %v6625_v19  ;;  %v6807_v44 = vadd.f32 1.0, %v9468_v7 }
0x1472   :  { %8741 = vmatmul.mubr.f32.gmra.mrb[144].mxu1 %v6838_v21  ;;  %v6823_v42 = vmul.f32 %v6807_v44, %v6695_v58 }
0x1473   :  { %v9470_v34 = vpop.eup %9469 }
0x1474   :  { %v6839_v61 = vmul.f32 %v6823_v42, %v6631_v1  ;;  %v6808_v63 = vadd.f32 1.0, %v9470_v34 }
0x1476   :  { %8743 = vmatprep.mubr.f32.mxu1 %v6839_v61  ;;  %v6824_v14 = vmul.f32 %v6808_v63, %v6696_v45 }
0x1478   :  { %v6840_v37 = vmul.f32 %v6824_v14, %v6637_v3 }
0x147a   :  { %8744 = vmatmul.mubr.f32.gmra.mrb[146].mxu1 %v6840_v37 }
0x14c4   :  { %v6642_v35 = vpop.f32.mrb[172].mxu0 }
0x14c5   :  { %v6644_v27 = vpop.f32.mrb[173].mxu0 }
0x14c6   :  { %v6645_v26 = vadd.f32 %v6644_v27, %v12011_v17 }
0x14c8   :  { %v6713_v53 = vmul.f32 0.044715, %v6645_v26  ;;  %v12088_v54 = vpop.f32.mrb[174].mxu0  ;;  %v6697_v37 = vmul.f32 0.5, %v6645_v26 }
0x14c9   :  { %v6650_v29 = vpop.f32.mrb[175].mxu0 }
0x14ca   :  { %v6729_v25 = vmul.f32 %v6713_v53, %v6645_v26  ;;  %v6651_v59 = vadd.f32 %v6650_v29, %v12011_v17 }
0x14cc   :  { %v6745_v6 = vmul.f32 %v6729_v25, %v6645_v26  ;;  %v6714_v31 = vmul.f32 0.044715, %v6651_v59  ;;  %v12091_v30 = vpop.f32.mrb[176].mxu0 }
0x14cd   :  { %v6656_v57 = vpop.f32.mrb[177].mxu0 }
0x14ce   :  { %v6730_v23 = vmul.f32 %v6714_v31, %v6651_v59  ;;  %v12094_v48 = vadd.f32 %v6656_v57, %v12011_v17  ;;  %v6761_v39 = vadd.f32 %v6745_v6, %v6645_v26  ;;  %v6643_v6 = vadd.f32 %v6642_v35, %v12047_v24 }
0x14d0   :  { %v6746_v36 = vmul.f32 %v6730_v23, %v6651_v59  ;;  %v6715_v13 = vmul.f32 0.044715, %v12094_v48  ;;  %v12097_v52 = vpop.f32.mrb[178].mxu0  ;;  %v6777_v51 = vmul.f32 0.7978846, %v6761_v39 }
0x14d1   :  { %v6662_v49 = vpop.f32.mrb[179].mxu0 }
0x14d2   :  { %v6731_v15 = vmul.f32 %v6715_v13, %v12094_v48  ;;  %v12101_v16 = vadd.f32 %v6662_v49, %v12011_v17  ;;  %9471 = vtanh.f32 %v6777_v51  ;;  %v6762_v0 = vadd.f32 %v6746_v36, %v6651_v59 }
0x14d3   :  { %v6698_v49 = vmul.f32 0.5, %v6651_v59  ;;  %v6699_v59 = vmul.f32 0.5, %v12094_v48 }
0x14d4   :  { %v6747_v10 = vmul.f32 %v6731_v15, %v12094_v48  ;;  %v6716_v11 = vmul.f32 0.044715, %v12101_v16  ;;  %v12105_v41 = vpop.f32.mrb[180].mxu0  ;;  %v6778_v46 = vmul.f32 0.7978846, %v6762_v0 }
0x14d5   :  { %v6668_v62 = vpop.f32.mrb[181].mxu0 }
0x14d6   :  { %v6732_v60 = vmul.f32 %v6716_v11, %v12101_v16  ;;  %v12109_v2 = vadd.f32 %v6668_v62, %v12011_v17  ;;  %9473 = vtanh.f32 %v6778_v46  ;;  %v6763_v12 = vadd.f32 %v6747_v10, %v12094_v48 }
0x14d7   :  { %v6649_v11 = vadd.f32 %v12088_v54, %v12047_v24  ;;  %v6661_v48 = vadd.f32 %v12097_v52, %v12047_v24 }
0x14d8   :  { %v6748_v19 = vmul.f32 %v6732_v60, %v12101_v16  ;;  %v6717_v5 = vmul.f32 0.044715, %v12109_v2  ;;  %v12114_v7 = vpop.f32.mrb[182].mxu0  ;;  %v6779_v21 = vmul.f32 0.7978846, %v6763_v12 }
0x14d9   :  { %v6674_v58 = vpop.f32.mrb[183].mxu0  ;;  %v6673_v52 = vadd.f32 %v12114_v7, %v12047_v24 }
0x14da   :  { %v6733_v44 = vmul.f32 %v6717_v5, %v12109_v2  ;;  %v12118_v1 = vadd.f32 %v6674_v58, %v12011_v17  ;;  %9475 = vtanh.f32 %v6779_v21  ;;  %v6764_v42 = vadd.f32 %v6748_v19, %v12101_v16 }
0x14dc   :  { %v9472_v34 = vpop.eup %9471  ;;  %v6749_v61 = vmul.f32 %v6733_v44, %v12109_v2  ;;  %v6718_v45 = vmul.f32 0.044715, %v12118_v1  ;;  %v12123_v63 = vpop.f32.mrb[184].mxu0  ;;  %v6780_v3 = vmul.f32 0.7978846, %v6764_v42  ;;  %v6655_v44 = vadd.f32 %v12091_v30, %v12047_v24 }
0x14dd   :  { %v6680_v14 = vpop.f32.mrb[185].mxu0  ;;  %v6809_v27 = vadd.f32 1.0, %v9472_v34  ;;  %v6701_v30 = vmul.f32 0.5, %v12109_v2 }
0x14de   :  { %v6734_v53 = vmul.f32 %v6718_v45, %v12118_v1  ;;  %v12127_v29 = vadd.f32 %v6680_v14, %v12011_v17  ;;  %9477 = vtanh.f32 %v6780_v3  ;;  %v6765_v25 = vadd.f32 %v6749_v61, %v12109_v2 }
0x14df   :  { %v6825_v31 = vmul.f32 %v6809_v27, %v6697_v37  ;;  %v6700_v3 = vmul.f32 0.5, %v12101_v16 }
0x14e0   :  { %v9474_v57 = vpop.eup %9473  ;;  %v6750_v23 = vmul.f32 %v6734_v53, %v12118_v1  ;;  %v6719_v39 = vmul.f32 0.044715, %v12127_v29  ;;  %v12133_v36 = vpop.f32.mrb[186].mxu0  ;;  %v6781_v26 = vmul.f32 0.7978846, %v6765_v25  ;;  %v6703_v2 = vmul.f32 0.5, %v12127_v29 }
0x14e1   :  { %v6686_v13 = vpop.f32.mrb[187].mxu0  ;;  %v6841_v51 = vmul.f32 %v6825_v31, %v6643_v6  ;;  %v6810_v15 = vadd.f32 1.0, %v9474_v57  ;;  %v6667_v57 = vadd.f32 %v12105_v41, %v12047_v24  ;;  %v6679_v41 = vadd.f32 %v12123_v63, %v12047_v24 }
0x14e2   :  { %v6735_v0 = vmul.f32 %v6719_v39, %v12127_v29  ;;  %v6687_v10 = vadd.f32 %v6686_v13, %v12011_v17  ;;  %9479 = vtanh.f32 %v6781_v26  ;;  %v6766_v35 = vadd.f32 %v6750_v23, %v12118_v1 }
0x14e3   :  { %8746 = vmatprep.mubr.f32.mxu1 %v6841_v51  ;;  %v6826_v46 = vmul.f32 %v6810_v15, %v6698_v49  ;;  %v6702_v26 = vmul.f32 0.5, %v12118_v1 }
0x14e4   :  { %v9476_v62 = vpop.eup %9475  ;;  %v6751_v60 = vmul.f32 %v6735_v0, %v12127_v29  ;;  %v6720_v12 = vmul.f32 0.044715, %v6687_v10  ;;  %v6782_v19 = vmul.f32 0.7978846, %v6766_v35 }
0x14e5   :  { %v6842_v5 = vmul.f32 %v6826_v46, %v6649_v11  ;;  %v6811_v21 = vadd.f32 1.0, %v9476_v62  ;;  %v6704_v62 = vmul.f32 0.5, %v6687_v10 }
0x14e6   :  { %v6736_v58 = vmul.f32 %v6720_v12, %v6687_v10  ;;  %9481 = vtanh.f32 %v6782_v19  ;;  %v6767_v17 = vadd.f32 %v6751_v60, %v12127_v29  ;;  %v6685_v60 = vadd.f32 %v12133_v36, %v12047_v24  ;;  %v7465_v29 = vld [vmem:[%s12263_s21] ss:$0 sm:$0xff] }
0x14e7   :  { %8747 = vmatmul.mubr.f32.gmra.mrb[148].mxu1 %v6842_v5  ;;  %v6827_v54 = vmul.f32 %v6811_v21, %v6699_v59 }
0x14e8   :  { %v9478_v42 = vpop.eup %9477  ;;  %v6752_v34 = vmul.f32 %v6736_v58, %v6687_v10  ;;  %v6783_v61 = vmul.f32 0.7978846, %v6767_v17 }
0x14e9   :  { %v6843_v45 = vmul.f32 %v6827_v54, %v6655_v44  ;;  %v6812_v14 = vadd.f32 1.0, %v9478_v42 }
0x14ea   :  { %9483 = vtanh.f32 %v6783_v61  ;;  %v6768_v37 = vadd.f32 %v6752_v34, %v6687_v10 }
0x14eb   :  { %8749 = vmatprep.mubr.f32.mxu1 %v6843_v45  ;;  %v6828_v27 = vmul.f32 %v6812_v14, %v6700_v3 }
0x14ec   :  { %v9480_v53 = vpop.eup %9479  ;;  %v6784_v25 = vmul.f32 0.7978846, %v6768_v37 }
0x14ed   :  { %v6844_v6 = vmul.f32 %v6828_v27, %v6661_v48  ;;  %v6813_v31 = vadd.f32 1.0, %v9480_v53 }
0x14ee   :  { %9485 = vtanh.f32 %v6784_v25 }
0x14ef   :  { %8750 = vmatmul.mubr.f32.gmra.mrb[150].mxu1 %v6844_v6  ;;  %v6829_v16 = vmul.f32 %v6813_v31, %v6701_v30 }
0x14f0   :  { %v9482_v23 = vpop.eup %9481 }
0x14f1   :  { %v6845_v39 = vmul.f32 %v6829_v16, %v6667_v57  ;;  %v6814_v13 = vadd.f32 1.0, %v9482_v23 }
0x14f3   :  { %8752 = vmatprep.mubr.f32.mxu1 %v6845_v39  ;;  %v6830_v51 = vmul.f32 %v6814_v13, %v6702_v26 }
0x14f4   :  { %v9484_v49 = vpop.eup %9483 }
0x14f5   :  { %v6846_v15 = vmul.f32 %v6830_v51, %v6673_v52  ;;  %v6815_v0 = vadd.f32 1.0, %v9484_v49 }
0x14f7   :  { %8753 = vmatmul.mubr.f32.gmra.mrb[152].mxu1 %v6846_v15  ;;  %v6831_v35 = vmul.f32 %v6815_v0, %v6703_v2 }
0x14f8   :  { %v9486_v11 = vpop.eup %9485 }
0x14f9   :  { %v6847_v46 = vmul.f32 %v6831_v35, %v6679_v41  ;;  %v6816_v1 = vadd.f32 1.0, %v9486_v11 }
0x14fb   :  { %8755 = vmatprep.mubr.f32.mxu1 %v6847_v46  ;;  %v6832_v7 = vmul.f32 %v6816_v1, %v6704_v62 }
0x14fd   :  { %v6848_v12 = vmul.f32 %v6832_v7, %v6685_v60 }
0x14ff   :  { %8756 = vmatmul.mubr.f32.gmra.mrb[154].mxu1 %v6848_v12 }
0x1535   :  { %v8736_v19 = vpop.f32.mrb[140].mxu1 }
0x1536   :  { %v6944_v5 = vadd.f32 %v8736_v19, %v7465_v29  ;;  %v6938_v63 = vpop.f32.mrb[141].mxu1 }
0x1537   :  { %v6939_v59 = vadd.f32 %v7465_v29, %v6938_v63 }
0x1538   :  { %v7018_v21 = vadd.f32 %v6944_v5, %v11657_v20 }
0x1539   :  { %v7017_v10 = vadd.f32 %v6939_v59, %v11660_v28 }
0x153a   :  { %7034 = vst.msk [vmem:[%s12264_s22 + $0x8] sm:$0xff] %vm89_vm0, %v7018_v21 }
0x153b   :  { %7033 = vst.msk [vmem:[%s12264_s22] sm:$0xff] %vm89_vm0, %v7017_v10 }
0x153d   :  { %v8739_v24 = vpop.f32.mrb[142].mxu1 }
0x153e   :  { %v6954_v36 = vadd.f32 %v8739_v24, %v7465_v29  ;;  %v6948_v58 = vpop.f32.mrb[143].mxu1 }
0x153f   :  { %v6949_v17 = vadd.f32 %v7465_v29, %v6948_v58 }
0x1540   :  { %v7020_v44 = vadd.f32 %v6954_v36, %v11669_v33 }
0x1541   :  { %v7019_v20 = vadd.f32 %v6949_v17, %v11672_v8 }
0x1542   :  { %7036 = vst.msk [vmem:[%s12264_s22 + $0x18] sm:$0xff] %vm89_vm0, %v7020_v44 }
0x1543   :  { %7035 = vst.msk [vmem:[%s12264_s22 + $0x10] sm:$0xff] %vm89_vm0, %v7019_v20 }
0x1545   :  { %v8742_v28 = vpop.f32.mrb[144].mxu1 }
0x1546   :  { %v6964_v54 = vadd.f32 %v8742_v28, %v7465_v29  ;;  %v6958_v42 = vpop.f32.mrb[145].mxu1 }
0x1547   :  { %v6959_v34 = vadd.f32 %v7465_v29, %v6958_v42 }
0x1548   :  { %v7022_v61 = vadd.f32 %v6964_v54, %v11681_v43 }
0x1549   :  { %v7021_v33 = vadd.f32 %v6959_v34, %v11684_v40 }
0x154a   :  { %7038 = vst.msk [vmem:[%s12264_s22 + $0x28] sm:$0xff] %vm89_vm0, %v7022_v61 }
0x154b   :  { %7037 = vst.msk [vmem:[%s12264_s22 + $0x20] sm:$0xff] %vm89_vm0, %v7021_v33 }
0x154d   :  { %v8745_v8 = vpop.f32.mrb[146].mxu1 }
0x154e   :  { %v6974_v45 = vadd.f32 %v8745_v8, %v7465_v29  ;;  %v6968_v3 = vpop.f32.mrb[147].mxu1 }
0x154f   :  { %v6969_v14 = vadd.f32 %v7465_v29, %v6968_v3 }
0x1550   :  { %v7024_v37 = vadd.f32 %v6974_v45, %v11693_v55 }
0x1551   :  { %v7023_v43 = vadd.f32 %v6969_v14, %v11696_v56 }
0x1552   :  { %7040 = vst.msk [vmem:[%s12264_s22 + $0x38] sm:$0xff] %vm89_vm0, %v7024_v37 }
0x1553   :  { %7039 = vst.msk [vmem:[%s12264_s22 + $0x30] sm:$0xff] %vm89_vm0, %v7023_v43 }
0x15ba   :  { %v8748_v40 = vpop.f32.mrb[148].mxu1 }
0x15bb   :  { %v6984_v48 = vadd.f32 %v8748_v40, %v7465_v29  ;;  %v6978_v27 = vpop.f32.mrb[149].mxu1 }
0x15bc   :  { %v6979_v53 = vadd.f32 %v7465_v29, %v6978_v27 }
0x15bd   :  { %v7026_v25 = vadd.f32 %v6984_v48, %v11705_v47 }
0x15be   :  { %v7025_v55 = vadd.f32 %v6979_v53, %v11708_v38 }
0x15bf   :  { %7042 = vst.msk [vmem:[%s12264_s22 + $0x48] sm:$0xff] %vm89_vm0, %v7026_v25 }
0x15c0   :  { %7041 = vst.msk [vmem:[%s12264_s22 + $0x40] sm:$0xff] %vm89_vm0, %v7025_v55 }
0x15c2   :  { %v8751_v56 = vpop.f32.mrb[150].mxu1 }
0x15c3   :  { %v6994_v6 = vadd.f32 %v8751_v56, %v7465_v29  ;;  %v6988_v30 = vpop.f32.mrb[151].mxu1 }
0x15c4   :  { %v6989_v31 = vadd.f32 %v7465_v29, %v6988_v30 }
0x15c5   :  { %v7028_v57 = vadd.f32 %v6994_v6, %v11717_v9 }
0x15c6   :  { %v7027_v47 = vadd.f32 %v6989_v31, %v11720_v4 }
0x15c7   :  { %7044 = vst.msk [vmem:[%s12264_s22 + $0x58] sm:$0xff] %vm89_vm0, %v7028_v57 }
0x15c8   :  { %7043 = vst.msk [vmem:[%s12264_s22 + $0x50] sm:$0xff] %vm89_vm0, %v7027_v47 }
0x15ca   :  { %v8754_v38 = vpop.f32.mrb[152].mxu1 }
0x15cb   :  { %v7004_v16 = vadd.f32 %v8754_v38, %v7465_v29  ;;  %v6998_v23 = vpop.f32.mrb[153].mxu1 }
0x15cc   :  { %v6999_v39 = vadd.f32 %v7465_v29, %v6998_v23 }
0x15cd   :  { %v7030_v26 = vadd.f32 %v7004_v16, %v11729_v50 }
0x15ce   :  { %v7029_v9 = vadd.f32 %v6999_v39, %v11732_v32 }
0x15cf   :  { %7046 = vst.msk [vmem:[%s12264_s22 + $0x68] sm:$0xff] %vm89_vm0, %v7030_v26 }
0x15d0   :  { %7045 = vst.msk [vmem:[%s12264_s22 + $0x60] sm:$0xff] %vm89_vm0, %v7029_v9 }
0x15d2   :  { %v8757_v4 = vpop.f32.mrb[154].mxu1 }
0x15d3   :  { %v7014_v13 = vadd.f32 %v8757_v4, %v7465_v29  ;;  %v7008_v52 = vpop.f32.mrb[155].mxu1 }
0x15d4   :  { %v7009_v51 = vadd.f32 %v7465_v29, %v7008_v52 }
0x15d5   :  { %v7032_v49 = vadd.f32 %v7014_v13, %v11747_v18 }
0x15d6   :  { %v7031_v50 = vadd.f32 %v7009_v51, %v11750_v22 }
0x15d7   :  { %7048 = vst.msk [vmem:[%s12264_s22 + $0x78] sm:$0xff] %vm89_vm0, %v7032_v49 }
0x15d8   :  { %7047 = vst.msk [vmem:[%s12264_s22 + $0x70] sm:$0xff] %vm89_vm0, %v7031_v50 }

</bundles_post_ra>
